<compile_context>
chip_gen: v7x
topology: tpu7x:2x2x1
jax: 0.10.0
libtpu: 0.0.40
codegen_flags: <defaults>
</compile_context>

<pallas_src>
import math
import functools

import jax
import jax.numpy as jnp
from jax import lax
from jax.experimental import pallas as pl
from jax.experimental.pallas import tpu as pltpu

# ----- small shapes consistent with the module's forward ---------------------
B = 8               # batch
N_SEQ = 16          # tokens per sample
D = 256             # embed dim (module hard-codes 784; scaled down, same math)
HEADS = 2           # SimpleAttention default heads=2
DH = D // HEADS     # dim_head = 128 -> lane-aligned head slices
LN_EPS = 1e-5       # nn.LayerNorm default
L2_EPS = 1e-12      # F.normalize default
MXU_DTYPE = jnp.bfloat16   # matmul-input dtype (f32 accumulation everywhere)


# ------------------------------ shared math ----------------------------------
def _layernorm(x, g, b):
    mu = jnp.mean(x, axis=-1, keepdims=True)
    var = jnp.mean((x - mu) ** 2, axis=-1, keepdims=True)
    return (x - mu) * lax.rsqrt(var + LN_EPS) * g + b


def _hardswish(x):
    return x * jnp.clip(x + 3.0, 0.0, 6.0) * (1.0 / 6.0)


def _l2norm(x):
    # F.normalize(t, dim=-1, p=2): t / max(||t||, eps)  ==  t * rsqrt(max(ss, eps^2))
    ss = jnp.sum(x * x, axis=-1, keepdims=True)
    return x * lax.rsqrt(jnp.maximum(ss, L2_EPS * L2_EPS))


# --------------------------------- kernel ------------------------------------
def simple_attention_kernel(x_ref, g_ref, b_ref, wqkv_ref, bqkv_ref, scale_ref,
                            wffn_ref, bffn_ref, wout_ref, bout_ref, out_ref,
                            *, heads):
    f32 = jnp.float32
    bb, n, d = x_ref.shape
    dh = d // heads

    def mm(a2d, w_ref, bias_ref):
        # bf16 MXU inputs, f32 accumulation, f32 bias add.
        return jnp.dot(a2d.astype(MXU_DTYPE), w_ref[...],
                       preferred_element_type=f32) + bias_ref[...]

    # ---- x = self.norm(x) ----------------------------------------------------
    x = x_ref[...]                                            # (bb, n, d) f32
    xn = _layernorm(x, g_ref[...], b_ref[...])

    # ---- qkv = self.to_qkv(x) -------------------------------------------------
    rows = xn.reshape(bb * n, d)                              # one big MXU matmul
    qkv = mm(rows, wqkv_ref, bqkv_ref).reshape(bb, n, 3 * d)  # (bb, n, 3d) f32

    # ---- per-head cosine attention (heads are lane slices, no transposes) ----
    head_outs = []
    for h in range(heads):
        q = _l2norm(qkv[:, :, h * dh:(h + 1) * dh])                   # (bb, n, dh)
        k = _l2norm(qkv[:, :, d + h * dh:d + (h + 1) * dh])           # (bb, n, dh)
        v = qkv[:, :, 2 * d + h * dh:2 * d + (h + 1) * dh]            # (bb, n, dh)

        sim = jnp.einsum('bnd,bmd->bnm',
                         q.astype(MXU_DTYPE), k.astype(MXU_DTYPE),
                         preferred_element_type=f32)
        sim = sim * scale_ref[h]                       # per-head sqrt(scale), SMEM scalar

        sim = sim - jnp.max(sim, axis=-1, keepdims=True)
        e = jnp.exp(sim)
        denom = jnp.sum(e, axis=-1, keepdims=True)
        p = e * pl.reciprocal(denom, approx=True)      # EUP reciprocal (review item)

        o = jnp.einsum('bnm,bmd->bnd',
                       p.astype(MXU_DTYPE), v.astype(MXU_DTYPE),
                       preferred_element_type=f32)     # (bb, n, dh)
        head_outs.append(o)

    att = jnp.concatenate(head_outs, axis=-1)          # lane-axis merge, (bb, n, d)

    # ---- out = hardswish(norm(out)); out_ffn = ffn(out); to_out(out+out_ffn) --
    att = _hardswish(_layernorm(att, g_ref[...], b_ref[...]))
    rows2 = att.reshape(bb * n, d)
    out_ffn = _hardswish(mm(rows2, wffn_ref, bffn_ref))
    result = mm(rows2 + out_ffn, wout_ref, bout_ref)    # (bb*n, d)
    out_ref[...] = result.reshape(bb, n, d)


# --------------------------------- wrapper -----------------------------------
def prepare_params(params):
    """Reshape LN params / biases to (1, X), cast matmul weights to bf16,
    and pre-take sqrt(scale) as a per-head SMEM scalar table."""
    g, b, wqkv, bqkv, scale, wffn, bffn, wout, bout = params
    heads = scale.shape[0]
    return (g.reshape(1, -1), b.reshape(1, -1),
            wqkv.astype(MXU_DTYPE), bqkv.reshape(1, -1),
            jnp.sqrt(scale).reshape(heads).astype(jnp.float32),
            wffn.astype(MXU_DTYPE), bffn.reshape(1, -1),
            wout.astype(MXU_DTYPE), bout.reshape(1, -1))


def simple_attention_forward(x, params, *, num_blocks=2):
    """x: (B, N, D) float32.  Returns (B, N, D) float32.

    num_blocks = grid steps over the batch.  Default 2 -> one "parallel" step
    per v7x TensorCore; use num_blocks=1 on single-TC v5e / v6e (per review).
    """
    bsz, n, d = x.shape
    heads = params[4].shape[0]
    assert d % heads == 0 and bsz % num_blocks == 0
    bb = bsz // num_blocks
    kp = prepare_params(params)
    (g, bta, wqkv, bqkv, sqrt_scale, wffn, bffn, wout, bout) = kp

    def const2d(a):
        return pl.BlockSpec(a.shape, lambda i: (0, 0))

    in_specs = [
        pl.BlockSpec((bb, n, d), lambda i: (i, 0, 0)),          # x
        const2d(g), const2d(bta),
        const2d(wqkv), const2d(bqkv),
        pl.BlockSpec(memory_space=pltpu.MemorySpace.SMEM),      # sqrt(scale) per head
        const2d(wffn), const2d(bffn),
        const2d(wout), const2d(bout),
    ]
    out_spec = pl.BlockSpec((bb, n, d), lambda i: (i, 0, 0))    # dense (8,128)-aligned stores

    out = pl.pallas_call(
        functools.partial(simple_attention_kernel, heads=heads),
        out_shape=jax.ShapeDtypeStruct((bsz, n, d), jnp.float32),
        grid_spec=pltpu.PrefetchScalarGridSpec(
            num_scalar_prefetch=0,
            grid=(num_blocks,),
            in_specs=in_specs,
            out_specs=out_spec,
        ),
        compiler_params=pltpu.CompilerParams(
            dimension_semantics=("parallel",)),
    )(x, g, bta, wqkv, bqkv, sqrt_scale, wffn, bffn, wout, bout)
    return out


# --------------------------- pure-JAX reference ------------------------------
def simple_attention_reference(x, params, matmul_dtype=jnp.float32):
    """Reference forward.  matmul_dtype=bf16 mirrors the kernel's
    bf16-at-MXU-inputs / f32-accumulation policy; f32 is the full model."""
    g, b, wqkv, bqkv, scale, wffn, bffn, wout, bout = params
    bsz, n, d = x.shape
    heads = scale.shape[0]
    dh = d // heads

    def mm(a, w, bias):
        return jnp.dot(a.astype(matmul_dtype), w.astype(matmul_dtype),
                       precision=lax.Precision.HIGHEST,
                       preferred_element_type=jnp.float32) + bias

    xn = _layernorm(x, g, b)
    qkv = mm(xn, wqkv, bqkv)
    q, k, v = qkv[..., :d], qkv[..., d:2 * d], qkv[..., 2 * d:]

    def split_heads(t):                      # b n (h d) -> b h n d
        return t.reshape(bsz, n, heads, dh).transpose(0, 2, 1, 3)

    q, k, v = map(split_heads, (q, k, v))
    q, k = _l2norm(q), _l2norm(k)
    sim = jnp.einsum('bhnd,bhmd->bhnm',
                     q.astype(matmul_dtype), k.astype(matmul_dtype),
                     precision=lax.Precision.HIGHEST,
                     preferred_element_type=jnp.float32)
    sim = sim * jnp.sqrt(scale).reshape(1, heads, 1, 1)
    attn = jax.nn.softmax(sim, axis=-1)
    out = jnp.einsum('bhnm,bhmd->bhnd',
                     attn.astype(matmul_dtype), v.astype(matmul_dtype),
                     precision=lax.Precision.HIGHEST,
                     preferred_element_type=jnp.float32)
    out = out.transpose(0, 2, 1, 3).reshape(bsz, n, d)      # b h n d -> b n (h d)
    out = _hardswish(_layernorm(out, g, b))
    out_ffn = _hardswish(mm(out, wffn, bffn))
    return mm(out + out_ffn, wout, bout)


# --------------------------- deterministic params ----------------------------
def make_params(key):
    ks = jax.random.split(key, 8)
    s = 0.02
    g = 1.0 + s * jax.random.normal(ks[0], (D,), jnp.float32)
    b = s * jax.random.normal(ks[1], (D,), jnp.float32)
    wqkv = s * jax.random.normal(ks[2], (D, 3 * D), jnp.float32)
    bqkv = s * jax.random.normal(ks[3], (3 * D,), jnp.float32)
    scale = 0.01 * jnp.ones((HEADS, 1, 1), jnp.float32)      # module init value
    wffn = s * jax.random.normal(ks[4], (D, D), jnp.float32)
    bffn = s * jax.random.normal(ks[5], (D,), jnp.float32)
    wout = s * jax.random.normal(ks[6], (D, D), jnp.float32)
    bout = s * jax.random.normal(ks[7], (D,), jnp.float32)
    return (g, b, wqkv, bqkv, scale, wffn, bffn, wout, bout)


if __name__ == "__main__":
    key = jax.random.PRNGKey(0)
    params = make_params(key)
    x = jax.random.normal(jax.random.fold_in(key, 7), (B, N_SEQ, D), jnp.float32)

    out = jax.block_until_ready(simple_attention_forward(x, params, num_blocks=2))
    assert out.shape == (B, N_SEQ, D), out.shape

    # Check against a reference using the kernel's bf16-at-MXU / f32-accumulate
    # policy (realistic tolerance: two schedules of the same bf16 math).
    ref_mixed = simple_attention_reference(x, params, matmul_dtype=MXU_DTYPE)
    err_mixed = float(jnp.max(jnp.abs(out - ref_mixed)))
    assert err_mixed < 1e-2, err_mixed

    # Looser sanity check against the full-f32 model (bounds total bf16 error).
    ref_f32 = simple_attention_reference(x, params, matmul_dtype=jnp.float32)
    err_f32 = float(jnp.max(jnp.abs(out - ref_f32)))
    assert err_f32 < 6e-2, err_f32

    print("KERNEL_OK")
</pallas_src>

<mosaic_0001>
module attributes {stable_mosaic.version = 11 : i64} {
  func.func @simple_attention_kernel(%arg0: i32, %arg1: memref<4x16x256xf32, #tpu.memory_space<vmem>>, %arg2: memref<1x256xf32, #tpu.memory_space<vmem>>, %arg3: memref<1x256xf32, #tpu.memory_space<vmem>>, %arg4: memref<256x768xbf16, #tpu.memory_space<vmem>>, %arg5: memref<1x768xf32, #tpu.memory_space<vmem>>, %arg6: memref<2xf32, #tpu.memory_space<smem>>, %arg7: memref<256x256xbf16, #tpu.memory_space<vmem>>, %arg8: memref<1x256xf32, #tpu.memory_space<vmem>>, %arg9: memref<256x256xbf16, #tpu.memory_space<vmem>>, %arg10: memref<1x256xf32, #tpu.memory_space<vmem>>, %arg11: memref<4x16x256xf32, #tpu.memory_space<vmem>>) attributes {dimension_semantics = [#tpu.dimension_semantics<parallel>], iteration_bounds = array<i64: 2>, scalar_prefetch = 0 : i64, scratch_operands = 0 : i64, tpu.core_type = #tpu.core_type<tc>, window_params = [{transform_indices = @transform_0, window_bounds = array<i64: 4, 16, 256>}, {pipeline_mode = #tpu.pipeline_mode<synchronous>, transform_indices = @transform_1, window_bounds = array<i64: 1, 256>}, {pipeline_mode = #tpu.pipeline_mode<synchronous>, transform_indices = @transform_2, window_bounds = array<i64: 1, 256>}, {pipeline_mode = #tpu.pipeline_mode<synchronous>, transform_indices = @transform_3, window_bounds = array<i64: 256, 768>}, {pipeline_mode = #tpu.pipeline_mode<synchronous>, transform_indices = @transform_4, window_bounds = array<i64: 1, 768>}, {transform_indices = @transform_5, window_bounds = array<i64: 2>}, {pipeline_mode = #tpu.pipeline_mode<synchronous>, transform_indices = @transform_6, window_bounds = array<i64: 256, 256>}, {pipeline_mode = #tpu.pipeline_mode<synchronous>, transform_indices = @transform_7, window_bounds = array<i64: 1, 256>}, {pipeline_mode = #tpu.pipeline_mode<synchronous>, transform_indices = @transform_8, window_bounds = array<i64: 256, 256>}, {pipeline_mode = #tpu.pipeline_mode<synchronous>, transform_indices = @transform_9, window_bounds = array<i64: 1, 256>}, {transform_indices = @transform_10, window_bounds = array<i64: 4, 16, 256>}]} {
    %c0 = arith.constant 0 : index
    %c0_0 = arith.constant 0 : index
    %c0_1 = arith.constant 0 : index
    %0 = vector.load %arg1[%c0, %c0_0, %c0_1] : memref<4x16x256xf32, #tpu.memory_space<vmem>>, vector<4x16x256xf32>
    %c0_2 = arith.constant 0 : index
    %c0_3 = arith.constant 0 : index
    %1 = vector.load %arg2[%c0_2, %c0_3] : memref<1x256xf32, #tpu.memory_space<vmem>>, vector<1x256xf32>
    %c0_4 = arith.constant 0 : index
    %c0_5 = arith.constant 0 : index
    %2 = vector.load %arg3[%c0_4, %c0_5] : memref<1x256xf32, #tpu.memory_space<vmem>>, vector<1x256xf32>
    %cst = arith.constant dense<0.000000e+00> : vector<4x16xf32>
    %3 = vector.multi_reduction <add>, %0, %cst [2] : vector<4x16x256xf32> to vector<4x16xf32>
    %4 = vector.shape_cast %3 : vector<4x16xf32> to vector<4x16x1xf32>
    %cst_6 = arith.constant 2.560000e+02 : f32
    %5 = vector.broadcast %cst_6 : f32 to vector<4x16x1xf32>
    %6 = arith.divf %4, %5 : vector<4x16x1xf32>
    %7 = vector.broadcast %6 : vector<4x16x1xf32> to vector<4x16x256xf32>
    %8 = arith.subf %0, %7 : vector<4x16x256xf32>
    %9 = arith.mulf %8, %8 : vector<4x16x256xf32>
    %cst_7 = arith.constant dense<0.000000e+00> : vector<4x16xf32>
    %10 = vector.multi_reduction <add>, %9, %cst_7 [2] : vector<4x16x256xf32> to vector<4x16xf32>
    %11 = vector.shape_cast %10 : vector<4x16xf32> to vector<4x16x1xf32>
    %cst_8 = arith.constant 2.560000e+02 : f32
    %12 = vector.broadcast %cst_8 : f32 to vector<4x16x1xf32>
    %13 = arith.divf %11, %12 : vector<4x16x1xf32>
    %14 = vector.broadcast %6 : vector<4x16x1xf32> to vector<4x16x256xf32>
    %15 = arith.subf %0, %14 : vector<4x16x256xf32>
    %cst_9 = arith.constant 9.99999974E-6 : f32
    %16 = vector.broadcast %cst_9 : f32 to vector<4x16x1xf32>
    %17 = arith.addf %13, %16 : vector<4x16x1xf32>
    %18 = math.rsqrt %17 : vector<4x16x1xf32>
    %19 = vector.broadcast %18 : vector<4x16x1xf32> to vector<4x16x256xf32>
    %20 = arith.mulf %15, %19 : vector<4x16x256xf32>
    %21 = vector.shape_cast %1 : vector<1x256xf32> to vector<1x1x256xf32>
    %22 = vector.broadcast %21 : vector<1x1x256xf32> to vector<4x16x256xf32>
    %23 = arith.mulf %20, %22 : vector<4x16x256xf32>
    %24 = vector.shape_cast %2 : vector<1x256xf32> to vector<1x1x256xf32>
    %25 = vector.broadcast %24 : vector<1x1x256xf32> to vector<4x16x256xf32>
    %26 = arith.addf %23, %25 : vector<4x16x256xf32>
    %27 = vector.shape_cast %26 : vector<4x16x256xf32> to vector<64x256xf32>
    %28 = arith.truncf %27 : vector<64x256xf32> to vector<64x256xbf16>
    %c0_10 = arith.constant 0 : index
    %c0_11 = arith.constant 0 : index
    %29 = vector.load %arg4[%c0_10, %c0_11] : memref<256x768xbf16, #tpu.memory_space<vmem>>, vector<256x768xbf16>
    %cst_12 = arith.constant dense<0.000000e+00> : vector<64x768xf32>
    %30 = tpu.matmul %28, %29, %cst_12 {dimension_numbers = #tpu.dot_dimension_numbers<[1], [0], [0], [1], [0, 0, 1, 1], [], []>} : vector<64x256xbf16>, vector<256x768xbf16>, vector<64x768xf32> -> vector<64x768xf32>
    %c0_13 = arith.constant 0 : index
    %c0_14 = arith.constant 0 : index
    %31 = vector.load %arg5[%c0_13, %c0_14] : memref<1x768xf32, #tpu.memory_space<vmem>>, vector<1x768xf32>
    %32 = vector.broadcast %31 : vector<1x768xf32> to vector<64x768xf32>
    %33 = arith.addf %30, %32 : vector<64x768xf32>
    %34 = vector.shape_cast %33 : vector<64x768xf32> to vector<4x16x768xf32>
    %35 = vector.extract_strided_slice %34 {offsets = [0, 0, 0], sizes = [4, 16, 128], strides = [1, 1, 1]} : vector<4x16x768xf32> to vector<4x16x128xf32>
    %36 = arith.mulf %35, %35 : vector<4x16x128xf32>
    %cst_15 = arith.constant dense<0.000000e+00> : vector<4x16xf32>
    %37 = vector.multi_reduction <add>, %36, %cst_15 [2] : vector<4x16x128xf32> to vector<4x16xf32>
    %38 = vector.shape_cast %37 : vector<4x16xf32> to vector<4x16x1xf32>
    %cst_16 = arith.constant 1.000000e-24 : f32
    %39 = vector.broadcast %cst_16 : f32 to vector<4x16x1xf32>
    %40 = arith.maximumf %38, %39 : vector<4x16x1xf32>
    %41 = math.rsqrt %40 : vector<4x16x1xf32>
    %42 = vector.broadcast %41 : vector<4x16x1xf32> to vector<4x16x128xf32>
    %43 = arith.mulf %35, %42 : vector<4x16x128xf32>
    %44 = vector.extract_strided_slice %34 {offsets = [0, 0, 256], sizes = [4, 16, 128], strides = [1, 1, 1]} : vector<4x16x768xf32> to vector<4x16x128xf32>
    %45 = arith.mulf %44, %44 : vector<4x16x128xf32>
    %cst_17 = arith.constant dense<0.000000e+00> : vector<4x16xf32>
    %46 = vector.multi_reduction <add>, %45, %cst_17 [2] : vector<4x16x128xf32> to vector<4x16xf32>
    %47 = vector.shape_cast %46 : vector<4x16xf32> to vector<4x16x1xf32>
    %cst_18 = arith.constant 1.000000e-24 : f32
    %48 = vector.broadcast %cst_18 : f32 to vector<4x16x1xf32>
    %49 = arith.maximumf %47, %48 : vector<4x16x1xf32>
    %50 = math.rsqrt %49 : vector<4x16x1xf32>
    %51 = vector.broadcast %50 : vector<4x16x1xf32> to vector<4x16x128xf32>
    %52 = arith.mulf %44, %51 : vector<4x16x128xf32>
    %53 = vector.extract_strided_slice %34 {offsets = [0, 0, 512], sizes = [4, 16, 128], strides = [1, 1, 1]} : vector<4x16x768xf32> to vector<4x16x128xf32>
    %54 = arith.truncf %43 : vector<4x16x128xf32> to vector<4x16x128xbf16>
    %55 = arith.truncf %52 : vector<4x16x128xf32> to vector<4x16x128xbf16>
    "tpu.trace_start"() <{level = 10 : i32, message = "bnd,bmd->bnm"}> : () -> ()
    %cst_19 = arith.constant dense<0.000000e+00> : vector<4x16x16xf32>
    %56 = tpu.matmul %54, %55, %cst_19 {dimension_numbers = #tpu.dot_dimension_numbers<[2], [2], [1], [1], [0, 0, 0, 1, 1, 1], [0], [0]>} : vector<4x16x128xbf16>, vector<4x16x128xbf16>, vector<4x16x16xf32> -> vector<4x16x16xf32>
    "tpu.trace_stop"() : () -> ()
    %c0_20 = arith.constant 0 : index
    %57 = memref.load %arg6[%c0_20] : memref<2xf32, #tpu.memory_space<smem>>
    %58 = vector.broadcast %57 : f32 to vector<4x16x16xf32>
    %59 = arith.mulf %56, %58 : vector<4x16x16xf32>
    %cst_21 = arith.constant dense<0xFF800000> : vector<4x16xf32>
    %60 = vector.multi_reduction <maximumf>, %59, %cst_21 [2] : vector<4x16x16xf32> to vector<4x16xf32>
    %61 = vector.shape_cast %60 : vector<4x16xf32> to vector<4x16x1xf32>
    %62 = vector.broadcast %61 : vector<4x16x1xf32> to vector<4x16x16xf32>
    %63 = arith.subf %59, %62 : vector<4x16x16xf32>
    %64 = math.exp %63 : vector<4x16x16xf32>
    %cst_22 = arith.constant dense<0.000000e+00> : vector<4x16xf32>
    %65 = vector.multi_reduction <add>, %64, %cst_22 [2] : vector<4x16x16xf32> to vector<4x16xf32>
    %66 = vector.shape_cast %65 : vector<4x16xf32> to vector<4x16x1xf32>
    %67 = tpu.reciprocal %66 {approx = true} : vector<4x16x1xf32> -> vector<4x16x1xf32>
    %68 = vector.broadcast %67 : vector<4x16x1xf32> to vector<4x16x16xf32>
    %69 = arith.mulf %64, %68 : vector<4x16x16xf32>
    %70 = arith.truncf %69 : vector<4x16x16xf32> to vector<4x16x16xbf16>
    %71 = arith.truncf %53 : vector<4x16x128xf32> to vector<4x16x128xbf16>
    "tpu.trace_start"() <{level = 10 : i32, message = "bnm,bmd->bnd"}> : () -> ()
    %cst_23 = arith.constant dense<0.000000e+00> : vector<4x16x128xf32>
    %72 = tpu.matmul %70, %71, %cst_23 {dimension_numbers = #tpu.dot_dimension_numbers<[2], [1], [1], [2], [0, 0, 0, 1, 1, 2], [0], [0]>} : vector<4x16x16xbf16>, vector<4x16x128xbf16>, vector<4x16x128xf32> -> vector<4x16x128xf32>
    "tpu.trace_stop"() : () -> ()
    %73 = vector.extract_strided_slice %34 {offsets = [0, 0, 128], sizes = [4, 16, 128], strides = [1, 1, 1]} : vector<4x16x768xf32> to vector<4x16x128xf32>
    %74 = arith.mulf %73, %73 : vector<4x16x128xf32>
    %cst_24 = arith.constant dense<0.000000e+00> : vector<4x16xf32>
    %75 = vector.multi_reduction <add>, %74, %cst_24 [2] : vector<4x16x128xf32> to vector<4x16xf32>
    %76 = vector.shape_cast %75 : vector<4x16xf32> to vector<4x16x1xf32>
    %cst_25 = arith.constant 1.000000e-24 : f32
    %77 = vector.broadcast %cst_25 : f32 to vector<4x16x1xf32>
    %78 = arith.maximumf %76, %77 : vector<4x16x1xf32>
    %79 = math.rsqrt %78 : vector<4x16x1xf32>
    %80 = vector.broadcast %79 : vector<4x16x1xf32> to vector<4x16x128xf32>
    %81 = arith.mulf %73, %80 : vector<4x16x128xf32>
    %82 = vector.extract_strided_slice %34 {offsets = [0, 0, 384], sizes = [4, 16, 128], strides = [1, 1, 1]} : vector<4x16x768xf32> to vector<4x16x128xf32>
    %83 = arith.mulf %82, %82 : vector<4x16x128xf32>
    %cst_26 = arith.constant dense<0.000000e+00> : vector<4x16xf32>
    %84 = vector.multi_reduction <add>, %83, %cst_26 [2] : vector<4x16x128xf32> to vector<4x16xf32>
    %85 = vector.shape_cast %84 : vector<4x16xf32> to vector<4x16x1xf32>
    %cst_27 = arith.constant 1.000000e-24 : f32
    %86 = vector.broadcast %cst_27 : f32 to vector<4x16x1xf32>
    %87 = arith.maximumf %85, %86 : vector<4x16x1xf32>
    %88 = math.rsqrt %87 : vector<4x16x1xf32>
    %89 = vector.broadcast %88 : vector<4x16x1xf32> to vector<4x16x128xf32>
    %90 = arith.mulf %82, %89 : vector<4x16x128xf32>
    %91 = vector.extract_strided_slice %34 {offsets = [0, 0, 640], sizes = [4, 16, 128], strides = [1, 1, 1]} : vector<4x16x768xf32> to vector<4x16x128xf32>
    %92 = arith.truncf %81 : vector<4x16x128xf32> to vector<4x16x128xbf16>
    %93 = arith.truncf %90 : vector<4x16x128xf32> to vector<4x16x128xbf16>
    "tpu.trace_start"() <{level = 10 : i32, message = "bnd,bmd->bnm"}> : () -> ()
    %cst_28 = arith.constant dense<0.000000e+00> : vector<4x16x16xf32>
    %94 = tpu.matmul %92, %93, %cst_28 {dimension_numbers = #tpu.dot_dimension_numbers<[2], [2], [1], [1], [0, 0, 0, 1, 1, 1], [0], [0]>} : vector<4x16x128xbf16>, vector<4x16x128xbf16>, vector<4x16x16xf32> -> vector<4x16x16xf32>
    "tpu.trace_stop"() : () -> ()
    %c1 = arith.constant 1 : index
    %95 = memref.load %arg6[%c1] : memref<2xf32, #tpu.memory_space<smem>>
    %96 = vector.broadcast %95 : f32 to vector<4x16x16xf32>
    %97 = arith.mulf %94, %96 : vector<4x16x16xf32>
    %cst_29 = arith.constant dense<0xFF800000> : vector<4x16xf32>
    %98 = vector.multi_reduction <maximumf>, %97, %cst_29 [2] : vector<4x16x16xf32> to vector<4x16xf32>
    %99 = vector.shape_cast %98 : vector<4x16xf32> to vector<4x16x1xf32>
    %100 = vector.broadcast %99 : vector<4x16x1xf32> to vector<4x16x16xf32>
    %101 = arith.subf %97, %100 : vector<4x16x16xf32>
    %102 = math.exp %101 : vector<4x16x16xf32>
    %cst_30 = arith.constant dense<0.000000e+00> : vector<4x16xf32>
    %103 = vector.multi_reduction <add>, %102, %cst_30 [2] : vector<4x16x16xf32> to vector<4x16xf32>
    %104 = vector.shape_cast %103 : vector<4x16xf32> to vector<4x16x1xf32>
    %105 = tpu.reciprocal %104 {approx = true} : vector<4x16x1xf32> -> vector<4x16x1xf32>
    %106 = vector.broadcast %105 : vector<4x16x1xf32> to vector<4x16x16xf32>
    %107 = arith.mulf %102, %106 : vector<4x16x16xf32>
    %108 = arith.truncf %107 : vector<4x16x16xf32> to vector<4x16x16xbf16>
    %109 = arith.truncf %91 : vector<4x16x128xf32> to vector<4x16x128xbf16>
    "tpu.trace_start"() <{level = 10 : i32, message = "bnm,bmd->bnd"}> : () -> ()
    %cst_31 = arith.constant dense<0.000000e+00> : vector<4x16x128xf32>
    %110 = tpu.matmul %108, %109, %cst_31 {dimension_numbers = #tpu.dot_dimension_numbers<[2], [1], [1], [2], [0, 0, 0, 1, 1, 2], [0], [0]>} : vector<4x16x16xbf16>, vector<4x16x128xbf16>, vector<4x16x128xf32> -> vector<4x16x128xf32>
    "tpu.trace_stop"() : () -> ()
    %111 = tpu.concatenate %72, %110 in 2 : vector<4x16x128xf32>, vector<4x16x128xf32> -> vector<4x16x256xf32>
    %c0_32 = arith.constant 0 : index
    %c0_33 = arith.constant 0 : index
    %112 = vector.load %arg2[%c0_32, %c0_33] : memref<1x256xf32, #tpu.memory_space<vmem>>, vector<1x256xf32>
    %c0_34 = arith.constant 0 : index
    %c0_35 = arith.constant 0 : index
    %113 = vector.load %arg3[%c0_34, %c0_35] : memref<1x256xf32, #tpu.memory_space<vmem>>, vector<1x256xf32>
    %cst_36 = arith.constant dense<0.000000e+00> : vector<4x16xf32>
    %114 = vector.multi_reduction <add>, %111, %cst_36 [2] : vector<4x16x256xf32> to vector<4x16xf32>
    %115 = vector.shape_cast %114 : vector<4x16xf32> to vector<4x16x1xf32>
    %cst_37 = arith.constant 2.560000e+02 : f32
    %116 = vector.broadcast %cst_37 : f32 to vector<4x16x1xf32>
    %117 = arith.divf %115, %116 : vector<4x16x1xf32>
    %118 = vector.broadcast %117 : vector<4x16x1xf32> to vector<4x16x256xf32>
    %119 = arith.subf %111, %118 : vector<4x16x256xf32>
    %120 = arith.mulf %119, %119 : vector<4x16x256xf32>
    %cst_38 = arith.constant dense<0.000000e+00> : vector<4x16xf32>
    %121 = vector.multi_reduction <add>, %120, %cst_38 [2] : vector<4x16x256xf32> to vector<4x16xf32>
    %122 = vector.shape_cast %121 : vector<4x16xf32> to vector<4x16x1xf32>
    %cst_39 = arith.constant 2.560000e+02 : f32
    %123 = vector.broadcast %cst_39 : f32 to vector<4x16x1xf32>
    %124 = arith.divf %122, %123 : vector<4x16x1xf32>
    %125 = vector.broadcast %117 : vector<4x16x1xf32> to vector<4x16x256xf32>
    %126 = arith.subf %111, %125 : vector<4x16x256xf32>
    %cst_40 = arith.constant 9.99999974E-6 : f32
    %127 = vector.broadcast %cst_40 : f32 to vector<4x16x1xf32>
    %128 = arith.addf %124, %127 : vector<4x16x1xf32>
    %129 = math.rsqrt %128 : vector<4x16x1xf32>
    %130 = vector.broadcast %129 : vector<4x16x1xf32> to vector<4x16x256xf32>
    %131 = arith.mulf %126, %130 : vector<4x16x256xf32>
    %132 = vector.shape_cast %112 : vector<1x256xf32> to vector<1x1x256xf32>
    %133 = vector.broadcast %132 : vector<1x1x256xf32> to vector<4x16x256xf32>
    %134 = arith.mulf %131, %133 : vector<4x16x256xf32>
    %135 = vector.shape_cast %113 : vector<1x256xf32> to vector<1x1x256xf32>
    %136 = vector.broadcast %135 : vector<1x1x256xf32> to vector<4x16x256xf32>
    %137 = arith.addf %134, %136 : vector<4x16x256xf32>
    %cst_41 = arith.constant 3.000000e+00 : f32
    %138 = vector.broadcast %cst_41 : f32 to vector<4x16x256xf32>
    %139 = arith.addf %137, %138 : vector<4x16x256xf32>
    %cst_42 = arith.constant 0.000000e+00 : f32
    %cst_43 = arith.constant 6.000000e+00 : f32
    %140 = vector.broadcast %cst_42 : f32 to vector<4x16x256xf32>
    %141 = arith.maximumf %140, %139 : vector<4x16x256xf32>
    %142 = vector.broadcast %cst_43 : f32 to vector<4x16x256xf32>
    %143 = arith.minimumf %142, %141 : vector<4x16x256xf32>
    %144 = arith.mulf %137, %143 : vector<4x16x256xf32>
    %cst_44 = arith.constant 0.166666672 : f32
    %145 = vector.broadcast %cst_44 : f32 to vector<4x16x256xf32>
    %146 = arith.mulf %144, %145 : vector<4x16x256xf32>
    %147 = vector.shape_cast %146 : vector<4x16x256xf32> to vector<64x256xf32>
    %148 = arith.truncf %147 : vector<64x256xf32> to vector<64x256xbf16>
    %c0_45 = arith.constant 0 : index
    %c0_46 = arith.constant 0 : index
    %149 = vector.load %arg7[%c0_45, %c0_46] : memref<256x256xbf16, #tpu.memory_space<vmem>>, vector<256x256xbf16>
    %cst_47 = arith.constant dense<0.000000e+00> : vector<64x256xf32>
    %150 = tpu.matmul %148, %149, %cst_47 {dimension_numbers = #tpu.dot_dimension_numbers<[1], [0], [0], [1], [0, 0, 1, 1], [], []>} : vector<64x256xbf16>, vector<256x256xbf16>, vector<64x256xf32> -> vector<64x256xf32>
    %c0_48 = arith.constant 0 : index
    %c0_49 = arith.constant 0 : index
    %151 = vector.load %arg8[%c0_48, %c0_49] : memref<1x256xf32, #tpu.memory_space<vmem>>, vector<1x256xf32>
    %152 = vector.broadcast %151 : vector<1x256xf32> to vector<64x256xf32>
    %153 = arith.addf %150, %152 : vector<64x256xf32>
    %cst_50 = arith.constant 3.000000e+00 : f32
    %154 = vector.broadcast %cst_50 : f32 to vector<64x256xf32>
    %155 = arith.addf %153, %154 : vector<64x256xf32>
    %cst_51 = arith.constant 0.000000e+00 : f32
    %cst_52 = arith.constant 6.000000e+00 : f32
    %156 = vector.broadcast %cst_51 : f32 to vector<64x256xf32>
    %157 = arith.maximumf %156, %155 : vector<64x256xf32>
    %158 = vector.broadcast %cst_52 : f32 to vector<64x256xf32>
    %159 = arith.minimumf %158, %157 : vector<64x256xf32>
    %160 = arith.mulf %153, %159 : vector<64x256xf32>
    %cst_53 = arith.constant 0.166666672 : f32
    %161 = vector.broadcast %cst_53 : f32 to vector<64x256xf32>
    %162 = arith.mulf %160, %161 : vector<64x256xf32>
    %163 = arith.addf %147, %162 : vector<64x256xf32>
    %164 = arith.truncf %163 : vector<64x256xf32> to vector<64x256xbf16>
    %c0_54 = arith.constant 0 : index
    %c0_55 = arith.constant 0 : index
    %165 = vector.load %arg9[%c0_54, %c0_55] : memref<256x256xbf16, #tpu.memory_space<vmem>>, vector<256x256xbf16>
    %cst_56 = arith.constant dense<0.000000e+00> : vector<64x256xf32>
    %166 = tpu.matmul %164, %165, %cst_56 {dimension_numbers = #tpu.dot_dimension_numbers<[1], [0], [0], [1], [0, 0, 1, 1], [], []>} : vector<64x256xbf16>, vector<256x256xbf16>, vector<64x256xf32> -> vector<64x256xf32>
    %c0_57 = arith.constant 0 : index
    %c0_58 = arith.constant 0 : index
    %167 = vector.load %arg10[%c0_57, %c0_58] : memref<1x256xf32, #tpu.memory_space<vmem>>, vector<1x256xf32>
    %168 = vector.broadcast %167 : vector<1x256xf32> to vector<64x256xf32>
    %169 = arith.addf %166, %168 : vector<64x256xf32>
    %170 = vector.shape_cast %169 : vector<64x256xf32> to vector<4x16x256xf32>
    %c0_59 = arith.constant 0 : index
    %c0_60 = arith.constant 0 : index
    %c0_61 = arith.constant 0 : index
    %171 = vector.load %arg11[%c0_59, %c0_60, %c0_61] : memref<4x16x256xf32, #tpu.memory_space<vmem>>, vector<4x16x256xf32>
    tpu.vector_store %arg11[%c0_59, %c0_60, %c0_61], %170 {strides = array<i32>} : memref<4x16x256xf32, #tpu.memory_space<vmem>>, vector<4x16x256xf32>,
    return
  }
  func.func @transform_0(%arg0: i32) -> (i32, i32, i32) {
    %c0_i32 = arith.constant 0 : i32
    %c0_i32_0 = arith.constant 0 : i32
    %c0_i32_1 = arith.constant 0 : i32
    return %arg0, %c0_i32, %c0_i32_0 : i32, i32, i32
  }
  func.func @transform_1(%arg0: i32) -> (i32, i32) {
    %c0_i32 = arith.constant 0 : i32
    %c0_i32_0 = arith.constant 0 : i32
    %c0_i32_1 = arith.constant 0 : i32
    return %c0_i32, %c0_i32_0 : i32, i32
  }
  func.func @transform_2(%arg0: i32) -> (i32, i32) {
    %c0_i32 = arith.constant 0 : i32
    %c0_i32_0 = arith.constant 0 : i32
    %c0_i32_1 = arith.constant 0 : i32
    return %c0_i32, %c0_i32_0 : i32, i32
  }
  func.func @transform_3(%arg0: i32) -> (i32, i32) {
    %c0_i32 = arith.constant 0 : i32
    %c0_i32_0 = arith.constant 0 : i32
    %c0_i32_1 = arith.constant 0 : i32
    return %c0_i32, %c0_i32_0 : i32, i32
  }
  func.func @transform_4(%arg0: i32) -> (i32, i32) {
    %c0_i32 = arith.constant 0 : i32
    %c0_i32_0 = arith.constant 0 : i32
    %c0_i32_1 = arith.constant 0 : i32
    return %c0_i32, %c0_i32_0 : i32, i32
  }
  func.func @transform_5(%arg0: i32) -> i32 {
    %c0_i32 = arith.constant 0 : i32
    %c0_i32_0 = arith.constant 0 : i32
    return %c0_i32 : i32
  }
  func.func @transform_6(%arg0: i32) -> (i32, i32) {
    %c0_i32 = arith.constant 0 : i32
    %c0_i32_0 = arith.constant 0 : i32
    %c0_i32_1 = arith.constant 0 : i32
    return %c0_i32, %c0_i32_0 : i32, i32
  }
  func.func @transform_7(%arg0: i32) -> (i32, i32) {
    %c0_i32 = arith.constant 0 : i32
    %c0_i32_0 = arith.constant 0 : i32
    %c0_i32_1 = arith.constant 0 : i32
    return %c0_i32, %c0_i32_0 : i32, i32
  }
  func.func @transform_8(%arg0: i32) -> (i32, i32) {
    %c0_i32 = arith.constant 0 : i32
    %c0_i32_0 = arith.constant 0 : i32
    %c0_i32_1 = arith.constant 0 : i32
    return %c0_i32, %c0_i32_0 : i32, i32
  }
  func.func @transform_9(%arg0: i32) -> (i32, i32) {
    %c0_i32 = arith.constant 0 : i32
    %c0_i32_0 = arith.constant 0 : i32
    %c0_i32_1 = arith.constant 0 : i32
    return %c0_i32, %c0_i32_0 : i32, i32
  }
  func.func @transform_10(%arg0: i32) -> (i32, i32, i32) {
    %c0_i32 = arith.constant 0 : i32
    %c0_i32_0 = arith.constant 0 : i32
    %c0_i32_1 = arith.constant 0 : i32
    return %arg0, %c0_i32, %c0_i32_0 : i32, i32, i32
  }
}

</mosaic_0001>

<bundles_post_ra>
// kernel: tpu_custom_call.1
= control target key start
LH: loop header
LB: loop body
LE: loop exit
PB: predicated region body
PF: predicated region fallthrough
CT: control target
= control target key end

     0   :  { %s6045_s0 = inlined_call_operand.hbm [shape: f32[8,16,256], index: 0, kind: input, shape index: {}]   ;;  %s6046_s1 = inlined_call_operand.vmem [shape: f32[1,256], index: 1, kind: input, shape index: {}]   ;;  %s6047_s2 = inlined_call_operand.vmem [shape: f32[1,256], index: 2, kind: input, shape index: {}]   ;;  %s6048_s3 = inlined_call_operand.hbm [shape: bf16[256,768], index: 3, kind: input, shape index: {}]   ;;  %s6049_s4 = inlined_call_operand.vmem [shape: f32[1,768], index: 4, kind: input, shape index: {}]   ;;  %s6050_s5 = inlined_call_operand.vmem [shape: f32[2], index: 5, kind: input, shape index: {}]   ;;  %s6051_s6 = inlined_call_operand.hbm [shape: bf16[256,256], index: 6, kind: input, shape index: {}]   ;;  %s6052_s7 = inlined_call_operand.vmem [shape: f32[1,256], index: 7, kind: input, shape index: {}]   ;;  %s6053_s8 = inlined_call_operand.hbm [shape: bf16[256,256], index: 8, kind: input, shape index: {}]   ;;  %s6054_s9 = inlined_call_operand.vmem [shape: f32[1,256], index: 9, kind: input, shape index: {}]   ;;  %s6055_s10 = inlined_call_operand.hbm [shape: f32[8,16,256], index: 10, kind: output, shape index: {}]  }
   0x1   :  { %6069 = sst [smem:[#allocation26_spill]] %s6048_s3 }
   0x2   :  { %6070 = sst [smem:[#allocation27_spill]] %s6050_s5 }
   0x3   :  { %15 = vsyncpa [#allocation3], 0 }
   0x4   :  { %17 = vsyncpa [#allocation3 + $0x1], 0 }
   0x5   :  { %18 = vsyncpa [#allocation7], 0 }
   0x6   :  { %19 = vsyncpa [#allocation5], 0 }
   0x7   :  { %20 = vsyncpa [#allocation11], 0 }
   0x8   :  { %21 = vsyncpa [#allocation4], 0 }
   0x9   :  { %23 = vsyncpa [#allocation4 + $0x1], 0  ;;  %s4758_s13 = smov 0   ;;  %s4760_s14 = smov 0  }
   0xa   :  { %s4762_s15 = smov 0   ;;  %s4764_s16 = smov 0  }
   0xb LB: > { %6071 = sst [smem:[#allocation19_spill]] %s4673_s13  ;;  %s4779_s17 = sadd.s32 4294967295, %s4685_s16   ;;  %s4685_s16 = sphi %s4764_s16, %s6120_s16   ;;  %s4681_s15 = sphi %s4762_s15, %s6119_s15   ;;  %s4677_s14 = sphi %s4760_s14, %s6118_s14   ;;  %s4673_s13 = sphi %s4758_s13, %s6117_s13  }
   0xc   : > { %s3652_s18 = sadd.s32 4294967294, %s4685_s16   ;;  %p49_p0 = scmp.ne.s32.totalorder %s4677_s14, %s4673_s13 }
   0xd   : > { %p6056_p1 = scmp.eq.s32.totalorder %s4779_s17, 0  ;;  %p268_p3 = scmp.eq.s32.totalorder %s3652_s18, 1 }
   0xe   : > { %p3653_p5 = scmp.ge.s32.totalorder %s4685_s16, 1  ;;  %p275_p7 = scmp.lt.s32.totalorder %s4685_s16, 3 }
   0xf   : > { %p4788_p4 = por %p6056_p1, %p49_p0  ;;  %p4793_p6 = por %p268_p3, %p49_p0 }
  0x10   : > { %p4798_p8 = pnand %p3653_p5, %p275_p7  ;;  %s4687_s22 = smov [#allocation6]  }
  0x11   : > { %s6072_s19 = scalar_select %p4788_p4, 1, 0 }
  0x12   : > { %s6073_s20 = scalar_select %p4793_p6, 1, 0 }
  0x13   : > { %s6075_s21 = scalar_select %p4798_p8, 1, 0 }
  0x14   : > { %6074 = sst [smem:[#allocation20_spill]] %s6073_s20  ;;  %s293_s23 = sshll.u32 %s4687_s22, 4  ;;  %s4802_s23 = int_to_ptr.vmem [resolvable:$true] %s293_s23 }
  0x15   : > { %p3997_p9 = pneg %p4798_p8  ;;  %s6076_s5 = sld [smem:[#allocation27_spill]] }
  0x16   : > { %s4688_s28 = smov [#allocation9]   ;;  %s6078_s3 = sld [smem:[#allocation26_spill]] }
  0x17   : > { %p4812_p11 = pnand %p3997_p9, %p6056_p1  ;;  %s4818_s29 = sshll.u32 %s4688_s28, 4  ;;  %s321_s29 = int_to_ptr.vmem [resolvable:$true] %s4818_s29 }
  0x19   : > { %p4828_p13 = pneg %p4812_p11 }
  0x1b   : > { %s310_s26 = sshll.u32 %s6076_s5, 4  ;;  %s4816_s26 = int_to_ptr.vmem [resolvable:$true] %s310_s26 }
  0x1c   : > { %s4474_s12 = scalar_lea.hbm %s6078_s3, 12288 }
  0x1d   : > { %p4475_p12 = scmp.ne.s32.totalorder %s6078_s3, %s4474_s12  ;;  %p4481_p5 = scmp.lt.u32.totalorder %s4474_s12, %s6078_s3 }
  0x1f   : > { %p4477_p0 = pnand %p4828_p13, %p4475_p12 }
  0x21   : > { %p4478_p3 = pneg %p4477_p0 }
  0x23   : > { %p4483_p7 = pnand %p4481_p5, %p4478_p3 }
  0x25   : > { %4486 = shalt.err (!%p4483_p7)
}
  0x26   : > { %s4487_s30 = scalar_lea.vmem %s4802_s23, 12288  ;;  %p4495_p2 = scmp.lt.s32.totalorder %s4802_s23, %s4802_s23 }
  0x27   : > { %p4488_p9 = scmp.ne.s32.totalorder %s4802_s23, %s4487_s30  ;;  %p4496_p6 = scmp.lt.s32.totalorder %s4487_s30, %s4487_s30 }
  0x29   : > { %p4490_p10 = pnand %p4488_p9, %p4828_p13  ;;  %p4497_p12 = por %p4496_p6, %p4495_p2 }
  0x2b   : > { %p4491_p1 = pneg %p4490_p10 }
  0x2d   : > { %p4498_p0 = pnand %p4497_p12, %p4491_p1 }
  0x2f   : > { %4501 = shalt.err (!%p4498_p0)
}
  0x30   : > { %s4689_s11 = smov 384   ;;  %s4690_s12 = smov 24  }
  0x31   : > { %4000 = dma.hbm_to_vmem [thread:$0]  (!%p4812_p11), %s6078_s3, 12288, %s4802_s23, [#allocation7], %s4689_s11, %s4689_s11, %s4690_s12  }
  0x32   : > { %s4502_s25 = scalar_lea.vmem %s4816_s26, 16  ;;  %p4510_p1 = scmp.lt.s32.totalorder %s4816_s26, %s4816_s26 }
  0x33   : > { %p4503_p10 = scmp.ne.s32.totalorder %s4816_s26, %s4502_s25  ;;  %p4511_p6 = scmp.lt.s32.totalorder %s4502_s25, %s4502_s25 }
  0x35   : > { %p4505_p3 = pnand %p4503_p10, %p4828_p13  ;;  %p4512_p5 = por %p4511_p6, %p4510_p1 }
  0x37   : > { %p4506_p2 = pneg %p4505_p3 }
  0x39   : > { %p4513_p7 = pnand %p4512_p5, %p4506_p2 }
  0x3b   : > { %4516 = shalt.err (!%p4513_p7)
}
  0x3c   : > { %s4691_s28 = smov [#allocation8]   ;;  %s4517_s11 = scalar_lea.hbm %s6051_s6, 4096 }
  0x3d   : > { %4003 = dma.vmem_to_smem (!%p4812_p11), %s4816_s26, 16, %s4691_s28, [#allocation5]  }
  0x3e   : > { %p4518_p9 = scmp.ne.s32.totalorder %s6051_s6, %s4517_s11  ;;  %p4524_p10 = scmp.lt.u32.totalorder %s4517_s11, %s6051_s6 }
  0x40   : > { %p4520_p12 = pnand %p4518_p9, %p4828_p13 }
  0x42   : > { %p4521_p0 = pneg %p4520_p12 }
  0x44   : > { %p4526_p3 = pnand %p4524_p10, %p4521_p0 }
  0x46   : > { %4529 = shalt.err (!%p4526_p3)
}
  0x47   : > { %s4530_s3 = scalar_lea.vmem %s321_s29, 4096  ;;  %p4538_p5 = scmp.lt.s32.totalorder %s321_s29, %s321_s29 }
  0x48   : > { %p4531_p2 = scmp.ne.s32.totalorder %s321_s29, %s4530_s3  ;;  %p4539_p7 = scmp.lt.s32.totalorder %s4530_s3, %s4530_s3 }
  0x4a   : > { %p4533_p1 = pnand %p4531_p2, %p4828_p13  ;;  %p4540_p4 = por %p4539_p7, %p4538_p5 }
  0x4c   : > { %p4534_p6 = pneg %p4533_p1 }
  0x4e   : > { %p4541_p8 = pnand %p4540_p4, %p4534_p6 }
  0x50   : > { %4544 = shalt.err (!%p4541_p8)
}
  0x51   : > { %s4692_s26 = smov 128   ;;  %s4693_s28 = smov 8  }
  0x52   : > { %4006 = dma.hbm_to_vmem [thread:$0]  (!%p4812_p11), %s6051_s6, 4096, %s321_s29, [#allocation7], %s4692_s26, %s4692_s26, %s4693_s28  }
  0x53   : > { %s4694_s11 = smov [#allocation10]   ;;  %s4545_s25 = scalar_lea.hbm %s6053_s8, 4096 }
  0x54   : > { %s336_s12 = sshll.u32 %s4694_s11, 4  ;;  %p4546_p4 = scmp.ne.s32.totalorder %s6053_s8, %s4545_s25  ;;  %s337_s12 = int_to_ptr.vmem [resolvable:$true] %s336_s12 }
  0x55   : > { %p4552_p12 = scmp.lt.u32.totalorder %s4545_s25, %s6053_s8 }
  0x56   : > { %p4548_p8 = pnand %p4546_p4, %p4828_p13 }
  0x58   : > { %p4549_p9 = pneg %p4548_p8 }
  0x5a   : > { %p4554_p0 = pnand %p4552_p12, %p4549_p9 }
  0x5c   : > { %4557 = shalt.err (!%p4554_p0)
}
  0x5d   : > { %s4558_s29 = scalar_lea.vmem %s337_s12, 4096  ;;  %p4566_p1 = scmp.lt.s32.totalorder %s337_s12, %s337_s12 }
  0x5e   : > { %p4559_p10 = scmp.ne.s32.totalorder %s337_s12, %s4558_s29  ;;  %p4567_p6 = scmp.lt.s32.totalorder %s4558_s29, %s4558_s29 }
  0x60   : > { %p4561_p3 = pnand %p4559_p10, %p4828_p13  ;;  %p4568_p5 = por %p4567_p6, %p4566_p1 }
  0x62   : > { %p4562_p2 = pneg %p4561_p3 }
  0x64   : > { %p4569_p7 = pnand %p4568_p5, %p4562_p2 }
  0x66   : > { %4572 = shalt.err (!%p4569_p7)
}
  0x67   : > { %4009 = dma.hbm_to_vmem [thread:$0]  (!%p4812_p11), %s6053_s8, 4096, %s337_s12, [#allocation11], %s4692_s26, %s4692_s26, %s4693_s28  }
  0x68   : > { %s4896_s13 = sadd.s32 1, %s4685_s16   ;;  %s36_s20 = sadd.s32 1, %s4681_s15 }
  0x69   : > { %s33_s27 = ssub.s32 %s4685_s16, %s4896_s13  ;;  %p43_p13 = scmp.ne.s32.totalorder %s4681_s15, %s4677_s14 }
  0x6a   : > { %p34_p4 = scmp.eq.s32.totalorder %s33_s27, 0  ;;  %p44_p8 = scmp.eq.s32.totalorder %s4685_s16, 0 }
  0x6b   : > { %p6080_p9 = scmp.eq.s32.totalorder %s4779_s17, 1  ;;  %p4022_p0 = scmp.lt.s32.totalorder %s4685_s16, 2 }
  0x6c   : > { %s4912_s30 = scalar_select %p34_p4, %s4681_s15, %s36_s20  }
  0x6d   : > { %p4906_p12 = por %p6080_p9, %p43_p13  ;;  %p45_p10 = por %p44_p8, %p43_p13 }
  0x6e   : > { %s353_s11 = sand.u32 1, %s4681_s15   ;;  %s3846_s26 = sshll.u32 %s4685_s16, 11 }
  0x6f   : > { %s3659_s18 = sshll.u32 %s353_s11, 7  ;;  %s4919_s22 = scalar_lea.hbm %s6045_s0, %s3846_s26 }
  0x70   : > { %s357_s25 = scalar_lea.vmem [#allocation2], %s3659_s18  ;;  %p4923_p11 = pnand %p4022_p0, %p45_p10 }
  0x71   : > { %s365_s3 = sshll.u32 %s357_s25, 4  ;;  %s4927_s5 = scalar_lea.sflag [#allocation3], %s353_s11  ;;  %s4921_s3 = int_to_ptr.vmem [resolvable:$true] %s365_s3 }
  0x72   : > { %s4573_s23 = scalar_lea.hbm %s4919_s22, 2048  ;;  %p4575_p2 = pneg %p4923_p11 }
  0x73   : > { %p4574_p3 = scmp.ne.s32.totalorder %s4919_s22, %s4573_s23  ;;  %s4578_s18 = scalar_lea.hbm %s6045_s0, 4096 }
  0x74   : > { %p4579_p5 = scmp.lt.u32.totalorder %s4919_s22, %s6045_s0  ;;  %p4580_p7 = scmp.lt.u32.totalorder %s4578_s18, %s4573_s23 }
  0x75   : > { %p4576_p1 = pnand %p4575_p2, %p4574_p3  ;;  %p4582_p4 = scmp.lt.u32.totalorder %s4573_s23, %s4919_s22 }
  0x76   : > { %p4581_p13 = por %p4580_p7, %p4579_p5 }
  0x77   : > { %p4577_p6 = pneg %p4576_p1 }
  0x78   : > { %p4583_p8 = por %p4582_p4, %p4581_p13 }
  0x7a   : > { %p4584_p9 = pnand %p4583_p8, %p4577_p6 }
  0x7c   : > { %4587 = shalt.err (!%p4584_p9)
}
  0x7d   : > { %s4588_s11 = scalar_lea.vmem %s4921_s3, 2048  ;;  %s4695_s12 = smov [#allocation2]  }
  0x7e   : > { %p4589_p0 = scmp.ne.s32.totalorder %s4921_s3, %s4588_s11  ;;  %s4593_s25 = sshll.u32 %s4695_s12, 4  ;;  %s4594_s25 = int_to_ptr.vmem [resolvable:$false] %s4593_s25 }
  0x7f   : > { %s4595_s20 = scalar_lea.vmem %s4594_s25, 4096  ;;  %p4596_p1 = scmp.lt.s32.totalorder %s4921_s3, %s4594_s25 }
  0x80   : > { %p4591_p10 = pnand %p4589_p0, %p4575_p2  ;;  %p4597_p5 = scmp.lt.s32.totalorder %s4595_s20, %s4588_s11 }
  0x82   : > { %p4592_p3 = pneg %p4591_p10  ;;  %p4598_p7 = por %p4597_p5, %p4596_p1 }
  0x84   : > { %p4599_p13 = pnand %p4598_p7, %p4592_p3 }
  0x86   : > { %4602 = shalt.err (!%p4599_p13)
}
  0x87   : > { %s4696_s23 = smov 256   ;;  %s4697_s27 = smov 16  }
  0x88   : > { %4013 = dma.hbm_to_vmem [thread:$0]  (!%p4923_p11), %s4919_s22, 2048, %s4921_s3, %s4927_s5, %s4696_s23, %s4696_s23, %s4697_s27  }
  0x89   : > { %p6083_p2 = scmp.ne.s32.totalorder %s6075_s21, 0 }
  0x8b   : > { %377 = sbr.rel (%p6083_p2) target bundleno = 2993 (0xbb1), region = 60 }
  0x92   : > { %s4958_s18 = sand.u32 1, %s4677_s14   ;;  %p6084_p6 = scmp.ne.s32.totalorder %s6072_s19, 0 }
  0x93   : > { %s3664_s26 = sshll.u32 %s4958_s18, 7  ;;  %s380_s28 = scalar_lea.sflag [#allocation3], %s4958_s18 }
  0x94   : > { %s4964_s11 = scalar_lea.vmem [#allocation2], %s3664_s26 }
  0x95   : > { %4648 = dma.done.wait (%p6084_p6), %s380_s28, 2048  }
  0x96   : > { %4650 = vsyncadd (%p6084_p6), %s380_s28, 4294965248  ;;  %p6085_p11 = scmp.eq.s32.totalorder %s4779_s17, 0 }
  0x98   : > { %4652 = dma.done.wait (%p6085_p11), [#allocation7], 12288   ;;  %p6086_p4 = pmov %p6085_p11 }
  0x9a   : > { %4654 = vsyncadd (%p6086_p4), [#allocation7], 4294955008  ;;  %p6087_p8 = pmov %p6086_p4 }
  0x9b   : > { %p6088_p9 = pmov %p6086_p4 }
  0x9c   : > { %4656 = dma.done.wait (%p6087_p8), [#allocation5], 16  }
  0x9d   : > { %4658 = vsyncadd (%p6088_p9), [#allocation5], 4294967280  ;;  %p6089_p0 = pmov %p6086_p4 }
  0x9f   : > { %4660 = dma.done.wait (%p6089_p0), [#allocation7], 4096   ;;  %p6090_p10 = pmov %p6089_p0 }
  0xa0   : > { %p6091_p3 = pmov %p6089_p0 }
  0xa1   : > { %4662 = vsyncadd (%p6090_p10), [#allocation7], 4294963200 }
  0xa2   : > { %4664 = dma.done.wait (%p6091_p3), [#allocation11], 4096   ;;  %p6092_p1 = pmov %p6089_p0 }
  0xa4   : > { %4666 = vsyncadd (%p6092_p1), [#allocation11], 4294963200 }
  0xa5   : > { %404 = sfence }
  0xa6   : > { %v4987_v0 = vld [vmem:[%s4964_s11] sm:$0xff]  ;;  %v4990_v1 = vld [vmem:[%s4964_s11 + $0x8] sm:$0xff]  ;;  %v5001_v5 = vld [vmem:[%s4964_s11 + $0x10] sm:$0xff]  ;;  %vm4699_vm0 = vmmov 0   ;;  %s1744_s12 = sld [smem:[#allocation8]]  ;;  %vm1754_vm1 = vcmask 130048  }
  0xa7   : > { %v4993_v2 = vld [vmem:[%s4964_s11 + $0x20] sm:$0xff]  ;;  %v458_v3 = vadd.f32 %v4990_v1, %v4987_v0  ;;  %v4998_v4 = vld [vmem:[%s4964_s11 + $0x28] sm:$0xff]  ;;  %v5004_v6 = vld [vmem:[%s4964_s11 + $0x18] sm:$0xff]  ;;  %s3770_s25 = sld [smem:[#allocation8 + $0x1]]  ;;  %s5976_s3 = scalar_lea.vmem [#allocation12], %s3664_s26 }
  0xa8   : > { %v464_v7 = vadd.f32 %v4998_v4, %v4993_v2  ;;  %v5009_v8 = vld [vmem:[%s4964_s11 + $0x30] sm:$0xff]  ;;  %v5012_v9 = vld [vmem:[%s4964_s11 + $0x38] sm:$0xff]  ;;  %v461_v10 = vadd.f32 %v5004_v6, %v5001_v5  ;;  %v5019_v12 = vld [vmem:[%s4964_s11 + $0x40] sm:$0xff]  ;;  %s3848_s26 = sshll.u32 %s4779_s17, 11  ;;  %s3538_s29 = sshll.u32 %s5976_s3, 4  ;;  %s5998_s29 = int_to_ptr.vmem [resolvable:$true] %s3538_s29 }
  0xa9   : > { %459 = vadd.xlane.f32.xlu0 %v458_v3  ;;  %v467_v11 = vadd.f32 %v5012_v9, %v5009_v8  ;;  %v5022_v13 = vld [vmem:[%s4964_s11 + $0x48] sm:$0xff]  ;;  %v5025_v14 = vld [vmem:[%s4964_s11 + $0x50] sm:$0xff]  ;;  %v5028_v15 = vld [vmem:[%s4964_s11 + $0x58] sm:$0xff]  ;;  %s3524_s17 = scalar_lea.sflag [#allocation4], %s4958_s18  ;;  %s4603_s20 = scalar_lea.vmem %s5998_s29, 2048 }
  0xaa   : > { %465 = vadd.xlane.f32.xlu1 %v464_v7  ;;  %v5031_v16 = vld [vmem:[%s4964_s11 + $0x60] sm:$0xff]  ;;  %v5034_v17 = vld [vmem:[%s4964_s11 + $0x68] sm:$0xff]  ;;  %v470_v18 = vadd.f32 %v5022_v13, %v5019_v12  ;;  %v5039_v19 = vld [vmem:[%s4964_s11 + $0x70] sm:$0xff]  ;;  %v473_v21 = vadd.f32 %v5028_v15, %v5025_v14  ;;  %p4604_p5 = scmp.ne.s32.totalorder %s5998_s29, %s4603_s20  ;;  %s4700_s23 = smov [#allocation12]  }
  0xab   : > { %v5042_v20 = vld [vmem:[%s4964_s11 + $0x78] sm:$0xff]  ;;  %v476_v22 = vadd.f32 %v5034_v17, %v5031_v16  ;;  %v4077_v26 = vld [vmem:[#allocation6 + $0xc] ss:$24 sps:$4 sm:$0xff]   ;;  %v4079_v27 = vld [vmem:[#allocation6 + $0x8] ss:$24 sps:$4 sm:$0xff]   ;;  %s4607_s27 = sshll.u32 %s4700_s23, 4  ;;  %s4608_s27 = int_to_ptr.vmem [resolvable:$false] %s4607_s27 }
  0xac   : > { %v479_v23 = vadd.f32 %v5042_v20, %v5039_v19  ;;  %v4074_v24 = vld [vmem:[#allocation6 + $0x4] ss:$24 sps:$4 sm:$0xff]   ;;  %v4076_v25 = vld [vmem:[#allocation6] ss:$24 sps:$4 sm:$0xff]   ;;  %v4080_v28 = vld [vmem:[#allocation6 + $0x34] ss:$24 sps:$4 sm:$0xff]   ;;  %1330 = vmatprep.subr.bf16.mxu1 %v4077_v26  ;;  %p4605_p7 = pnand %p4604_p5, %p4906_p12  ;;  %p4610_p2 = scmp.lt.s32.totalorder %s5998_s29, %s4608_s27 }
  0xad   : > { %462 = vadd.xlane.f32.xlu0 %v461_v10  ;;  %1257 = vmatprep.subr.bf16.mxu0 %v4074_v24  ;;  %v4083_v29 = vld [vmem:[#allocation6 + $0x3c] ss:$24 sps:$4 sm:$0xff]   ;;  %v4082_v30 = vld [vmem:[#allocation6 + $0x30] ss:$24 sps:$4 sm:$0xff]   ;;  %v4089_v33 = vld [vmem:[#allocation6 + $0x6c] ss:$24 sps:$4 sm:$0xff]  }
  0xae   : > { %468 = vadd.xlane.f32.xlu1 %v467_v11  ;;  %1258 = vmatpush1.bf16.msra.mxu0 %v4076_v25  ;;  %v4085_v31 = vld [vmem:[#allocation6 + $0x38] ss:$24 sps:$4 sm:$0xff]   ;;  %v4086_v32 = vld [vmem:[#allocation6 + $0x64] ss:$24 sps:$4 sm:$0xff]   ;;  %v4091_v35 = vld [vmem:[#allocation6 + $0x68] ss:$24 sps:$4 sm:$0xff]   ;;  %p4606_p13 = pneg %p4605_p7 }
  0xaf   : > { %1331 = vmatpush1.bf16.msra.mxu1 %v4079_v27  ;;  %1259 = vmatprep.subr.bf16.mxu0 %v4080_v28  ;;  %v4088_v34 = vld [vmem:[#allocation6 + $0x60] ss:$24 sps:$4 sm:$0xff]   ;;  %v4092_v36 = vld [vmem:[#allocation6 + $0x94] ss:$24 sps:$4 sm:$0xff]   ;;  %v4094_v38 = vld [vmem:[#allocation6 + $0x90] ss:$24 sps:$4 sm:$0xff]  }
  0xb0   : > { %1332 = vmatprep.subr.bf16.mxu1 %v4083_v29  ;;  %v4095_v37 = vld [vmem:[#allocation6 + $0x9c] ss:$24 sps:$4 sm:$0xff]   ;;  %v4097_v39 = vld [vmem:[#allocation6 + $0x98] ss:$24 sps:$4 sm:$0xff]   ;;  %v4101_v41 = vld [vmem:[#allocation6 + $0xcc] ss:$24 sps:$4 sm:$0xff]  }
  0xb1   : > { %471 = vadd.xlane.f32.xlu0 %v470_v18  ;;  %v4098_v40 = vld [vmem:[#allocation6 + $0xc4] ss:$24 sps:$4 sm:$0xff]   ;;  %v4100_v42 = vld [vmem:[#allocation6 + $0xc0] ss:$24 sps:$4 sm:$0xff]   ;;  %v4104_v44 = vld [vmem:[#allocation6 + $0xf4] ss:$24 sps:$4 sm:$0xff]  }
  0xb2   : > { %474 = vadd.xlane.f32.xlu1 %v473_v21  ;;  %1260 = vmatpush1.bf16.msra.mxu0 %v4082_v30  ;;  %v4103_v43 = vld [vmem:[#allocation6 + $0xc8] ss:$24 sps:$4 sm:$0xff]   ;;  %v4107_v45 = vld [vmem:[#allocation6 + $0xfc] ss:$24 sps:$4 sm:$0xff]   ;;  %v4109_v47 = vld [vmem:[#allocation6 + $0xf8] ss:$24 sps:$4 sm:$0xff]  }
  0xb3   : > { %1333 = vmatpush1.bf16.msra.mxu1 %v4085_v31  ;;  %1261 = vmatprep.subr.bf16.mxu0 %v4086_v32  ;;  %v4106_v46 = vld [vmem:[#allocation6 + $0xf0] ss:$24 sps:$4 sm:$0xff]   ;;  %v4110_v48 = vld [vmem:[#allocation6 + $0x124] ss:$24 sps:$4 sm:$0xff]   ;;  %v4112_v50 = vld [vmem:[#allocation6 + $0x120] ss:$24 sps:$4 sm:$0xff]  }
  0xb4   : > { %1334 = vmatprep.subr.bf16.mxu1 %v4089_v33  ;;  %v4113_v49 = vld [vmem:[#allocation6 + $0x12c] ss:$24 sps:$4 sm:$0xff]   ;;  %v4115_v51 = vld [vmem:[#allocation6 + $0x128] ss:$24 sps:$4 sm:$0xff]   ;;  %v4119_v53 = vld [vmem:[#allocation6 + $0x15c] ss:$24 sps:$4 sm:$0xff]  }
  0xb5   : > { %477 = vadd.xlane.f32.xlu0 %v476_v22  ;;  %v4116_v52 = vld [vmem:[#allocation6 + $0x154] ss:$24 sps:$4 sm:$0xff]   ;;  %v4118_v54 = vld [vmem:[#allocation6 + $0x150] ss:$24 sps:$4 sm:$0xff]   ;;  %v4122_v56 = vld [vmem:[#allocation6 + $0x184] ss:$24 sps:$4 sm:$0xff]  }
  0xb6   : > { %480 = vadd.xlane.f32.xlu1 %v479_v23  ;;  %1262 = vmatpush1.bf16.msra.mxu0 %v4088_v34  ;;  %v4121_v55 = vld [vmem:[#allocation6 + $0x158] ss:$24 sps:$4 sm:$0xff]   ;;  %v4125_v57 = vld [vmem:[#allocation6 + $0x18c] ss:$24 sps:$4 sm:$0xff]   ;;  %v4127_v59 = vld [vmem:[#allocation6 + $0x188] ss:$24 sps:$4 sm:$0xff]  }
  0xb7   : > { %1335 = vmatpush1.bf16.msra.mxu1 %v4091_v35  ;;  %1263 = vmatprep.subr.bf16.mxu0 %v4092_v36  ;;  %v4124_v58 = vld [vmem:[#allocation6 + $0x180] ss:$24 sps:$4 sm:$0xff]   ;;  %v4128_v60 = vld [vmem:[#allocation6 + $0x1b4] ss:$24 sps:$4 sm:$0xff]   ;;  %s4609_s28 = scalar_lea.vmem %s4608_s27, 4096 }
  0xb8   : > { %1336 = vmatprep.subr.bf16.mxu1 %v4095_v37  ;;  %p4611_p6 = scmp.lt.s32.totalorder %s4609_s28, %s4603_s20 }
  0xba   : > { %1264 = vmatpush1.bf16.msra.mxu0 %v4094_v38  ;;  %p4612_p11 = por %p4611_p6, %p4610_p2 }
  0xbb   : > { %1337 = vmatpush1.bf16.msra.mxu1 %v4097_v39  ;;  %1265 = vmatprep.subr.bf16.mxu0 %v4098_v40 }
  0xbc   : > { %1338 = vmatprep.subr.bf16.mxu1 %v4101_v41  ;;  %p4613_p4 = pnand %p4612_p11, %p4606_p13 }
  0xbe   : > { %1266 = vmatpush1.bf16.msra.mxu0 %v4100_v42 }
  0xbf   : > { %1339 = vmatpush1.bf16.msra.mxu1 %v4103_v43  ;;  %1267 = vmatprep.subr.bf16.mxu0 %v4104_v44 }
  0xc0   : > { %1340 = vmatprep.subr.bf16.mxu1 %v4107_v45 }
  0xc2   : > { %1268 = vmatpush1.bf16.msra.mxu0 %v4106_v46 }
  0xc3   : > { %1341 = vmatpush1.bf16.msra.mxu1 %v4109_v47  ;;  %1269 = vmatprep.subr.bf16.mxu0 %v4110_v48 }
  0xc4   : > { %1342 = vmatprep.subr.bf16.mxu1 %v4113_v49 }
  0xc6   : > { %1270 = vmatpush1.bf16.msra.mxu0 %v4112_v50 }
  0xc7   : > { %1343 = vmatpush1.bf16.msra.mxu1 %v4115_v51  ;;  %1271 = vmatprep.subr.bf16.mxu0 %v4116_v52 }
  0xc8   : > { %1344 = vmatprep.subr.bf16.mxu1 %v4119_v53  ;;  %v4130_v53 = vld [vmem:[#allocation6 + $0x1b0] ss:$24 sps:$4 sm:$0xff]  }
  0xca   : > { %1272 = vmatpush1.bf16.msra.mxu0 %v4118_v54  ;;  %v4131_v54 = vld [vmem:[#allocation6 + $0x1bc] ss:$24 sps:$4 sm:$0xff]  }
  0xcb   : > { %1345 = vmatpush1.bf16.msra.mxu1 %v4121_v55  ;;  %1273 = vmatprep.subr.bf16.mxu0 %v4122_v56  ;;  %v4133_v55 = vld [vmem:[#allocation6 + $0x1b8] ss:$24 sps:$4 sm:$0xff]   ;;  %v4134_v56 = vld [vmem:[#allocation6 + $0x1e4] ss:$24 sps:$4 sm:$0xff]  }
  0xcc   : > { %1346 = vmatprep.subr.bf16.mxu1 %v4125_v57  ;;  %v4136_v57 = vld [vmem:[#allocation6 + $0x1e0] ss:$24 sps:$4 sm:$0xff]  }
  0xce   : > { %1274 = vmatpush1.bf16.msra.mxu0 %v4124_v58  ;;  %v4137_v58 = vld [vmem:[#allocation6 + $0x1ec] ss:$24 sps:$4 sm:$0xff]  }
  0xcf   : > { %1347 = vmatpush1.bf16.msra.mxu1 %v4127_v59  ;;  %1275 = vmatprep.subr.bf16.mxu0 %v4128_v60  ;;  %v4139_v59 = vld [vmem:[#allocation6 + $0x1e8] ss:$24 sps:$4 sm:$0xff]   ;;  %v4140_v60 = vld [vmem:[#allocation6 + $0x214] ss:$24 sps:$4 sm:$0xff]  }
  0xd0   : > { %1348 = vmatprep.subr.bf16.mxu1 %v4131_v54  ;;  %v456_v54 = vld [vmem:[%s6046_s1] sm:$0x3] }
  0xd2   : > { %1276 = vmatpush1.bf16.msra.mxu0 %v4130_v53 }
  0xd3   : > { %1349 = vmatpush1.bf16.msra.mxu1 %v4133_v55  ;;  %1277 = vmatprep.subr.bf16.mxu0 %v4134_v56 }
  0xd4   : > { %1350 = vmatprep.subr.bf16.mxu1 %v4137_v58 }
  0xd6   : > { %1278 = vmatpush1.bf16.msra.mxu0 %v4136_v57 }
  0xd7   : > { %1351 = vmatpush1.bf16.msra.mxu1 %v4139_v59  ;;  %1279 = vmatprep.subr.bf16.mxu0 %v4140_v60  ;;  %v457_v59 = vld [vmem:[%s6047_s2] sm:$0x3] }
 0x136   : > { %v460_v61 = vpop.xlane.xlu0 %459 }
 0x137   : > { %v483_v62 = vmul.f32 0.00390625, %v460_v61  ;;  %v466_v63 = vpop.xlane.xlu1 %465  ;;  %v4142_v61 = vld [vmem:[#allocation6 + $0x210] ss:$24 sps:$4 sm:$0xff]  }
 0x138   : > { %v485_v3 = vmul.f32 0.00390625, %v466_v63  ;;  %v4145_v63 = vld [vmem:[#allocation6 + $0x218] ss:$24 sps:$4 sm:$0xff]   ;;  %1280 = vmatpush1.bf16.msra.mxu0 %v4142_v61 }
 0x139   : > { %v5051_v7 = vsub.f32 %v4987_v0, %v483_v62  ;;  %v5054_v10 = vsub.f32 %v4990_v1, %v483_v62  ;;  %v4143_v62 = vld [vmem:[#allocation6 + $0x21c] ss:$24 sps:$4 sm:$0xff]  }
 0x13a   : > { %v5057_v11 = vsub.f32 %v4993_v2, %v485_v3  ;;  %v5060_v18 = vsub.f32 %v4998_v4, %v485_v3  ;;  %v463_v21 = vpop.xlane.xlu0 %462  ;;  %1352 = vmatprep.subr.bf16.mxu1 %v4143_v62  ;;  %v4146_v3 = vld [vmem:[#allocation6 + $0x244] ss:$24 sps:$4 sm:$0xff]  }
 0x13b   : > { %v484_v22 = vmul.f32 0.00390625, %v463_v21  ;;  %v469_v23 = vpop.xlane.xlu1 %468  ;;  %v507_v24 = vmul.f32 %v5051_v7, %v5051_v7  ;;  %v508_v25 = vmul.f32 %v5054_v10, %v5054_v10  ;;  %1353 = vmatpush1.bf16.msra.mxu1 %v4145_v63  ;;  %v4148_v21 = vld [vmem:[#allocation6 + $0x240] ss:$24 sps:$4 sm:$0xff]   ;;  %1281 = vmatprep.subr.bf16.mxu0 %v4146_v3 }
 0x13c   : > { %v486_v0 = vmul.f32 0.00390625, %v469_v23  ;;  %v511_v1 = vmul.f32 %v5057_v11, %v5057_v11  ;;  %v512_v2 = vmul.f32 %v5060_v18, %v5060_v18  ;;  %v4151_v23 = vld [vmem:[#allocation6 + $0x248] ss:$24 sps:$4 sm:$0xff]   ;;  %1282 = vmatpush1.bf16.msra.mxu0 %v4148_v21 }
 0x13d   : > { %v5071_v26 = vsub.f32 %v5001_v5, %v484_v22  ;;  %v5074_v4 = vsub.f32 %v5004_v6, %v484_v22  ;;  %v523_v27 = vadd.f32 %v508_v25, %v507_v24  ;;  %v4149_v22 = vld [vmem:[#allocation6 + $0x24c] ss:$24 sps:$4 sm:$0xff]   ;;  %v4154_v25 = vld [vmem:[#allocation6 + $0x270] ss:$24 sps:$4 sm:$0xff]  }
 0x13e   : > { %v5077_v28 = vsub.f32 %v5009_v8, %v486_v0  ;;  %v5080_v29 = vsub.f32 %v5012_v9, %v486_v0  ;;  %v472_v30 = vpop.xlane.xlu0 %471  ;;  %v529_v33 = vadd.f32 %v512_v2, %v511_v1  ;;  %1354 = vmatprep.subr.bf16.mxu1 %v4149_v22  ;;  %v4152_v24 = vld [vmem:[#allocation6 + $0x274] ss:$24 sps:$4 sm:$0xff]   ;;  %v4157_v1 = vld [vmem:[#allocation6 + $0x278] ss:$24 sps:$4 sm:$0xff]   ;;  %v4158_v2 = vld [vmem:[#allocation6 + $0x2a4] ss:$24 sps:$4 sm:$0xff]  }
 0x13f   : > { %v487_v31 = vmul.f32 0.00390625, %v472_v30  ;;  %524 = vadd.xlane.f32.xlu0 %v523_v27  ;;  %v475_v32 = vpop.xlane.xlu1 %474  ;;  %v509_v34 = vmul.f32 %v5071_v26, %v5071_v26  ;;  %v510_v5 = vmul.f32 %v5074_v4, %v5074_v4  ;;  %1355 = vmatpush1.bf16.msra.mxu1 %v4151_v23  ;;  %v4155_v0 = vld [vmem:[#allocation6 + $0x27c] ss:$24 sps:$4 sm:$0xff]   ;;  %v4160_v27 = vld [vmem:[#allocation6 + $0x2a0] ss:$24 sps:$4 sm:$0xff]  }
 0x140   : > { %v488_v6 = vmul.f32 0.00390625, %v475_v32  ;;  %v513_v35 = vmul.f32 %v5077_v28, %v5077_v28  ;;  %v514_v8 = vmul.f32 %v5080_v29, %v5080_v29  ;;  %1283 = vmatprep.subr.bf16.mxu0 %v4152_v24  ;;  %1356 = vmatprep.subr.bf16.mxu1 %v4155_v0  ;;  %v4161_v30 = vld [vmem:[#allocation6 + $0x2ac] ss:$24 sps:$4 sm:$0xff]  }
 0x141   : > { %v5091_v9 = vsub.f32 %v5019_v12, %v487_v31  ;;  %v5094_v36 = vsub.f32 %v5022_v13, %v487_v31  ;;  %v526_v37 = vadd.f32 %v510_v5, %v509_v34  ;;  %1284 = vmatpush1.bf16.msra.mxu0 %v4154_v25  ;;  %v4163_v31 = vld [vmem:[#allocation6 + $0x2a8] ss:$24 sps:$4 sm:$0xff]   ;;  %v4164_v32 = vld [vmem:[#allocation6 + $0x2d4] ss:$24 sps:$4 sm:$0xff]   ;;  %v4169_v5 = vld [vmem:[#allocation6 + $0x2d8] ss:$24 sps:$4 sm:$0xff]  }
 0x142   : > { %v5097_v38 = vsub.f32 %v5025_v14, %v488_v6  ;;  %v5100_v39 = vsub.f32 %v5028_v15, %v488_v6  ;;  %v478_v40 = vpop.xlane.xlu0 %477  ;;  %v532_v43 = vadd.f32 %v514_v8, %v513_v35  ;;  %1285 = vmatprep.subr.bf16.mxu0 %v4158_v2  ;;  %v4167_v34 = vld [vmem:[#allocation6 + $0x2dc] ss:$24 sps:$4 sm:$0xff]  }
 0x143   : > { %v489_v41 = vmul.f32 0.00390625, %v478_v40  ;;  %530 = vadd.xlane.f32.xlu0 %v529_v33  ;;  %527 = vadd.xlane.f32.xlu1 %v526_v37  ;;  %v481_v42 = vpop.xlane.xlu1 %480  ;;  %v515_v12 = vmul.f32 %v5091_v9, %v5091_v9  ;;  %v516_v13 = vmul.f32 %v5094_v36, %v5094_v36  ;;  %v4166_v33 = vld [vmem:[#allocation6 + $0x2d0] ss:$24 sps:$4 sm:$0xff]   ;;  %v4172_v6 = vld [vmem:[#allocation6 + $0x14] ss:$24 sps:$4 sm:$0xff]   ;;  %v588_v40 = vlaneseq }
 0x144   : > { %v490_v44 = vmul.f32 0.00390625, %v481_v42  ;;  %v517_v14 = vmul.f32 %v5097_v38, %v5097_v38  ;;  %v518_v15 = vmul.f32 %v5100_v39, %v5100_v39  ;;  %1357 = vmatpush1.bf16.msra.mxu1 %v4157_v1 }
 0x145   : > { %v5111_v45 = vsub.f32 %v5031_v16, %v489_v41  ;;  %v5114_v46 = vsub.f32 %v5034_v17, %v489_v41  ;;  %v535_v47 = vadd.f32 %v516_v13, %v515_v12  ;;  %1286 = vmatpush1.bf16.msra.mxu0 %v4160_v27  ;;  %1358 = vmatprep.subr.bf16.mxu1 %v4161_v30 }
 0x146   : > { %v5117_v48 = vsub.f32 %v5039_v19, %v490_v44  ;;  %v5120_v49 = vsub.f32 %v5042_v20, %v490_v44  ;;  %v538_v50 = vadd.f32 %v518_v15, %v517_v14  ;;  %1287 = vmatprep.subr.bf16.mxu0 %v4164_v32  ;;  %v5130_v14 = vshrl.u32 %v588_v40, 7 }
 0x147   : > { %533 = vadd.xlane.f32.xlu1 %v532_v43  ;;  %536 = vadd.xlane.f32.xlu0 %v535_v47  ;;  %v519_v51 = vmul.f32 %v5111_v45, %v5111_v45  ;;  %v520_v16 = vmul.f32 %v5114_v46, %v5114_v46 }
 0x148   : > { %v521_v17 = vmul.f32 %v5117_v48, %v5117_v48  ;;  %v522_v52 = vmul.f32 %v5120_v49, %v5120_v49  ;;  %1359 = vmatpush1.bf16.msra.mxu1 %v4163_v31 }
 0x149   : > { %v541_v19 = vadd.f32 %v520_v16, %v519_v51  ;;  %1360 = vmatprep.subr.bf16.mxu1 %v4167_v34  ;;  %1288 = vmatpush1.bf16.msra.mxu0 %v4166_v33 }
 0x14a   : > { %v544_v20 = vadd.f32 %v522_v52, %v521_v17  ;;  %1403 = vmatprep.subr.bf16.mxu0 %v4172_v6  ;;  %v5133_v52 = vsub.s32 1, %v5130_v14 }
 0x14b   : > { %539 = vadd.xlane.f32.xlu1 %v538_v50  ;;  %542 = vadd.xlane.f32.xlu0 %v541_v19  ;;  %v5136_v19 = vsub.s32 0, %v5130_v14 }
 0x14c   : > { %1361 = vmatpush1.bf16.msra.mxu1 %v4169_v5  ;;  %v5145_v60 = vrot.slane %v456_v54, %v5133_v52  ;;  %v5153_v23 = vrot.slane %v457_v59, %v5133_v52 }
 0x14d   : > { %6093 = vst [vmem:[#allocation21_spill] sm:$0xff] %v5136_v19  ;;  %v5148_v61 = vrot.slane %v456_v54, %v5136_v19  ;;  %v5158_v2 = vrot.slane %v457_v59, %v5136_v19  ;;  %v4176_v59 = vld [vmem:[#allocation6 + $0x70] ss:$24 sps:$4 sm:$0xff]  }
 0x14f   : > { %545 = vadd.xlane.f32.xlu1 %v544_v20 }
 0x1cc   : > { %v525_v35 = vpop.xlane.xlu0 %524 }
 0x1cd   : > { %v547_v8 = vmul.f32 0.00390625, %v525_v35 }
 0x1cf   : > { %v555_v37 = vadd.f32 1e-05, %v547_v8 }
 0x1d0   : > { %v528_v41 = vpop.xlane.xlu1 %527  ;;  %v531_v42 = vpop.xlane.xlu0 %530 }
 0x1d1   : > { %4314 = vrsqrt.f32 %v555_v37  ;;  %v548_v43 = vmul.f32 0.00390625, %v528_v41  ;;  %v549_v12 = vmul.f32 0.00390625, %v531_v42  ;;  %v4170_v41 = vld [vmem:[#allocation6 + $0x10] ss:$24 sps:$4 sm:$0xff]  }
 0x1d3   : > { %v556_v13 = vadd.f32 1e-05, %v548_v43  ;;  %v557_v44 = vadd.f32 1e-05, %v549_v12 }
 0x1d4   : > { %v534_v15 = vpop.xlane.xlu1 %533  ;;  %v537_v47 = vpop.xlane.xlu0 %536 }
 0x1d5   : > { %4316 = vrsqrt.f32 %v556_v13  ;;  %v550_v50 = vmul.f32 0.00390625, %v534_v15  ;;  %v551_v51 = vmul.f32 0.00390625, %v537_v47 }
 0x1d6   : > { %4318 = vrsqrt.f32 %v557_v44  ;;  %v4175_v44 = vld [vmem:[#allocation6 + $0x44] ss:$24 sps:$4 sm:$0xff]  }
 0x1d7   : > { %v558_v16 = vadd.f32 1e-05, %v550_v50  ;;  %v559_v17 = vadd.f32 1e-05, %v551_v51  ;;  %v4173_v51 = vld [vmem:[#allocation6 + $0x40] ss:$24 sps:$4 sm:$0xff]  }
 0x1d8   : > { %v540_v20 = vpop.xlane.xlu1 %539  ;;  %v543_v53 = vpop.xlane.xlu0 %542 }
 0x1d9   : > { %4320 = vrsqrt.f32 %v558_v16  ;;  %v552_v55 = vmul.f32 0.00390625, %v540_v20  ;;  %v553_v56 = vmul.f32 0.00390625, %v543_v53  ;;  %v4178_v53 = vld [vmem:[#allocation6 + $0x74] ss:$24 sps:$4 sm:$0xff]  }
 0x1da   : > { %4322 = vrsqrt.f32 %v559_v17 }
 0x1db   : > { %v4315_v57 = vpop.eup %4314  ;;  %v560_v58 = vadd.f32 1e-05, %v552_v55  ;;  %v561_v62 = vadd.f32 1e-05, %v553_v56 }
 0x1dc   : > { %v546_v63 = vpop.xlane.xlu1 %545  ;;  %v572_v3 = vmul.f32 %v4315_v57, %v5054_v10  ;;  %v571_v21 = vmul.f32 %v4315_v57, %v5051_v7 }
 0x1dd   : > { %4324 = vrsqrt.f32 %v560_v58  ;;  %v554_v22 = vmul.f32 0.00390625, %v546_v63 }
 0x1de   : > { %v599_v0 = vmul.f32 %v5145_v60, %v572_v3  ;;  %v598_v1 = vmul.f32 %v5148_v61, %v571_v21  ;;  %4326 = vrsqrt.f32 %v561_v62  ;;  %v4181_v3 = vld [vmem:[#allocation6 + $0xa4] ss:$24 sps:$4 sm:$0xff]  }
 0x1df   : > { %v4317_v24 = vpop.eup %4316  ;;  %v562_v25 = vadd.f32 1e-05, %v554_v22 }
 0x1e0   : > { %v4319_v27 = vpop.eup %4318  ;;  %v574_v10 = vmul.f32 %v4317_v24, %v5074_v4  ;;  %v573_v7 = vmul.f32 %v4317_v24, %v5071_v26  ;;  %v626_v34 = vadd.f32 %v5153_v23, %v599_v0  ;;  %v625_v5 = vadd.f32 %v5158_v2, %v598_v1 }
 0x1e1   : > { %4328 = vrsqrt.f32 %v562_v25  ;;  %v576_v30 = vmul.f32 %v4319_v27, %v5060_v18  ;;  %v575_v37 = vmul.f32 %v4319_v27, %v5057_v11  ;;  %v4184_v25 = vld [vmem:[#allocation6 + $0xd4] ss:$24 sps:$4 sm:$0xff]  }
 0x1e2   : > { %v601_v31 = vmul.f32 %v5145_v60, %v574_v10  ;;  %v600_v32 = vmul.f32 %v5148_v61, %v573_v7 }
 0x1e3   : > { %v4321_v33 = vpop.eup %4320  ;;  %v603_v6 = vmul.f32 %v5145_v60, %v576_v30  ;;  %v4182_v30 = vld [vmem:[#allocation6 + $0xd0] ss:$24 sps:$4 sm:$0xff]  }
 0x1e4   : > { %v4323_v35 = vpop.eup %4322  ;;  %v628_v8 = vadd.f32 %v5153_v23, %v601_v31  ;;  %v627_v4 = vadd.f32 %v5158_v2, %v600_v32  ;;  %v578_v26 = vmul.f32 %v4321_v33, %v5080_v29  ;;  %v577_v18 = vmul.f32 %v4321_v33, %v5077_v28  ;;  %v4187_v32 = vld [vmem:[#allocation6 + $0x104] ss:$24 sps:$4 sm:$0xff]  }
 0x1e5   : > { %v580_v12 = vmul.f32 %v4323_v35, %v5094_v36  ;;  %v630_v28 = vadd.f32 %v5153_v23, %v603_v6  ;;  %v602_v36 = vmul.f32 %v5148_v61, %v575_v37  ;;  %v579_v58 = vmul.f32 %v4323_v35, %v5091_v9  ;;  %v4188_v35 = vld [vmem:[#allocation6 + $0x130] ss:$24 sps:$4 sm:$0xff]   ;;  %v4199_v37 = vld [vmem:[#allocation6 + $0x1c4] ss:$24 sps:$4 sm:$0xff]  }
 0x1e6   : > { %v5173_v40 = vpack.c.bf16 %v628_v8, %v626_v34  ;;  %v5175_v42 = vpack.c.bf16 %v627_v4, %v625_v5  ;;  %v605_v43 = vmul.f32 %v5145_v60, %v578_v26  ;;  %v604_v15 = vmul.f32 %v5148_v61, %v577_v18  ;;  %v4185_v5 = vld [vmem:[#allocation6 + $0x100] ss:$24 sps:$4 sm:$0xff]   ;;  %v4193_v4 = vld [vmem:[#allocation6 + $0x164] ss:$24 sps:$4 sm:$0xff]   ;;  %v4196_v26 = vld [vmem:[#allocation6 + $0x194] ss:$24 sps:$4 sm:$0xff]  }
 0x1e7   : > { %v4325_v13 = vpop.eup %4324  ;;  %v607_v16 = vmul.f32 %v5145_v60, %v580_v12  ;;  %v629_v57 = vadd.f32 %v5158_v2, %v602_v36  ;;  %v606_v9 = vmul.f32 %v5148_v61, %v579_v58  ;;  %v4194_v18 = vld [vmem:[#allocation6 + $0x190] ss:$24 sps:$4 sm:$0xff]   ;;  %v4205_v12 = vld [vmem:[#allocation6 + $0x224] ss:$24 sps:$4 sm:$0xff]  }
 0x1e8   : > { %1289 = vmatprep.mubr.bf16.mxu0 %v5173_v40  ;;  %1362 = vmatprep.mubr.bf16.mxu1 %v5173_v40  ;;  %v632_v11 = vadd.f32 %v5153_v23, %v605_v43  ;;  %v582_v29 = vmul.f32 %v4325_v13, %v5100_v39  ;;  %v4327_v47 = vpop.eup %4326  ;;  %v631_v39 = vadd.f32 %v5158_v2, %v604_v15  ;;  %v4200_v43 = vld [vmem:[#allocation6 + $0x1f0] ss:$24 sps:$4 sm:$0xff]   ;;  %v4211_v15 = vld [vmem:[#allocation6 + $0x284] ss:$24 sps:$4 sm:$0xff]  }
 0x1e9   : > { %1290 = vmatmul.mubr.bf16.vlgmr.msra.gmra.mrb[0].mxu0 %v5175_v42  ;;  %1363 = vmatmul.mubr.bf16.vlgmr.msra.gmra.mrb[0].mxu1 %v5175_v42  ;;  %v581_v54 = vmul.f32 %v4325_v13, %v5097_v38  ;;  %v634_v62 = vadd.f32 %v5153_v23, %v607_v16  ;;  %v584_v63 = vmul.f32 %v4327_v47, %v5114_v46  ;;  %v4179_v46 = vld [vmem:[#allocation6 + $0xa0] ss:$24 sps:$4 sm:$0xff]   ;;  %v4217_v36 = vld [vmem:[#allocation6 + $0x2e4] ss:$24 sps:$4 sm:$0xff]  }
 0x1ea   : > { %1404 = vmatpush1.bf16.msra.mxu0 %v4170_v41  ;;  %v5188_v50 = vpack.c.bf16 %v632_v11, %v630_v28  ;;  %v609_v17 = vmul.f32 %v5145_v60, %v582_v29  ;;  %v5202_v38 = vpack.c.bf16 %v631_v39, %v629_v57  ;;  %v633_v10 = vadd.f32 %v5158_v2, %v606_v9  ;;  %v4197_v41 = vld [vmem:[#allocation6 + $0x1c0] ss:$24 sps:$4 sm:$0xff]   ;;  %v4214_v11 = vld [vmem:[#allocation6 + $0x2b4] ss:$24 sps:$4 sm:$0xff]   ;;  %v4212_v29 = vld [vmem:[#allocation6 + $0x2b0] ss:$24 sps:$4 sm:$0xff]  }
 0x1eb   : > { %v4329_v20 = vpop.eup %4328  ;;  %1405 = vmatprep.subr.bf16.mxu0 %v4175_v44  ;;  %v608_v21 = vmul.f32 %v5148_v61, %v581_v54  ;;  %v611_v24 = vmul.f32 %v5145_v60, %v584_v63  ;;  %v583_v7 = vmul.f32 %v4327_v47, %v5111_v45  ;;  %v4190_v45 = vld [vmem:[#allocation6 + $0x134] ss:$24 sps:$4 sm:$0xff]   ;;  %v4203_v13 = vld [vmem:[#allocation6 + $0x220] ss:$24 sps:$4 sm:$0xff]  }
 0x1ec   : > { %1299 = vmatprep.mubr.bf16.mxu0 %v5188_v50  ;;  %1372 = vmatprep.mubr.bf16.mxu1 %v5188_v50  ;;  %v636_v55 = vadd.f32 %v5153_v23, %v609_v17  ;;  %v586_v56 = vmul.f32 %v4329_v20, %v5120_v49  ;;  %v585_v1 = vmul.f32 %v4329_v20, %v5117_v48  ;;  %v4208_v44 = vld [vmem:[#allocation6 + $0x254] ss:$24 sps:$4 sm:$0xff]   ;;  %v4209_v28 = vld [vmem:[#allocation6 + $0x280] ss:$24 sps:$4 sm:$0xff]  }
 0x1ed   : > { %v635_v0 = vadd.f32 %v5158_v2, %v608_v21  ;;  %v638_v31 = vadd.f32 %v5153_v23, %v611_v24  ;;  %v610_v48 = vmul.f32 %v5148_v61, %v583_v7  ;;  %v4215_v47 = vld [vmem:[#allocation6 + $0x2e0] ss:$24 sps:$4 sm:$0xff]  }
 0x1ee   : > { %1406 = vmatpush1.bf16.msra.mxu0 %v4173_v51  ;;  %v5205_v22 = vpack.c.bf16 %v636_v55, %v634_v62  ;;  %v613_v49 = vmul.f32 %v5145_v60, %v586_v56  ;;  %v612_v33 = vmul.f32 %v5148_v61, %v585_v1  ;;  %v4191_v61 = vld [vmem:[#allocation6 + $0x160] ss:$24 sps:$4 sm:$0xff]   ;;  %v757_v51 = vsub.s32 2, %v5130_v14 }
 0x1ef   : > { %1407 = vmatprep.subr.bf16.mxu0 %v4178_v53  ;;  %v645_v60 = vpack.c.bf16 %v635_v0, %v633_v10  ;;  %v5233_v16 = vld [vmem:[%s6049_s4] sm:$0x3f] }
 0x1f0   : > { %v640_v27 = vadd.f32 %v5153_v23, %v613_v49  ;;  %v639_v6 = vadd.f32 %v5158_v2, %v612_v33  ;;  %v637_v23 = vadd.f32 %v5158_v2, %v610_v48  ;;  %v4202_v2 = vld [vmem:[#allocation6 + $0x1f4] ss:$24 sps:$4 sm:$0xff]   ;;  %v5236_v17 = vrot.slane %v5233_v16, %v757_v51 }
 0x1f1   : > { %1300 = vmatmul.mubr.bf16.gmra.mrb[4].mxu0 %v5202_v38  ;;  %1373 = vmatmul.mubr.bf16.gmra.mrb[4].mxu1 %v5202_v38 }
 0x1f2   : > { %1408 = vmatpush1.bf16.msra.mxu0 %v4176_v59  ;;  %1309 = vmatprep.mubr.bf16.mxu0 %v5205_v22  ;;  %v648_v34 = vpack.c.bf16 %v640_v27, %v638_v31  ;;  %v647_v8 = vpack.c.bf16 %v639_v6, %v637_v23 }
 0x1f3   : > { %1382 = vmatprep.mubr.bf16.mxu1 %v5205_v22  ;;  %1409 = vmatprep.subr.bf16.mxu0 %v4181_v3 }
 0x1f6   : > { %1410 = vmatpush1.bf16.msra.mxu0 %v4179_v46 }
 0x1f7   : > { %1411 = vmatprep.subr.bf16.mxu0 %v4184_v25 }
 0x1f9   : > { %1310 = vmatmul.mubr.bf16.gmra.mrb[8].mxu0 %v645_v60  ;;  %1383 = vmatmul.mubr.bf16.gmra.mrb[8].mxu1 %v645_v60 }
 0x1fa   : > { %1412 = vmatpush1.bf16.msra.mxu0 %v4182_v30  ;;  %1319 = vmatprep.mubr.bf16.mxu0 %v648_v34 }
 0x1fb   : > { %1392 = vmatprep.mubr.bf16.mxu1 %v648_v34  ;;  %1413 = vmatprep.subr.bf16.mxu0 %v4187_v32 }
 0x1fe   : > { %1414 = vmatpush1.bf16.msra.mxu0 %v4185_v5 }
 0x1ff   : > { %1415 = vmatprep.subr.bf16.mxu0 %v4190_v45 }
 0x201   : > { %1320 = vmatmul.mubr.bf16.gmra.mrb[12].mxu0 %v647_v8  ;;  %1393 = vmatmul.mubr.bf16.gmra.mrb[12].mxu1 %v647_v8 }
 0x202   : > { %1416 = vmatpush1.bf16.msra.mxu0 %v4188_v35  ;;  %1435 = vmatprep.mubr.bf16.mxu0 %v5173_v40  ;;  %v4206_v40 = vld [vmem:[#allocation6 + $0x250] ss:$24 sps:$4 sm:$0xff]  }
 0x203   : > { %1417 = vmatprep.subr.bf16.mxu0 %v4193_v4 }
 0x206   : > { %1418 = vmatpush1.bf16.msra.mxu0 %v4191_v61 }
 0x207   : > { %1419 = vmatprep.subr.bf16.mxu0 %v4196_v26 }
 0x20a   : > { %1420 = vmatpush1.bf16.msra.mxu0 %v4194_v18 }
 0x20b   : > { %1421 = vmatprep.subr.bf16.mxu0 %v4199_v37 }
 0x20e   : > { %1422 = vmatpush1.bf16.msra.mxu0 %v4197_v41 }
 0x20f   : > { %1423 = vmatprep.subr.bf16.mxu0 %v4202_v2 }
 0x212   : > { %1424 = vmatpush1.bf16.msra.mxu0 %v4200_v43 }
 0x213   : > { %1425 = vmatprep.subr.bf16.mxu0 %v4205_v12 }
 0x216   : > { %1426 = vmatpush1.bf16.msra.mxu0 %v4203_v13 }
 0x217   : > { %1427 = vmatprep.subr.bf16.mxu0 %v4208_v44 }
 0x21a   : > { %1428 = vmatpush1.bf16.msra.mxu0 %v4206_v40 }
 0x21b   : > { %1429 = vmatprep.subr.bf16.mxu0 %v4211_v15 }
 0x21e   : > { %1430 = vmatpush1.bf16.msra.mxu0 %v4209_v28 }
 0x21f   : > { %1431 = vmatprep.subr.bf16.mxu0 %v4214_v11 }
 0x222   : > { %1432 = vmatpush1.bf16.msra.mxu0 %v4212_v29 }
 0x223   : > { %1433 = vmatprep.subr.bf16.mxu0 %v4217_v36 }
 0x226   : > { %1434 = vmatpush1.bf16.msra.mxu0 %v4215_v47 }
 0x229   : > { %1436 = vmatmul.mubr.bf16.vlgmr.msra.gmra.mrb[16].mxu0 %v5175_v42  ;;  %v5240_v42 = vrot.slane %v5233_v16, %v5136_v19 }
 0x22a   : > { %1445 = vmatprep.mubr.bf16.mxu0 %v5188_v50 }
 0x231   : > { %1446 = vmatmul.mubr.bf16.gmra.mrb[20].mxu0 %v5202_v38 }
 0x232   : > { %1455 = vmatprep.mubr.bf16.mxu0 %v5205_v22 }
 0x239   : > { %1456 = vmatmul.mubr.bf16.gmra.mrb[24].mxu0 %v645_v60 }
 0x23a   : > { %1465 = vmatprep.mubr.bf16.mxu0 %v648_v34 }
 0x241   : > { %1466 = vmatmul.mubr.bf16.gmra.mrb[28].mxu0 %v647_v8 }
 0x2bc   : > { %v1291_v50 = vpop.f32.mrb[0].mxu0  ;;  %v1364_v20 = vpop.f32.mrb[0].mxu1 }
 0x2bd   : > { %v5243_v53 = vadd.f32 %v1364_v20, %v5236_v17  ;;  %v5245_v39 = vpop.f32.mrb[1].mxu0  ;;  %v5247_v54 = vpop.f32.mrb[1].mxu1  ;;  %v5250_v57 = vadd.f32 %v1291_v50, %v5240_v42 }
 0x2be   : > { %v1295_v55 = vpop.f32.mrb[2].mxu0  ;;  %v1368_v56 = vpop.f32.mrb[2].mxu1 }
 0x2bf   : > { %v5253_v58 = vadd.f32 %v1368_v56, %v5236_v17  ;;  %v5255_v59 = vpop.f32.mrb[3].mxu0  ;;  %v5257_v62 = vpop.f32.mrb[3].mxu1  ;;  %v1524_v63 = vmul.f32 %v5243_v53, %v5243_v53  ;;  %v5262_v38 = vadd.f32 %v1295_v55, %v5240_v42  ;;  %v1476_v21 = vmul.f32 %v5250_v57, %v5250_v57 }
 0x2c1   : > { %1532 = vadd.xlane.f32.xlu0 %v1524_v63  ;;  %v1525_v3 = vmul.f32 %v5253_v58, %v5253_v58  ;;  %v1477_v25 = vmul.f32 %v5262_v38, %v5262_v38 }
 0x2c3   : > { %1534 = vadd.xlane.f32.xlu1 %v1525_v3  ;;  %v6061_v3 = vmov 0.0  }
 0x2c4   : > { %v1301_v22 = vpop.f32.mrb[4].mxu0  ;;  %v1374_v49 = vpop.f32.mrb[4].mxu1  ;;  %3881 = vmatprep.subr.bf16.mxu1 %v6061_v3  ;;  %3929 = vmatprep.subr.bf16.mxu0 %v6061_v3 }
 0x2c5   : > { %v5269_v9 = vadd.f32 %v1374_v49, %v5236_v17  ;;  %1484 = vadd.xlane.f32.xlu0 %v1476_v21  ;;  %v5271_v46 = vpop.f32.mrb[5].mxu0  ;;  %v5273_v24 = vpop.f32.mrb[5].mxu1  ;;  %v5278_v27 = vadd.f32 %v1301_v22, %v5240_v42  ;;  %3883 = vmatprep.mubr.msk.bf16.mxu1 %vm4699_vm0, %v6061_v3  ;;  %v769_v21 = vsub.s32 5, %v5130_v14 }
 0x2c6   : > { %v1305_v0 = vpop.f32.mrb[6].mxu0  ;;  %v1378_v1 = vpop.f32.mrb[6].mxu1  ;;  %3931 = vmatprep.mubr.msk.bf16.mxu0 %vm4699_vm0, %v6061_v3 }
 0x2c7   : > { %v5281_v10 = vadd.f32 %v1378_v1, %v5236_v17  ;;  %1486 = vadd.xlane.f32.xlu1 %v1477_v25  ;;  %v5283_v7 = vpop.f32.mrb[7].mxu0  ;;  %v5285_v30 = vpop.f32.mrb[7].mxu1  ;;  %v1526_v31 = vmul.f32 %v5269_v9, %v5269_v9  ;;  %v5290_v60 = vadd.f32 %v1305_v0, %v5240_v42  ;;  %v1478_v33 = vmul.f32 %v5278_v27, %v5278_v27 }
 0x2c8   : > { %v770_v25 = vrot.slane %v5233_v16, %v769_v21 }
 0x2c9   : > { %1536 = vadd.xlane.f32.xlu0 %v1526_v31  ;;  %v1527_v32 = vmul.f32 %v5281_v10, %v5281_v10  ;;  %v1479_v23 = vmul.f32 %v5290_v60, %v5290_v60 }
 0x2cb   : > { %1538 = vadd.xlane.f32.xlu1 %v1527_v32 }
 0x2cc   : > { %v1311_v34 = vpop.f32.mrb[8].mxu0  ;;  %v1384_v48 = vpop.f32.mrb[8].mxu1 }
 0x2cd   : > { %v5297_v5 = vadd.f32 %v1384_v48, %v5236_v17  ;;  %1488 = vadd.xlane.f32.xlu0 %v1478_v33  ;;  %v5299_v45 = vpop.f32.mrb[9].mxu0  ;;  %v5301_v6 = vpop.f32.mrb[9].mxu1  ;;  %v5306_v4 = vadd.f32 %v1311_v34, %v5240_v42 }
 0x2ce   : > { %v1315_v35 = vpop.f32.mrb[10].mxu0  ;;  %v1388_v8 = vpop.f32.mrb[10].mxu1 }
 0x2cf   : > { %v5309_v61 = vadd.f32 %v1388_v8, %v5236_v17  ;;  %1490 = vadd.xlane.f32.xlu1 %v1479_v23  ;;  %v5311_v26 = vpop.f32.mrb[11].mxu0  ;;  %v5313_v18 = vpop.f32.mrb[11].mxu1  ;;  %v1528_v37 = vmul.f32 %v5297_v5, %v5297_v5  ;;  %v5318_v41 = vadd.f32 %v1315_v35, %v5240_v42  ;;  %v1480_v43 = vmul.f32 %v5306_v4, %v5306_v4 }
 0x2d1   : > { %1540 = vadd.xlane.f32.xlu0 %v1528_v37  ;;  %v1529_v2 = vmul.f32 %v5309_v61, %v5309_v61  ;;  %v1481_v28 = vmul.f32 %v5318_v41, %v5318_v41 }
 0x2d3   : > { %1542 = vadd.xlane.f32.xlu1 %v1529_v2 }
 0x2d4   : > { %v1321_v12 = vpop.f32.mrb[12].mxu0  ;;  %v1394_v13 = vpop.f32.mrb[12].mxu1 }
 0x2d5   : > { %v5325_v44 = vadd.f32 %v1394_v13, %v5236_v17  ;;  %1492 = vadd.xlane.f32.xlu0 %v1480_v43  ;;  %v5327_v40 = vpop.f32.mrb[13].mxu0  ;;  %v5329_v15 = vpop.f32.mrb[13].mxu1  ;;  %v5334_v36 = vadd.f32 %v1321_v12, %v5240_v42 }
 0x2d6   : > { %v1325_v11 = vpop.f32.mrb[14].mxu0  ;;  %v1398_v29 = vpop.f32.mrb[14].mxu1 }
 0x2d7   : > { %v5337_v47 = vadd.f32 %v1398_v29, %v5236_v17  ;;  %1494 = vadd.xlane.f32.xlu1 %v1481_v28  ;;  %v5339_v51 = vpop.f32.mrb[15].mxu0  ;;  %v5341_v50 = vpop.f32.mrb[15].mxu1  ;;  %v1530_v20 = vmul.f32 %v5325_v44, %v5325_v44  ;;  %v5346_v55 = vadd.f32 %v1325_v11, %v5240_v42  ;;  %v1482_v17 = vmul.f32 %v5334_v36, %v5334_v36 }
 0x2d8   : > { %v765_v42 = vsub.s32 4, %v5130_v14 }
 0x2d9   : > { %1544 = vadd.xlane.f32.xlu0 %v1530_v20  ;;  %v1531_v56 = vmul.f32 %v5337_v47, %v5337_v47  ;;  %v1483_v63 = vmul.f32 %v5346_v55, %v5346_v55 }
 0x2da   : > { %v766_v22 = vrot.slane %v5233_v16, %v765_v42 }
 0x2db   : > { %1546 = vadd.xlane.f32.xlu1 %v1531_v56 }
 0x2dd   : > { %1496 = vadd.xlane.f32.xlu0 %v1482_v17 }
 0x2df   : > { %1498 = vadd.xlane.f32.xlu1 %v1483_v63 }
 0x2fc   : > { %v1437_v49 = vpop.f32.mrb[16].mxu0 }
 0x2fd   : > { %v1439_v0 = vpop.f32.mrb[17].mxu0  ;;  %v5364_v31 = vadd.f32 %v1437_v49, %v766_v22 }
 0x2fe   : > { %v1441_v1 = vpop.f32.mrb[18].mxu0  ;;  %v5368_v34 = vadd.f32 %v1439_v0, %v770_v25 }
 0x2ff   : > { %v5366_v32 = vadd.f32 %v1441_v1, %v766_v22  ;;  %v1443_v33 = vpop.f32.mrb[19].mxu0 }
 0x300   : > { %v5370_v48 = vadd.f32 %v1443_v33, %v770_v25 }
 0x304   : > { %v1447_v8 = vpop.f32.mrb[20].mxu0 }
 0x305   : > { %v5376_v37 = vadd.f32 %v1447_v8, %v766_v22  ;;  %v1449_v2 = vpop.f32.mrb[21].mxu0 }
 0x306   : > { %v1451_v43 = vpop.f32.mrb[22].mxu0  ;;  %v5380_v28 = vadd.f32 %v1449_v2, %v770_v25 }
 0x307   : > { %v5378_v12 = vadd.f32 %v1451_v43, %v766_v22  ;;  %v1453_v13 = vpop.f32.mrb[23].mxu0 }
 0x308   : > { %v5382_v11 = vadd.f32 %v1453_v13, %v770_v25 }
 0x30c   : > { %v1457_v56 = vpop.f32.mrb[24].mxu0 }
 0x30d   : > { %v5388_v17 = vadd.f32 %v1457_v56, %v766_v22  ;;  %v1459_v63 = vpop.f32.mrb[25].mxu0 }
 0x30e   : > { %v5390_v42 = vadd.f32 %v1459_v63, %v770_v25  ;;  %v1461_v21 = vpop.f32.mrb[26].mxu0 }
 0x30f   : > { %v5392_v49 = vadd.f32 %v1461_v21, %v766_v22  ;;  %v1463_v0 = vpop.f32.mrb[27].mxu0 }
 0x310   : > { %6094 = vst [vmem:[#allocation22_spill] sm:$0xff] %v5390_v42  ;;  %v5394_v1 = vadd.f32 %v1463_v0, %v770_v25 }
 0x312   : > { %6095 = vst [vmem:[#allocation23_spill] sm:$0xff] %v5394_v1 }
 0x314   : > { %v1467_v2 = vpop.f32.mrb[28].mxu0 }
 0x315   : > { %v5400_v43 = vadd.f32 %v1467_v2, %v766_v22  ;;  %v1469_v13 = vpop.f32.mrb[29].mxu0 }
 0x316   : > { %v5402_v56 = vadd.f32 %v1469_v13, %v770_v25  ;;  %v1471_v63 = vpop.f32.mrb[30].mxu0 }
 0x317   : > { %v5404_v20 = vadd.f32 %v1471_v63, %v766_v22  ;;  %v1473_v21 = vpop.f32.mrb[31].mxu0 }
 0x318   : > { %6096 = vst [vmem:[#allocation24_spill] sm:$0xff] %v5402_v56  ;;  %v5406_v35 = vadd.f32 %v1473_v21, %v770_v25 }
 0x31a   : > { %6097 = vst [vmem:[#allocation25_spill] sm:$0xff] %v5406_v35 }
 0x34e   : > { %v1533_v29 = vpop.xlane.xlu0 %1532 }
 0x34f   : > { %v1548_v8 = vmax.f32 %v1533_v29, 1e-24 }
 0x350   : > { %v1535_v23 = vpop.xlane.xlu1 %1534 }
 0x351   : > { %4330 = vrsqrt.f32 %v1548_v8  ;;  %v1549_v2 = vmax.f32 %v1535_v23, 1e-24 }
 0x352   : > { %v1485_v3 = vpop.xlane.xlu0 %1484 }
 0x353   : > { %4332 = vrsqrt.f32 %v1549_v2  ;;  %v1500_v13 = vmax.f32 %v1485_v3, 1e-24 }
 0x354   : > { %v1487_v19 = vpop.xlane.xlu1 %1486 }
 0x355   : > { %v1501_v22 = vmax.f32 %v1487_v19, 1e-24 }
 0x356   : > { %v1537_v63 = vpop.xlane.xlu0 %1536 }
 0x357   : > { %4334 = vrsqrt.f32 %v1501_v22  ;;  %v1550_v25 = vmax.f32 %v1537_v63, 1e-24 }
 0x358   : > { %4336 = vrsqrt.f32 %v1500_v13  ;;  %v1539_v21 = vpop.xlane.xlu1 %1538 }
 0x359   : > { %4338 = vrsqrt.f32 %v1550_v25  ;;  %v1551_v0 = vmax.f32 %v1539_v21, 1e-24 }
 0x35a   : > { %v1489_v42 = vpop.xlane.xlu0 %1488 }
 0x35b   : > { %v4331_v1 = vpop.eup %4330  ;;  %4340 = vrsqrt.f32 %v1551_v0  ;;  %v1502_v33 = vmax.f32 %v1489_v42, 1e-24 }
 0x35c   : > { %v1491_v29 = vpop.xlane.xlu1 %1490  ;;  %v1564_v2 = vmul.f32 %v4331_v1, %v5243_v53 }
 0x35d   : > { %v4333_v56 = vpop.eup %4332  ;;  %v1503_v8 = vmax.f32 %v1491_v29, 1e-24  ;;  %v6098_v29 = vmov 0.0  }
 0x35e   : > { %v1541_v23 = vpop.xlane.xlu0 %1540  ;;  %v1565_v3 = vmul.f32 %v4333_v56, %v5253_v58 }
 0x35f   : > { %4342 = vrsqrt.f32 %v1503_v8  ;;  %v1552_v19 = vmax.f32 %v1541_v23, 1e-24 }
 0x360   : > { %4344 = vrsqrt.f32 %v1502_v33  ;;  %v1543_v22 = vpop.xlane.xlu1 %1542  ;;  %v1576_v13 = vpack.c.bf16 %v1565_v3, %v1564_v2 }
 0x361   : > { %v4335_v63 = vpop.eup %4334  ;;  %4346 = vrsqrt.f32 %v1552_v19  ;;  %v1553_v25 = vmax.f32 %v1543_v22, 1e-24 }
 0x362   : > { %v4337_v21 = vpop.eup %4336  ;;  %3882 = vmatpush3.bf16.xpose.msra.mxu1 %v1576_v13  ;;  %v1493_v0 = vpop.xlane.xlu0 %1492  ;;  %v1517_v35 = vmul.f32 %v4335_v63, %v5262_v38 }
 0x363   : > { %v4339_v42 = vpop.eup %4338  ;;  %4348 = vrsqrt.f32 %v1553_v25  ;;  %3887 = vmatprep.subr.bf16.mxu1 %v6098_v29  ;;  %v1504_v53 = vmax.f32 %v1493_v0, 1e-24  ;;  %v1516_v56 = vmul.f32 %v4337_v21, %v5250_v57 }
 0x364   : > { %v1495_v1 = vpop.xlane.xlu1 %1494  ;;  %v1566_v23 = vmul.f32 %v4339_v42, %v5269_v9 }
 0x365   : > { %v4341_v58 = vpop.eup %4340  ;;  %v1505_v33 = vmax.f32 %v1495_v1, 1e-24  ;;  %v1572_v19 = vpack.c.bf16 %v1517_v35, %v1516_v56 }
 0x366   : > { %v1545_v8 = vpop.xlane.xlu0 %1544  ;;  %v1567_v2 = vmul.f32 %v4341_v58, %v5281_v10 }
 0x367   : > { %4350 = vrsqrt.f32 %v1505_v33  ;;  %v1554_v3 = vmax.f32 %v1545_v8, 1e-24 }
 0x368   : > { %4352 = vrsqrt.f32 %v1504_v53  ;;  %v1547_v22 = vpop.xlane.xlu1 %1546  ;;  %v1577_v38 = vpack.c.bf16 %v1567_v2, %v1566_v23 }
 0x369   : > { %v4343_v13 = vpop.eup %4342  ;;  %4354 = vrsqrt.f32 %v1554_v3  ;;  %v1555_v63 = vmax.f32 %v1547_v22, 1e-24  ;;  %3884 = vmatmul.mubr.bf16.vlgmr.msra.gmra.mrb[16].mxu1 %v1572_v19 }
 0x36a   : > { %v4345_v25 = vpop.eup %4344  ;;  %3888 = vmatpush3.bf16.xpose.msra.mxu1 %v1577_v38  ;;  %v1497_v0 = vpop.xlane.xlu0 %1496  ;;  %3889 = vmatprep.mubr.msk.bf16.mxu1 %vm4699_vm0, %v6098_v29  ;;  %v1519_v9 = vmul.f32 %v4343_v13, %v5290_v60 }
 0x36b   : > { %v4347_v57 = vpop.eup %4346  ;;  %4356 = vrsqrt.f32 %v1555_v63  ;;  %3893 = vmatprep.subr.bf16.mxu1 %v6098_v29  ;;  %v1506_v10 = vmax.f32 %v1497_v0, 1e-24  ;;  %v1518_v53 = vmul.f32 %v4345_v25, %v5278_v27 }
 0x36c   : > { %v1499_v35 = vpop.xlane.xlu1 %1498  ;;  %v1568_v1 = vmul.f32 %v4347_v57, %v5297_v5 }
 0x36d   : > { %v4349_v21 = vpop.eup %4348  ;;  %v1507_v42 = vmax.f32 %v1499_v35, 1e-24  ;;  %v1573_v56 = vpack.c.bf16 %v1519_v9, %v1518_v53 }
 0x36e   : > { %v1569_v58 = vmul.f32 %v4349_v21, %v5309_v61 }
 0x36f   : > { %4358 = vrsqrt.f32 %v1507_v42 }
 0x370   : > { %4360 = vrsqrt.f32 %v1506_v10  ;;  %v1578_v33 = vpack.c.bf16 %v1569_v58, %v1568_v1 }
 0x371   : > { %v4351_v8 = vpop.eup %4350  ;;  %3890 = vmatmul.mubr.bf16.vlgmr.msra.gmra.mrb[20].mxu1 %v1573_v56 }
 0x372   : > { %v4353_v23 = vpop.eup %4352  ;;  %3894 = vmatpush3.bf16.xpose.msra.mxu1 %v1578_v33  ;;  %3895 = vmatprep.mubr.msk.bf16.mxu1 %vm4699_vm0, %v6098_v29  ;;  %v1521_v2 = vmul.f32 %v4351_v8, %v5318_v41 }
 0x373   : > { %v4355_v60 = vpop.eup %4354  ;;  %3899 = vmatprep.subr.bf16.mxu1 %v6098_v29  ;;  %v1520_v5 = vmul.f32 %v4353_v23, %v5306_v4 }
 0x374   : > { %v1570_v61 = vmul.f32 %v4355_v60, %v5325_v44  ;;  %v6099_v44 = vpack.c.bf16 %v5366_v32, %v5364_v31 }
 0x375   : > { %v4357_v27 = vpop.eup %4356  ;;  %v1574_v19 = vpack.c.bf16 %v1521_v2, %v1520_v5 }
 0x376   : > { %v1571_v3 = vmul.f32 %v4357_v27, %v5337_v47  ;;  %v1745_v47 = vstv %s1744_s12 }
 0x378   : > { %v1579_v22 = vpack.c.bf16 %v1571_v3, %v1570_v61 }
 0x379   : > { %v4359_v38 = vpop.eup %4358  ;;  %3896 = vmatmul.mubr.bf16.vlgmr.msra.gmra.mrb[24].mxu1 %v1574_v19 }
 0x37a   : > { %v4361_v13 = vpop.eup %4360  ;;  %3900 = vmatpush3.bf16.xpose.msra.mxu1 %v1579_v22  ;;  %3901 = vmatprep.mubr.msk.bf16.mxu1 %vm4699_vm0, %v6098_v29  ;;  %v1523_v41 = vmul.f32 %v4359_v38, %v5346_v55 }
 0x37b   : > { %3905 = vmatprep.subr.bf16.mxu1 %v6098_v29  ;;  %v1522_v63 = vmul.f32 %v4361_v13, %v5334_v36 }
 0x37d   : > { %v1575_v4 = vpack.c.bf16 %v1523_v41, %v1522_v63 }
 0x381   : > { %3902 = vmatmul.mubr.bf16.vlgmr.msra.gmra.mrb[28].mxu1 %v1575_v4 }
 0x382   : > { %3906 = vmatpush3.bf16.msra.mxu1 %v6099_v44  ;;  %3907 = vmatprep.mubr.msk.bf16.mxu1 %vm4699_vm0, %v6098_v29 }
 0x383   : > { %3911 = vmatprep.subr.bf16.mxu1 %v6098_v29 }
 0x43c   : > { %v1614_v25 = vpop.f32.mrb[16].mxu1 }
 0x43d   : > { %v1746_v55 = vmul.f32 %v1745_v47, %v1614_v25  ;;  %v3885_v0 = vpop.f32.mrb[17].mxu1 }
 0x43e   : > { %v1617_v57 = vpop.f32.mrb[18].mxu1 }
 0x43f   : > { %v1747_v9 = vmul.f32 %v1745_v47, %v1617_v57  ;;  %v3886_v36 = vpop.f32.mrb[19].mxu1  ;;  %v1755_v10 = vsel %vm1754_vm1, %v1746_v55, -inf }
 0x440   : > { %1756 = vmax.xlane.f32.xlu0 %v1755_v10 }
 0x441   : > { %v1758_v31 = vsel %vm1754_vm1, %v1747_v9, -inf }
 0x442   : > { %1759 = vmax.xlane.f32.xlu1 %v1758_v31  ;;  %v761_v31 = vsub.s32 3, %v5130_v14 }
 0x444   : > { %v1655_v32 = vpop.f32.mrb[20].mxu1 }
 0x445   : > { %v1748_v35 = vmul.f32 %v1745_v47, %v1655_v32  ;;  %v3891_v21 = vpop.f32.mrb[21].mxu1 }
 0x446   : > { %v1658_v42 = vpop.f32.mrb[22].mxu1 }
 0x447   : > { %v1749_v53 = vmul.f32 %v1745_v47, %v1658_v42  ;;  %v3892_v1 = vpop.f32.mrb[23].mxu1  ;;  %v1761_v58 = vsel %vm1754_vm1, %v1748_v35, -inf  ;;  %v5454_v42 = vrot.slane %v5233_v16, %v761_v31 }
 0x448   : > { %1762 = vmax.xlane.f32.xlu0 %v1761_v58 }
 0x449   : > { %v1764_v56 = vsel %vm1754_vm1, %v1749_v53, -inf }
 0x44a   : > { %1765 = vmax.xlane.f32.xlu1 %v1764_v56 }
 0x44c   : > { %v1696_v33 = vpop.f32.mrb[24].mxu1 }
 0x44d   : > { %v1750_v8 = vmul.f32 %v1745_v47, %v1696_v33  ;;  %v3897_v23 = vpop.f32.mrb[25].mxu1 }
 0x44e   : > { %v1699_v60 = vpop.f32.mrb[26].mxu1  ;;  %v5468_v23 = vadd.f32 %v5257_v62, %v5454_v42 }
 0x44f   : > { %v1751_v2 = vmul.f32 %v1745_v47, %v1699_v60  ;;  %v3898_v27 = vpop.f32.mrb[27].mxu1  ;;  %v1767_v5 = vsel %vm1754_vm1, %v1750_v8, -inf }
 0x450   : > { %1768 = vmax.xlane.f32.xlu0 %v1767_v5  ;;  %v2076_v62 = vmul.f32 %v5468_v23, %v5468_v23 }
 0x451   : > { %v1770_v61 = vsel %vm1754_vm1, %v1751_v2, -inf }
 0x452   : > { %1771 = vmax.xlane.f32.xlu1 %v1770_v61 }
 0x454   : > { %v1737_v3 = vpop.f32.mrb[28].mxu1 }
 0x455   : > { %v1752_v19 = vmul.f32 %v1745_v47, %v1737_v3  ;;  %v3903_v22 = vpop.f32.mrb[29].mxu1 }
 0x456   : > { %v1740_v38 = vpop.f32.mrb[30].mxu1 }
 0x457   : > { %v1753_v13 = vmul.f32 %v1745_v47, %v1740_v38  ;;  %v3904_v41 = vpop.f32.mrb[31].mxu1  ;;  %v1773_v63 = vsel %vm1754_vm1, %v1752_v19, -inf }
 0x458   : > { %1774 = vmax.xlane.f32.xlu0 %v1773_v63 }
 0x459   : > { %v1776_v4 = vsel %vm1754_vm1, %v1753_v13, -inf }
 0x45a   : > { %1777 = vmax.xlane.f32.xlu1 %v1776_v4 }
 0x4cd   : > { %v1757_v44 = vpop.xlane.xlu0 %1756 }
 0x4ce   : > { %v1779_v25 = vsub.f32 %v1746_v55, %v1757_v44  ;;  %v5460_v55 = vadd.f32 %v5247_v54, %v5454_v42  ;;  %v5474_v54 = vrot.slane %v5233_v16, %v5133_v52 }
 0x4cf   : > { %v1760_v0 = vpop.xlane.xlu1 %1759 }
 0x4d0   : > { %v1787_v57 = vmul.f32 1.442695, %v1779_v25  ;;  %v1780_v36 = vsub.f32 %v1747_v9, %v1760_v0  ;;  %v2075_v3 = vmul.f32 %v5460_v55, %v5460_v55  ;;  %v5484_v38 = vadd.f32 %v5245_v39, %v5474_v54 }
 0x4d1   : > { %v5492_v63 = vadd.f32 %v5255_v59, %v5474_v54 }
 0x4d2   : > { %4362 = vpow2.f32 %v1787_v57  ;;  %v1789_v10 = vmul.f32 1.442695, %v1780_v36  ;;  %v2027_v57 = vmul.f32 %v5484_v38, %v5484_v38 }
 0x4d4   : > { %4364 = vpow2.f32 %v1789_v10  ;;  %v2028_v10 = vmul.f32 %v5492_v63, %v5492_v63 }
 0x4d5   : > { %v1763_v32 = vpop.xlane.xlu0 %1762 }
 0x4d6   : > { %v1781_v21 = vsub.f32 %v1748_v35, %v1763_v32  ;;  %v5512_v32 = vadd.f32 %v5285_v30, %v5454_v42 }
 0x4d7   : > { %v1766_v47 = vpop.xlane.xlu1 %1765 }
 0x4d8   : > { %v1791_v1 = vmul.f32 1.442695, %v1781_v21  ;;  %v1782_v58 = vsub.f32 %v1749_v53, %v1766_v47  ;;  %v2078_v47 = vmul.f32 %v5512_v32, %v5512_v32 }
 0x4da   : > { %4366 = vpow2.f32 %v1791_v1  ;;  %v1793_v56 = vmul.f32 1.442695, %v1782_v58  ;;  %v5524_v58 = vadd.f32 %v5271_v46, %v5474_v54 }
 0x4dc   : > { %v5456_v33 = vpop.eup %4362  ;;  %4368 = vpow2.f32 %v1793_v56  ;;  %v2029_v46 = vmul.f32 %v5524_v58, %v5524_v58 }
 0x4dd   : > { %v1769_v9 = vpop.xlane.xlu0 %1768  ;;  %v1803_v14 = vsel %vm1754_vm1, %v5456_v33, 0.0 }
 0x4de   : > { %v5464_v35 = vpop.eup %4364  ;;  %v1783_v53 = vsub.f32 %v1750_v8, %v1769_v9  ;;  %1804 = vadd.xlane.f32.xlu0 %v1803_v14  ;;  %v5532_v9 = vadd.f32 %v5283_v7, %v5474_v54 }
 0x4df   : > { %v1772_v60 = vpop.xlane.xlu1 %1771  ;;  %v1806_v27 = vsel %vm1754_vm1, %v5464_v35, 0.0 }
 0x4e0   : > { %v1795_v5 = vmul.f32 1.442695, %v1783_v53  ;;  %v1784_v61 = vsub.f32 %v1751_v2, %v1772_v60  ;;  %1807 = vadd.xlane.f32.xlu1 %v1806_v27  ;;  %v5538_v53 = vadd.f32 %v5301_v6, %v5454_v42  ;;  %v5544_v60 = vadd.f32 %v5313_v18, %v5454_v42 }
 0x4e1   : > { %v2030_v7 = vmul.f32 %v5532_v9, %v5532_v9  ;;  %v5550_v27 = vadd.f32 %v5299_v45, %v5474_v54 }
 0x4e2   : > { %4370 = vpow2.f32 %v1795_v5  ;;  %v1797_v22 = vmul.f32 1.442695, %v1784_v61  ;;  %2083 = vadd.xlane.f32.xlu0 %v2075_v3  ;;  %v2079_v6 = vmul.f32 %v5538_v53, %v5538_v53  ;;  %v5556_v5 = vadd.f32 %v5311_v26, %v5474_v54 }
 0x4e3   : > { %v2080_v18 = vmul.f32 %v5544_v60, %v5544_v60  ;;  %v5562_v61 = vadd.f32 %v5329_v15, %v5454_v42  ;;  %v2031_v45 = vmul.f32 %v5550_v27, %v5550_v27  ;;  %v5568_v3 = vadd.f32 %v5341_v50, %v5454_v42 }
 0x4e4   : > { %v5480_v8 = vpop.eup %4366  ;;  %4372 = vpow2.f32 %v1797_v22  ;;  %2085 = vadd.xlane.f32.xlu1 %v2076_v62  ;;  %v2032_v26 = vmul.f32 %v5556_v5, %v5556_v5  ;;  %v5574_v22 = vadd.f32 %v5327_v40, %v5474_v54  ;;  %v5580_v62 = vadd.f32 %v5339_v51, %v5474_v54 }
 0x4e5   : > { %v1775_v16 = vpop.xlane.xlu0 %1774  ;;  %v1809_v2 = vsel %vm1754_vm1, %v5480_v8, 0.0  ;;  %v2081_v15 = vmul.f32 %v5562_v61, %v5562_v61  ;;  %v2082_v50 = vmul.f32 %v5568_v3, %v5568_v3 }
 0x4e6   : > { %v5488_v41 = vpop.eup %4368  ;;  %v1785_v4 = vsub.f32 %v1752_v19, %v1775_v16  ;;  %1810 = vadd.xlane.f32.xlu0 %v1809_v2  ;;  %v5504_v19 = vadd.f32 %v5273_v24, %v5454_v42  ;;  %v2033_v42 = vmul.f32 %v5574_v22, %v5574_v22  ;;  %v2034_v40 = vmul.f32 %v5580_v62, %v5580_v62 }
 0x4e7   : > { %v1778_v44 = vpop.xlane.xlu1 %1777  ;;  %v1812_v25 = vsel %vm1754_vm1, %v5488_v41, 0.0 }
 0x4e8   : > { %v1799_v39 = vmul.f32 1.442695, %v1785_v4  ;;  %v1786_v0 = vsub.f32 %v1753_v13, %v1778_v44  ;;  %1813 = vadd.xlane.f32.xlu1 %v1812_v25  ;;  %v2077_v24 = vmul.f32 %v5504_v19, %v5504_v19 }
 0x4ea   : > { %4374 = vpow2.f32 %v1799_v39  ;;  %v1801_v36 = vmul.f32 1.442695, %v1786_v0  ;;  %2035 = vadd.xlane.f32.xlu0 %v2027_v57 }
 0x4ec   : > { %v5500_v59 = vpop.eup %4370  ;;  %4376 = vpow2.f32 %v1801_v36  ;;  %2037 = vadd.xlane.f32.xlu1 %v2028_v10 }
 0x4ed   : > { %v1815_v13 = vsel %vm1754_vm1, %v5500_v59, 0.0 }
 0x4ee   : > { %v5508_v31 = vpop.eup %4372  ;;  %1816 = vadd.xlane.f32.xlu0 %v1815_v13 }
 0x4ef   : > { %v1818_v21 = vsel %vm1754_vm1, %v5508_v31, 0.0 }
 0x4f0   : > { %1819 = vadd.xlane.f32.xlu1 %v1818_v21 }
 0x4f2   : > { %2087 = vadd.xlane.f32.xlu0 %v2077_v24 }
 0x4f4   : > { %v5520_v1 = vpop.eup %4374  ;;  %2089 = vadd.xlane.f32.xlu1 %v2078_v47 }
 0x4f5   : > { %v1821_v30 = vsel %vm1754_vm1, %v5520_v1, 0.0 }
 0x4f6   : > { %v5528_v56 = vpop.eup %4376  ;;  %1822 = vadd.xlane.f32.xlu0 %v1821_v30 }
 0x4f7   : > { %v1824_v14 = vsel %vm1754_vm1, %v5528_v56, 0.0 }
 0x4f8   : > { %1825 = vadd.xlane.f32.xlu1 %v1824_v14 }
 0x4fa   : > { %2039 = vadd.xlane.f32.xlu0 %v2029_v46 }
 0x4fc   : > { %2041 = vadd.xlane.f32.xlu1 %v2030_v7 }
 0x4fe   : > { %2091 = vadd.xlane.f32.xlu0 %v2079_v6 }
 0x500   : > { %2093 = vadd.xlane.f32.xlu1 %v2080_v18  ;;  %v6100_v18 = vpack.c.bf16 %v5378_v12, %v5376_v37 }
 0x502   : > { %2043 = vadd.xlane.f32.xlu0 %v2031_v45 }
 0x504   : > { %2045 = vadd.xlane.f32.xlu1 %v2032_v26 }
 0x506   : > { %2095 = vadd.xlane.f32.xlu0 %v2081_v15 }
 0x508   : > { %2097 = vadd.xlane.f32.xlu1 %v2082_v50 }
 0x50a   : > { %2047 = vadd.xlane.f32.xlu0 %v2033_v42 }
 0x50c   : > { %2049 = vadd.xlane.f32.xlu1 %v2034_v40 }
 0x56b   : > { %v1805_v16 = vpop.xlane.xlu0 %1804 }
 0x56c   : > { %4378 = vrcp.f32 %v1805_v16 }
 0x56d   : > { %v1808_v2 = vpop.xlane.xlu1 %1807 }
 0x56e   : > { %4380 = vrcp.f32 %v1808_v2 }
 0x56f   : > { %v2084_v4 = vpop.xlane.xlu0 %2083 }
 0x570   : > { %v2099_v51 = vmax.f32 %v2084_v4, 1e-24 }
 0x571   : > { %v2086_v54 = vpop.xlane.xlu1 %2085 }
 0x572   : > { %4382 = vrsqrt.f32 %v2099_v51  ;;  %v2100_v44 = vmax.f32 %v2086_v54, 1e-24 }
 0x573   : > { %v1811_v25 = vpop.xlane.xlu0 %1810 }
 0x574   : > { %4384 = vrsqrt.f32 %v2100_v44 }
 0x575   : > { %4386 = vrcp.f32 %v1811_v25  ;;  %v1814_v39 = vpop.xlane.xlu1 %1813 }
 0x576   : > { %v4379_v0 = vpop.eup %4378  ;;  %4388 = vrcp.f32 %v1814_v39 }
 0x577   : > { %v2036_v57 = vpop.xlane.xlu0 %2035  ;;  %v1835_v13 = vmul.f32 %v4379_v0, %v5456_v33 }
 0x578   : > { %v4381_v36 = vpop.eup %4380  ;;  %v2051_v10 = vmax.f32 %v2036_v57, 1e-24 }
 0x579   : > { %v1836_v21 = vmul.f32 %v4381_v36, %v5464_v35  ;;  %v2038_v24 = vpop.xlane.xlu1 %2037 }
 0x57a   : > { %4390 = vrsqrt.f32 %v2051_v10  ;;  %v2052_v47 = vmax.f32 %v2038_v24, 1e-24 }
 0x57b   : > { %v1817_v30 = vpop.xlane.xlu0 %1816  ;;  %v1843_v14 = vpack.c.bf16 %v1836_v21, %v1835_v13 }
 0x57c   : > { %v4383_v46 = vpop.eup %4382  ;;  %4392 = vrsqrt.f32 %v2052_v47  ;;  %v6102_v47 = vpack.c.bf16 %v5404_v20, %v5400_v43 }
 0x57d   : > { %4394 = vrcp.f32 %v1817_v30  ;;  %v1820_v7 = vpop.xlane.xlu1 %1819  ;;  %3908 = vmatmul.mubr.msk.bf16.vlgmr.msra.gmra.mrb[32].mxu1 %vm1754_vm1, %v1843_v14  ;;  %v2115_v45 = vmul.f32 %v4383_v46, %v5460_v55 }
 0x57e   : > { %v4385_v6 = vpop.eup %4384  ;;  %4396 = vrcp.f32 %v1820_v7  ;;  %3912 = vmatpush3.bf16.msra.mxu1 %v6100_v18  ;;  %3913 = vmatprep.mubr.msk.bf16.mxu1 %vm4699_vm0, %v6098_v29 }
 0x57f   : > { %v4387_v33 = vpop.eup %4386  ;;  %v2088_v35 = vpop.xlane.xlu0 %2087  ;;  %v2116_v26 = vmul.f32 %v4385_v6, %v5468_v23  ;;  %3917 = vmatprep.subr.bf16.mxu1 %v6098_v29 }
 0x580   : > { %v4389_v15 = vpop.eup %4388  ;;  %v2101_v50 = vmax.f32 %v2088_v35, 1e-24  ;;  %v1837_v42 = vmul.f32 %v4387_v33, %v5480_v8  ;;  %v6101_v8 = vpack.c.bf16 %v5392_v49, %v5388_v17 }
 0x581   : > { %v1838_v40 = vmul.f32 %v4389_v15, %v5488_v41  ;;  %v2090_v16 = vpop.xlane.xlu1 %2089  ;;  %v2127_v37 = vpack.c.bf16 %v2116_v26, %v2115_v45 }
 0x582   : > { %v2102_v12 = vmax.f32 %v2090_v16, 1e-24  ;;  %4398 = vrsqrt.f32 %v2101_v50 }
 0x583   : > { %3930 = vmatpush3.bf16.xpose.msra.mxu0 %v2127_v37  ;;  %v1823_v2 = vpop.xlane.xlu0 %1822  ;;  %v1844_v4 = vpack.c.bf16 %v1838_v40, %v1837_v42 }
 0x584   : > { %v4391_v51 = vpop.eup %4390  ;;  %4400 = vrsqrt.f32 %v2102_v12  ;;  %3941 = vmatprep.subr.bf16.mxu0 %v6098_v29 }
 0x585   : > { %4402 = vrcp.f32 %v1823_v2  ;;  %v1826_v55 = vpop.xlane.xlu1 %1825  ;;  %3914 = vmatmul.mubr.msk.bf16.vlgmr.msra.gmra.mrb[36].mxu1 %vm1754_vm1, %v1844_v4  ;;  %v2067_v54 = vmul.f32 %v4391_v51, %v5484_v38 }
 0x586   : > { %v4393_v23 = vpop.eup %4392  ;;  %4404 = vrcp.f32 %v1826_v55  ;;  %3918 = vmatpush3.bf16.msra.mxu1 %v6101_v8  ;;  %3919 = vmatprep.mubr.msk.bf16.mxu1 %vm4699_vm0, %v6098_v29 }
 0x587   : > { %v4395_v41 = vpop.eup %4394  ;;  %v2068_v44 = vmul.f32 %v4393_v23, %v5492_v63  ;;  %v2040_v25 = vpop.xlane.xlu0 %2039  ;;  %3923 = vmatprep.subr.bf16.mxu1 %v6098_v29 }
 0x588   : > { %v4397_v39 = vpop.eup %4396  ;;  %v1839_v0 = vmul.f32 %v4395_v41, %v5500_v59  ;;  %v2053_v36 = vmax.f32 %v2040_v25, 1e-24 }
 0x589   : > { %v1840_v57 = vmul.f32 %v4397_v39, %v5508_v31  ;;  %v2042_v10 = vpop.xlane.xlu1 %2041  ;;  %v2123_v17 = vpack.c.bf16 %v2068_v44, %v2067_v54 }
 0x58a   : > { %v2054_v49 = vmax.f32 %v2042_v10, 1e-24 }
 0x58b   : > { %3932 = vmatmul.mubr.bf16.vlgmr.msra.gmra.mrb[32].mxu0 %v2123_v17  ;;  %v2092_v13 = vpop.xlane.xlu0 %2091  ;;  %v1845_v21 = vpack.c.bf16 %v1840_v57, %v1839_v0  ;;  %v6103_v17 = vpack.c.bf16 %v5370_v48, %v5368_v34 }
 0x58c   : > { %4406 = vrsqrt.f32 %v2054_v49  ;;  %v2103_v24 = vmax.f32 %v2092_v13, 1e-24  ;;  %3943 = vmatprep.mubr.msk.bf16.mxu0 %vm4699_vm0, %v6098_v29  ;;  %v4399_v38 = vpop.eup %4398 }
 0x58d   : > { %4408 = vrsqrt.f32 %v2053_v36  ;;  %v2094_v63 = vpop.xlane.xlu1 %2093  ;;  %3920 = vmatmul.mubr.msk.bf16.vlgmr.msra.gmra.mrb[40].mxu1 %vm1754_vm1, %v1845_v21  ;;  %v2117_v26 = vmul.f32 %v4399_v38, %v5504_v19 }
 0x58e   : > { %v4401_v59 = vpop.eup %4400  ;;  %4410 = vrsqrt.f32 %v2103_v24  ;;  %v2104_v31 = vmax.f32 %v2094_v63, 1e-24  ;;  %3924 = vmatpush3.bf16.msra.mxu1 %v6102_v47  ;;  %3925 = vmatprep.mubr.msk.bf16.mxu1 %vm4699_vm0, %v6098_v29 }
 0x58f   : > { %v4403_v30 = vpop.eup %4402  ;;  %v2044_v14 = vpop.xlane.xlu0 %2043  ;;  %3935 = vmatprep.subr.bf16.mxu1 %v6098_v29  ;;  %v2118_v35 = vmul.f32 %v4401_v59, %v5512_v32 }
 0x590   : > { %v4405_v46 = vpop.eup %4404  ;;  %4412 = vrsqrt.f32 %v2104_v31  ;;  %v1841_v7 = vmul.f32 %v4403_v30, %v5520_v1  ;;  %v2055_v18 = vmax.f32 %v2044_v14, 1e-24 }
 0x591   : > { %v1842_v6 = vmul.f32 %v4405_v46, %v5528_v56  ;;  %v2046_v33 = vpop.xlane.xlu1 %2045  ;;  %v2128_v42 = vpack.c.bf16 %v2118_v35, %v2117_v26 }
 0x592   : > { %v2056_v45 = vmax.f32 %v2046_v33, 1e-24 }
 0x593   : > { %v2096_v20 = vpop.xlane.xlu0 %2095  ;;  %v1846_v43 = vpack.c.bf16 %v1842_v6, %v1841_v7 }
 0x594   : > { %4414 = vrsqrt.f32 %v2056_v45  ;;  %v2105_v15 = vmax.f32 %v2096_v20, 1e-24 }
 0x595   : > { %4416 = vrsqrt.f32 %v2055_v18  ;;  %v2098_v50 = vpop.xlane.xlu1 %2097  ;;  %3926 = vmatmul.mubr.msk.bf16.vlgmr.msra.gmra.mrb[44].mxu1 %vm1754_vm1, %v1846_v43 }
 0x596   : > { %v4407_v40 = vpop.eup %4406  ;;  %4418 = vrsqrt.f32 %v2105_v15  ;;  %v2106_v1 = vmax.f32 %v2098_v50, 1e-24  ;;  %3937 = vmatprep.mubr.msk.bf16.mxu1 %vm4699_vm0, %v6098_v29 }
 0x597   : > { %v4409_v56 = vpop.eup %4408  ;;  %3936 = vmatpush3.bf16.xpose.msra.mxu1 %v2128_v42  ;;  %v2048_v32 = vpop.xlane.xlu0 %2047  ;;  %v2070_v19 = vmul.f32 %v4407_v40, %v5532_v9 }
 0x598   : > { %v4411_v16 = vpop.eup %4410  ;;  %4420 = vrsqrt.f32 %v2106_v1  ;;  %3947 = vmatprep.subr.bf16.mxu1 %v6098_v29  ;;  %v2057_v37 = vmax.f32 %v2048_v32, 1e-24  ;;  %v2069_v51 = vmul.f32 %v4409_v56, %v5524_v58 }
 0x599   : > { %v2050_v12 = vpop.xlane.xlu1 %2049  ;;  %v2119_v55 = vmul.f32 %v4411_v16, %v5538_v53 }
 0x59a   : > { %v4413_v2 = vpop.eup %4412  ;;  %v2058_v4 = vmax.f32 %v2050_v12, 1e-24  ;;  %v2124_v8 = vpack.c.bf16 %v2070_v19, %v2069_v51 }
 0x59b   : > { %v2120_v23 = vmul.f32 %v4413_v2, %v5544_v60 }
 0x59c   : > { %4422 = vrsqrt.f32 %v2058_v4 }
 0x59d   : > { %4424 = vrsqrt.f32 %v2057_v37  ;;  %v2129_v41 = vpack.c.bf16 %v2120_v23, %v2119_v55 }
 0x59e   : > { %v4415_v54 = vpop.eup %4414  ;;  %3938 = vmatmul.mubr.bf16.vlgmr.msra.gmra.mrb[48].mxu1 %v2124_v8 }
 0x59f   : > { %v4417_v44 = vpop.eup %4416  ;;  %3942 = vmatpush3.bf16.xpose.msra.mxu0 %v2129_v41  ;;  %3949 = vmatprep.mubr.msk.bf16.mxu1 %vm4699_vm0, %v6098_v29  ;;  %v2072_v25 = vmul.f32 %v4415_v54, %v5556_v5 }
 0x5a0   : > { %v4419_v9 = vpop.eup %4418  ;;  %3953 = vmatprep.subr.bf16.mxu0 %v6098_v29  ;;  %v2071_v53 = vmul.f32 %v4417_v44, %v5550_v27 }
 0x5a1   : > { %v2121_v60 = vmul.f32 %v4419_v9, %v5562_v61 }
 0x5a2   : > { %v4421_v58 = vpop.eup %4420  ;;  %v2125_v0 = vpack.c.bf16 %v2072_v25, %v2071_v53 }
 0x5a3   : > { %v2122_v39 = vmul.f32 %v4421_v58, %v5568_v3  ;;  %v6104_v3 = vpack.c.bf16 %v5382_v11, %v5380_v28  ;;  %v2296_v28 = vstv %s3770_s25  ;;  %s5996_s25 = scalar_lea.hbm %s6055_s10, %s3848_s26 }
 0x5a5   : > { %v2130_v57 = vpack.c.bf16 %v2122_v39, %v2121_v60 }
 0x5a6   : > { %v4423_v36 = vpop.eup %4422  ;;  %3944 = vmatmul.mubr.bf16.vlgmr.msra.gmra.mrb[36].mxu0 %v2125_v0 }
 0x5a7   : > { %v4425_v10 = vpop.eup %4424  ;;  %3948 = vmatpush3.bf16.xpose.msra.mxu1 %v2130_v57  ;;  %3954 = vmatpush3.bf16.msra.mxu0 %v6103_v17  ;;  %v2074_v5 = vmul.f32 %v4423_v36, %v5580_v62 }
 0x5a8   : > { %3959 = vmatprep.subr.bf16.mxu1 %v6098_v29  ;;  %3955 = vmatprep.mubr.msk.bf16.mxu0 %vm4699_vm0, %v6098_v29  ;;  %v2073_v27 = vmul.f32 %v4425_v10, %v5574_v22 }
 0x5a9   : > { %3965 = vmatprep.subr.bf16.mxu0 %v6098_v29 }
 0x5aa   : > { %v2126_v61 = vpack.c.bf16 %v2074_v5, %v2073_v27 }
 0x5ae   : > { %3950 = vmatmul.mubr.bf16.vlgmr.msra.gmra.mrb[52].mxu1 %v2126_v61 }
 0x5af   : > { %3960 = vmatpush3.bf16.msra.mxu1 %v6104_v3  ;;  %3961 = vmatprep.mubr.msk.bf16.mxu1 %vm4699_vm0, %v6098_v29 }
 0x5b0   : > { %3971 = vmatprep.subr.bf16.mxu1 %v6098_v29 }
 0x650   : > { %v5656_v34 = vpop.f32.mrb[32].mxu1 }
 0x651   : > { %v3909_v48 = vpop.f32.mrb[33].mxu1 }
 0x652   : > { %v5658_v62 = vpop.f32.mrb[34].mxu1 }
 0x653   : > { %v3910_v49 = vpop.f32.mrb[35].mxu1 }
 0x658   : > { %v5660_v13 = vpop.f32.mrb[36].mxu1 }
 0x659   : > { %v3915_v22 = vpop.f32.mrb[37].mxu1 }
 0x65a   : > { %v5662_v21 = vpop.f32.mrb[38].mxu1 }
 0x65b   : > { %v3916_v24 = vpop.f32.mrb[39].mxu1 }
 0x65e   : > { %v2165_v11 = vpop.f32.mrb[32].mxu0 }
 0x65f   : > { %v2297_v38 = vmul.f32 %v2296_v28, %v2165_v11  ;;  %v3933_v63 = vpop.f32.mrb[33].mxu0 }
 0x660   : > { %v5664_v59 = vpop.f32.mrb[40].mxu1  ;;  %v2168_v31 = vpop.f32.mrb[34].mxu0 }
 0x661   : > { %v2298_v47 = vmul.f32 %v2296_v28, %v2168_v31  ;;  %v3921_v30 = vpop.f32.mrb[41].mxu1  ;;  %v3934_v14 = vpop.f32.mrb[35].mxu0  ;;  %v2305_v46 = vsel %vm1754_vm1, %v2297_v38, -inf }
 0x662   : > { %2306 = vmax.xlane.f32.xlu0 %v2305_v46  ;;  %v5667_v7 = vpop.f32.mrb[42].mxu1 }
 0x663   : > { %v3922_v6 = vpop.f32.mrb[43].mxu1  ;;  %v2308_v18 = vsel %vm1754_vm1, %v2298_v47, -inf }
 0x664   : > { %2309 = vmax.xlane.f32.xlu1 %v2308_v18 }
 0x668   : > { %v5670_v33 = vpop.f32.mrb[44].mxu1 }
 0x669   : > { %v3927_v35 = vpop.f32.mrb[45].mxu1 }
 0x66a   : > { %v5672_v45 = vpop.f32.mrb[46].mxu1 }
 0x66b   : > { %v3928_v20 = vpop.f32.mrb[47].mxu1 }
 0x671   : > { %v2206_v43 = vpop.f32.mrb[48].mxu1 }
 0x672   : > { %v2299_v26 = vmul.f32 %v2296_v28, %v2206_v43  ;;  %v3939_v15 = vpop.f32.mrb[49].mxu1 }
 0x673   : > { %v2209_v50 = vpop.f32.mrb[50].mxu1 }
 0x674   : > { %v2300_v42 = vmul.f32 %v2296_v28, %v2209_v50  ;;  %v3940_v40 = vpop.f32.mrb[51].mxu1  ;;  %v2311_v1 = vsel %vm1754_vm1, %v2299_v26, -inf }
 0x675   : > { %2312 = vmax.xlane.f32.xlu0 %v2311_v1 }
 0x676   : > { %v2314_v56 = vsel %vm1754_vm1, %v2300_v42, -inf }
 0x677   : > { %2315 = vmax.xlane.f32.xlu1 %v2314_v56 }
 0x679   : > { %v2247_v32 = vpop.f32.mrb[36].mxu0 }
 0x67a   : > { %v2301_v16 = vmul.f32 %v2296_v28, %v2247_v32  ;;  %v3945_v19 = vpop.f32.mrb[37].mxu0 }
 0x67b   : > { %v2250_v37 = vpop.f32.mrb[38].mxu0 }
 0x67c   : > { %v2302_v12 = vmul.f32 %v2296_v28, %v2250_v37  ;;  %v3946_v2 = vpop.f32.mrb[39].mxu0  ;;  %v2317_v4 = vsel %vm1754_vm1, %v2301_v16, -inf }
 0x67d   : > { %2318 = vmax.xlane.f32.xlu0 %v2317_v4 }
 0x67e   : > { %v2320_v51 = vsel %vm1754_vm1, %v2302_v12, -inf }
 0x67f   : > { %2321 = vmax.xlane.f32.xlu1 %v2320_v51 }
 0x681   : > { %v2288_v55 = vpop.f32.mrb[52].mxu1 }
 0x682   : > { %v2303_v23 = vmul.f32 %v2296_v28, %v2288_v55  ;;  %v3951_v8 = vpop.f32.mrb[53].mxu1 }
 0x683   : > { %v2291_v41 = vpop.f32.mrb[54].mxu1  ;;  %v6106_v8 = vld [vmem:[#allocation22_spill] sm:$0xff] }
 0x684   : > { %v2304_v54 = vmul.f32 %v2296_v28, %v2291_v41  ;;  %v3952_v44 = vpop.f32.mrb[55].mxu1  ;;  %v2323_v9 = vsel %vm1754_vm1, %v2303_v23, -inf }
 0x685   : > { %2324 = vmax.xlane.f32.xlu0 %v2323_v9 }
 0x686   : > { %v2326_v25 = vsel %vm1754_vm1, %v2304_v54, -inf }
 0x687   : > { %2327 = vmax.xlane.f32.xlu1 %v2326_v25 }
 0x6ef   : > { %v2307_v58 = vpop.xlane.xlu0 %2306 }
 0x6f0   : > { %v2329_v53 = vsub.f32 %v2297_v38, %v2307_v58 }
 0x6f1   : > { %v2310_v60 = vpop.xlane.xlu1 %2309 }
 0x6f2   : > { %v2337_v39 = vmul.f32 1.442695, %v2329_v53  ;;  %v2330_v0 = vsub.f32 %v2298_v47, %v2310_v60 }
 0x6f4   : > { %4426 = vpow2.f32 %v2337_v39  ;;  %v2339_v57 = vmul.f32 1.442695, %v2330_v0 }
 0x6f6   : > { %4428 = vpow2.f32 %v2339_v57 }
 0x6fe   : > { %v4427_v36 = vpop.eup %4426 }
 0x6ff   : > { %v2353_v10 = vsel %vm1754_vm1, %v4427_v36, 0.0 }
 0x700   : > { %v4429_v17 = vpop.eup %4428  ;;  %2354 = vadd.xlane.f32.xlu0 %v2353_v10 }
 0x701   : > { %v2356_v5 = vsel %vm1754_vm1, %v4429_v17, 0.0 }
 0x702   : > { %v2313_v27 = vpop.xlane.xlu0 %2312  ;;  %2357 = vadd.xlane.f32.xlu1 %v2356_v5  ;;  %v6109_v5 = vld [vmem:[#allocation24_spill] sm:$0xff] }
 0x703   : > { %v2331_v61 = vsub.f32 %v2299_v26, %v2313_v27 }
 0x704   : > { %v2316_v3 = vpop.xlane.xlu1 %2315 }
 0x705   : > { %v2341_v48 = vmul.f32 1.442695, %v2331_v61  ;;  %v2332_v49 = vsub.f32 %v2300_v42, %v2316_v3 }
 0x707   : > { %4430 = vpow2.f32 %v2341_v48  ;;  %v2343_v22 = vmul.f32 1.442695, %v2332_v49 }
 0x709   : > { %4432 = vpow2.f32 %v2343_v22 }
 0x70a   : > { %v2319_v24 = vpop.xlane.xlu0 %2318 }
 0x70b   : > { %v2333_v28 = vsub.f32 %v2301_v16, %v2319_v24 }
 0x70c   : > { %v2322_v11 = vpop.xlane.xlu1 %2321 }
 0x70d   : > { %v2345_v38 = vmul.f32 1.442695, %v2333_v28  ;;  %v2334_v63 = vsub.f32 %v2302_v12, %v2322_v11 }
 0x70f   : > { %4434 = vpow2.f32 %v2345_v38  ;;  %v2347_v31 = vmul.f32 1.442695, %v2334_v63 }
 0x711   : > { %v4431_v47 = vpop.eup %4430  ;;  %4436 = vpow2.f32 %v2347_v31 }
 0x712   : > { %v2359_v30 = vsel %vm1754_vm1, %v4431_v47, 0.0  ;;  %v2325_v14 = vpop.xlane.xlu0 %2324 }
 0x713   : > { %v4433_v46 = vpop.eup %4432  ;;  %2360 = vadd.xlane.f32.xlu0 %v2359_v30  ;;  %v2335_v6 = vsub.f32 %v2303_v23, %v2325_v14  ;;  %v6105_v23 = vld [vmem:[#allocation23_spill] sm:$0xff] }
 0x714   : > { %v2362_v18 = vsel %vm1754_vm1, %v4433_v46, 0.0  ;;  %v2328_v35 = vpop.xlane.xlu1 %2327  ;;  %v6107_v41 = vpack.c.bf16 %v6105_v23, %v6106_v8  ;;  %v4226_v23 = vld [vmem:[#allocation9 + $0x24] ss:$8 sps:$4 sm:$0xff]   ;;  %v4224_v8 = vld [vmem:[#allocation9 + $0x20] ss:$8 sps:$4 sm:$0xff]  }
 0x715   : > { %v2349_v20 = vmul.f32 1.442695, %v2335_v6  ;;  %2363 = vadd.xlane.f32.xlu1 %v2362_v18  ;;  %v2336_v43 = vsub.f32 %v2304_v54, %v2328_v35 }
 0x717   : > { %4438 = vpow2.f32 %v2349_v20  ;;  %v2351_v26 = vmul.f32 1.442695, %v2336_v43 }
 0x719   : > { %v4435_v15 = vpop.eup %4434  ;;  %4440 = vpow2.f32 %v2351_v26 }
 0x71a   : > { %v2365_v50 = vsel %vm1754_vm1, %v4435_v15, 0.0 }
 0x71b   : > { %v4437_v42 = vpop.eup %4436  ;;  %2366 = vadd.xlane.f32.xlu0 %v2365_v50 }
 0x71c   : > { %v2368_v40 = vsel %vm1754_vm1, %v4437_v42, 0.0 }
 0x71d   : > { %2369 = vadd.xlane.f32.xlu1 %v2368_v40 }
 0x721   : > { %v4439_v1 = vpop.eup %4438 }
 0x722   : > { %v2371_v56 = vsel %vm1754_vm1, %v4439_v1, 0.0 }
 0x723   : > { %v4441_v32 = vpop.eup %4440  ;;  %2372 = vadd.xlane.f32.xlu0 %v2371_v56 }
 0x724   : > { %v2374_v16 = vsel %vm1754_vm1, %v4441_v32, 0.0 }
 0x725   : > { %2375 = vadd.xlane.f32.xlu1 %v2374_v16 }
 0x78d   : > { %v2355_v19 = vpop.xlane.xlu0 %2354 }
 0x78e   : > { %4442 = vrcp.f32 %v2355_v19 }
 0x78f   : > { %v2358_v37 = vpop.xlane.xlu1 %2357 }
 0x790   : > { %4444 = vrcp.f32 %v2358_v37 }
 0x798   : > { %v4443_v12 = vpop.eup %4442 }
 0x799   : > { %v2385_v4 = vmul.f32 %v4443_v12, %v4427_v36 }
 0x79a   : > { %v4445_v2 = vpop.eup %4444 }
 0x79b   : > { %v2386_v51 = vmul.f32 %v4445_v2, %v4429_v17  ;;  %v6108_v17 = vld [vmem:[#allocation25_spill] sm:$0xff] }
 0x79c   : > { %v6110_v27 = vpack.c.bf16 %v6108_v17, %v6109_v5  ;;  %v4218_v2 = vld [vmem:[#allocation9] ss:$8 sps:$4 sm:$0xff]  }
 0x79d   : > { %v2393_v55 = vpack.c.bf16 %v2386_v51, %v2385_v4  ;;  %v4220_v4 = vld [vmem:[#allocation9 + $0x4] ss:$8 sps:$4 sm:$0xff]   ;;  %v4223_v51 = vld [vmem:[#allocation9 + $0x14] ss:$8 sps:$4 sm:$0xff]  }
 0x79f   : > { %3956 = vmatmul.mubr.msk.bf16.vlgmr.msra.gmra.mrb[40].mxu0 %vm1754_vm1, %v2393_v55  ;;  %v4221_v55 = vld [vmem:[#allocation9 + $0x10] ss:$8 sps:$4 sm:$0xff]  }
 0x7a0   : > { %3966 = vmatpush3.bf16.msra.mxu0 %v6107_v41  ;;  %v2361_v54 = vpop.xlane.xlu0 %2360  ;;  %3967 = vmatprep.mubr.msk.bf16.mxu0 %vm4699_vm0, %v6098_v29  ;;  %v4229_v41 = vld [vmem:[#allocation9 + $0x34] ss:$8 sps:$4 sm:$0xff]  }
 0x7a1   : > { %4446 = vrcp.f32 %v2361_v54  ;;  %3053 = vmatprep.subr.bf16.mxu0 %v4220_v4  ;;  %v4227_v54 = vld [vmem:[#allocation9 + $0x30] ss:$8 sps:$4 sm:$0xff]  }
 0x7a2   : > { %v2364_v44 = vpop.xlane.xlu1 %2363  ;;  %v4245_v4 = vld [vmem:[#allocation9 + $0x90] ss:$8 sps:$4 sm:$0xff]  }
 0x7a3   : > { %4448 = vrcp.f32 %v2364_v44  ;;  %v4232_v44 = vld [vmem:[#allocation9 + $0x44] ss:$8 sps:$4 sm:$0xff]  }
 0x7a8   : > { %v2367_v9 = vpop.xlane.xlu0 %2366 }
 0x7a9   : > { %4450 = vrcp.f32 %v2367_v9  ;;  %v4230_v9 = vld [vmem:[#allocation9 + $0x40] ss:$8 sps:$4 sm:$0xff]  }
 0x7aa   : > { %v2370_v25 = vpop.xlane.xlu1 %2369 }
 0x7ab   : > { %v4447_v58 = vpop.eup %4446  ;;  %4452 = vrcp.f32 %v2370_v25  ;;  %v4235_v25 = vld [vmem:[#allocation9 + $0x54] ss:$8 sps:$4 sm:$0xff]  }
 0x7ac   : > { %v2387_v60 = vmul.f32 %v4447_v58, %v4431_v47  ;;  %v4233_v58 = vld [vmem:[#allocation9 + $0x50] ss:$8 sps:$4 sm:$0xff]  }
 0x7ad   : > { %v4449_v53 = vpop.eup %4448 }
 0x7ae   : > { %v2388_v39 = vmul.f32 %v4449_v53, %v4433_v46  ;;  %v4238_v53 = vld [vmem:[#allocation9 + $0x64] ss:$8 sps:$4 sm:$0xff]  }
 0x7b0   : > { %v2373_v0 = vpop.xlane.xlu0 %2372  ;;  %v2394_v57 = vpack.c.bf16 %v2388_v39, %v2387_v60  ;;  %v4236_v60 = vld [vmem:[#allocation9 + $0x60] ss:$8 sps:$4 sm:$0xff]  }
 0x7b1   : > { %4454 = vrcp.f32 %v2373_v0 }
 0x7b2   : > { %3962 = vmatmul.mubr.msk.bf16.vlgmr.msra.gmra.mrb[56].mxu1 %vm1754_vm1, %v2394_v57  ;;  %v2376_v36 = vpop.xlane.xlu1 %2375 }
 0x7b3   : > { %v4451_v10 = vpop.eup %4450  ;;  %3972 = vmatpush3.bf16.msra.mxu1 %v6110_v27  ;;  %4456 = vrcp.f32 %v2376_v36  ;;  %3973 = vmatprep.mubr.msk.bf16.mxu1 %vm4699_vm0, %v6098_v29 }
 0x7b4   : > { %v2389_v3 = vmul.f32 %v4451_v10, %v4435_v15 }
 0x7b5   : > { %v4453_v61 = vpop.eup %4452 }
 0x7b6   : > { %v2390_v48 = vmul.f32 %v4453_v61, %v4437_v42 }
 0x7b8   : > { %v2395_v49 = vpack.c.bf16 %v2390_v48, %v2389_v3 }
 0x7ba   : > { %3968 = vmatmul.mubr.msk.bf16.vlgmr.msra.gmra.mrb[44].mxu0 %vm1754_vm1, %v2395_v49 }
 0x7bb   : > { %v4455_v22 = vpop.eup %4454  ;;  %3054 = vmatpush1.bf16.msra.mxu0 %v4218_v2  ;;  %v4247_v2 = vld [vmem:[#allocation9 + $0x94] ss:$8 sps:$4 sm:$0xff]  }
 0x7bc   : > { %v2391_v28 = vmul.f32 %v4455_v22, %v4439_v1  ;;  %3055 = vmatprep.subr.bf16.mxu0 %v4223_v51 }
 0x7bd   : > { %v4457_v24 = vpop.eup %4456 }
 0x7be   : > { %v2392_v11 = vmul.f32 %v4457_v24, %v4441_v32 }
 0x7bf   : > { %3056 = vmatpush1.bf16.msra.mxu0 %v4221_v55 }
 0x7c0   : > { %v2396_v38 = vpack.c.bf16 %v2392_v11, %v2391_v28  ;;  %3057 = vmatprep.subr.bf16.mxu0 %v4226_v23 }
 0x7c2   : > { %3974 = vmatmul.mubr.msk.bf16.vlgmr.msra.gmra.mrb[60].mxu1 %vm1754_vm1, %v2396_v38 }
 0x7c3   : > { %3058 = vmatpush1.bf16.msra.mxu0 %v4224_v8  ;;  %v4250_v8 = vld [vmem:[#allocation9 + $0xa4] ss:$8 sps:$4 sm:$0xff]  }
 0x7c4   : > { %3059 = vmatprep.subr.bf16.mxu0 %v4229_v41 }
 0x7c7   : > { %3060 = vmatpush1.bf16.msra.mxu0 %v4227_v54  ;;  %v4248_v54 = vld [vmem:[#allocation9 + $0xa0] ss:$8 sps:$4 sm:$0xff]  }
 0x7c8   : > { %3061 = vmatprep.subr.bf16.mxu0 %v4232_v44 }
 0x7cb   : > { %3062 = vmatpush1.bf16.msra.mxu0 %v4230_v9 }
 0x7cc   : > { %3063 = vmatprep.subr.bf16.mxu0 %v4235_v25 }
 0x7cf   : > { %3064 = vmatpush1.bf16.msra.mxu0 %v4233_v58 }
 0x7d0   : > { %3065 = vmatprep.subr.bf16.mxu0 %v4238_v53 }
 0x7d3   : > { %3066 = vmatpush1.bf16.msra.mxu0 %v4236_v60 }
 0x872   : > { %v5702_v63 = vpop.f32.mrb[40].mxu0 }
 0x873   : > { %v3957_v31 = vpop.f32.mrb[41].mxu0  ;;  %v2579_v47 = vadd.f32 %v5702_v63, %v5656_v34 }
 0x874   : > { %v5706_v29 = vpop.f32.mrb[42].mxu0 }
 0x875   : > { %2580 = vadd.xlane.f32.xlu0 %v2579_v47  ;;  %v3958_v30 = vpop.f32.mrb[43].mxu0  ;;  %v2582_v14 = vadd.f32 %v5706_v29, %v5658_v62 }
 0x877   : > { %2583 = vadd.xlane.f32.xlu1 %v2582_v14  ;;  %v4241_v14 = vld [vmem:[#allocation9 + $0x74] ss:$8 sps:$4 sm:$0xff]  }
 0x878   : > { %3067 = vmatprep.subr.bf16.mxu0 %v4241_v14  ;;  %v4272_v14 = vld [vmem:[#allocation10 + $0x20] ss:$8 sps:$4 sm:$0xff]  }
 0x885   : > { %v5710_v46 = vpop.f32.mrb[56].mxu1 }
 0x886   : > { %v3963_v6 = vpop.f32.mrb[57].mxu1  ;;  %v2585_v18 = vadd.f32 %v5710_v46, %v5660_v13 }
 0x887   : > { %v5714_v35 = vpop.f32.mrb[58].mxu1  ;;  %v4239_v6 = vld [vmem:[#allocation9 + $0x70] ss:$8 sps:$4 sm:$0xff]  }
 0x888   : > { %2586 = vadd.xlane.f32.xlu0 %v2585_v18  ;;  %v3964_v20 = vpop.f32.mrb[59].mxu1  ;;  %v2588_v43 = vadd.f32 %v5714_v35, %v5662_v21  ;;  %3068 = vmatpush1.bf16.msra.mxu0 %v4239_v6  ;;  %v4277_v6 = vld [vmem:[#allocation10 + $0x34] ss:$8 sps:$4 sm:$0xff]  }
 0x88a   : > { %2589 = vadd.xlane.f32.xlu1 %v2588_v43  ;;  %v4244_v43 = vld [vmem:[#allocation9 + $0x84] ss:$8 sps:$4 sm:$0xff]  }
 0x88b   : > { %3069 = vmatprep.subr.bf16.mxu0 %v4244_v43  ;;  %v4284_v43 = vld [vmem:[#allocation10 + $0x60] ss:$8 sps:$4 sm:$0xff]  }
 0x88d   : > { %v5718_v26 = vpop.f32.mrb[44].mxu0 }
 0x88e   : > { %v3969_v15 = vpop.f32.mrb[45].mxu0  ;;  %v2591_v50 = vadd.f32 %v5718_v26, %v5664_v59 }
 0x88f   : > { %v5722_v42 = vpop.f32.mrb[46].mxu0 }
 0x890   : > { %2592 = vadd.xlane.f32.xlu0 %v2591_v50  ;;  %v3970_v40 = vpop.f32.mrb[47].mxu0  ;;  %v2594_v1 = vadd.f32 %v5722_v42, %v5667_v7  ;;  %v4242_v50 = vld [vmem:[#allocation9 + $0x80] ss:$8 sps:$4 sm:$0xff]  }
 0x891   : > { %3070 = vmatpush1.bf16.msra.mxu0 %v4242_v50  ;;  %v4287_v50 = vld [vmem:[#allocation10 + $0x70] ss:$8 sps:$4 sm:$0xff]  }
 0x892   : > { %2595 = vadd.xlane.f32.xlu1 %v2594_v1  ;;  %3071 = vmatprep.subr.bf16.mxu0 %v4247_v2  ;;  %v4293_v2 = vld [vmem:[#allocation10 + $0x90] ss:$8 sps:$4 sm:$0xff]  }
 0x895   : > { %v5726_v56 = vpop.f32.mrb[60].mxu1  ;;  %3072 = vmatpush1.bf16.msra.mxu0 %v4245_v4  ;;  %v4298_v4 = vld [vmem:[#allocation10 + $0xa4] ss:$8 sps:$4 sm:$0xff]  }
 0x896   : > { %v3975_v32 = vpop.f32.mrb[61].mxu1  ;;  %v2597_v16 = vadd.f32 %v5726_v56, %v5670_v33  ;;  %3073 = vmatprep.subr.bf16.mxu0 %v4250_v8 }
 0x897   : > { %v5730_v19 = vpop.f32.mrb[62].mxu1 }
 0x898   : > { %2598 = vadd.xlane.f32.xlu0 %v2597_v16  ;;  %v3976_v37 = vpop.f32.mrb[63].mxu1  ;;  %v2600_v12 = vadd.f32 %v5730_v19, %v5672_v45 }
 0x899   : > { %3074 = vmatpush1.bf16.msra.mxu0 %v4248_v54  ;;  %v2578_v54 = vld [vmem:[%s6047_s2] sm:$0x3] }
 0x89a   : > { %2601 = vadd.xlane.f32.xlu1 %v2600_v12 }
 0x902   : > { %v2581_v39 = vpop.xlane.xlu0 %2580 }
 0x903   : > { %v2603_v0 = vmul.f32 0.00390625, %v2581_v39  ;;  %v4251_v39 = vld [vmem:[#allocation9 + $0xb0] ss:$8 sps:$4 sm:$0xff]  }
 0x904   : > { %v2584_v57 = vpop.xlane.xlu1 %2583 }
 0x905   : > { %v5735_v36 = vsub.f32 %v5656_v34, %v2603_v0  ;;  %v5738_v10 = vsub.f32 %v5702_v63, %v2603_v0  ;;  %v2604_v17 = vmul.f32 0.00390625, %v2584_v57  ;;  %v4253_v0 = vld [vmem:[#allocation9 + $0xb4] ss:$8 sps:$4 sm:$0xff]  }
 0x906   : > { %3075 = vmatprep.subr.bf16.mxu0 %v4253_v0 }
 0x907   : > { %v5741_v5 = vsub.f32 %v5658_v62, %v2604_v17  ;;  %v5744_v27 = vsub.f32 %v5706_v29, %v2604_v17  ;;  %v2627_v61 = vmul.f32 %v5735_v36, %v5735_v36  ;;  %v2628_v3 = vmul.f32 %v5738_v10, %v5738_v10  ;;  %3076 = vmatpush1.bf16.msra.mxu0 %v4251_v39 }
 0x909   : > { %v2643_v48 = vadd.f32 %v2628_v3, %v2627_v61  ;;  %v2629_v34 = vmul.f32 %v5741_v5, %v5741_v5  ;;  %v2630_v49 = vmul.f32 %v5744_v27, %v5744_v27  ;;  %v4254_v61 = vld [vmem:[#allocation9 + $0xc0] ss:$8 sps:$4 sm:$0xff]   ;;  %v4257_v3 = vld [vmem:[#allocation9 + $0xd0] ss:$8 sps:$4 sm:$0xff]  }
 0x90b   : > { %2644 = vadd.xlane.f32.xlu0 %v2643_v48  ;;  %v2646_v22 = vadd.f32 %v2630_v49, %v2629_v34  ;;  %v4259_v48 = vld [vmem:[#allocation9 + $0xd4] ss:$8 sps:$4 sm:$0xff]   ;;  %v4262_v34 = vld [vmem:[#allocation9 + $0xe4] ss:$8 sps:$4 sm:$0xff]   ;;  %v4260_v49 = vld [vmem:[#allocation9 + $0xe0] ss:$8 sps:$4 sm:$0xff]  }
 0x90d   : > { %2647 = vadd.xlane.f32.xlu1 %v2646_v22  ;;  %v4263_v22 = vld [vmem:[#allocation9 + $0xf0] ss:$8 sps:$4 sm:$0xff]  }
 0x915   : > { %v2587_v62 = vpop.xlane.xlu0 %2586 }
 0x916   : > { %v2605_v24 = vmul.f32 0.00390625, %v2587_v62  ;;  %v4265_v62 = vld [vmem:[#allocation9 + $0xf4] ss:$8 sps:$4 sm:$0xff]  }
 0x917   : > { %v2590_v28 = vpop.xlane.xlu1 %2589 }
 0x918   : > { %v5755_v11 = vsub.f32 %v5660_v13, %v2605_v24  ;;  %v5758_v38 = vsub.f32 %v5710_v46, %v2605_v24  ;;  %v2606_v63 = vmul.f32 0.00390625, %v2590_v28  ;;  %v4266_v24 = vld [vmem:[#allocation10] ss:$8 sps:$4 sm:$0xff]   ;;  %v4268_v28 = vld [vmem:[#allocation10 + $0x4] ss:$8 sps:$4 sm:$0xff]  }
 0x919   : > { %3434 = vmatprep.subr.bf16.mxu1 %v4268_v28 }
 0x91a   : > { %v5761_v31 = vsub.f32 %v5662_v21, %v2606_v63  ;;  %v5764_v47 = vsub.f32 %v5714_v35, %v2606_v63  ;;  %v2631_v29 = vmul.f32 %v5755_v11, %v5755_v11  ;;  %v2632_v30 = vmul.f32 %v5758_v38, %v5758_v38  ;;  %v4271_v63 = vld [vmem:[#allocation10 + $0x14] ss:$8 sps:$4 sm:$0xff]   ;;  %3435 = vmatpush1.bf16.msra.mxu1 %v4266_v24 }
 0x91b   : > { %3436 = vmatprep.subr.bf16.mxu1 %v4271_v63 }
 0x91c   : > { %v2649_v13 = vadd.f32 %v2632_v30, %v2631_v29  ;;  %v2633_v46 = vmul.f32 %v5761_v31, %v5761_v31  ;;  %v2634_v18 = vmul.f32 %v5764_v47, %v5764_v47  ;;  %v4269_v29 = vld [vmem:[#allocation10 + $0x10] ss:$8 sps:$4 sm:$0xff]   ;;  %v4274_v30 = vld [vmem:[#allocation10 + $0x24] ss:$8 sps:$4 sm:$0xff]  }
 0x91d   : > { %v2593_v21 = vpop.xlane.xlu0 %2592 }
 0x91e   : > { %2650 = vadd.xlane.f32.xlu0 %v2649_v13  ;;  %v2607_v35 = vmul.f32 0.00390625, %v2593_v21  ;;  %v2652_v20 = vadd.f32 %v2634_v18, %v2633_v46  ;;  %3437 = vmatpush1.bf16.msra.mxu1 %v4269_v29  ;;  %v4275_v13 = vld [vmem:[#allocation10 + $0x30] ss:$8 sps:$4 sm:$0xff]   ;;  %v4280_v46 = vld [vmem:[#allocation10 + $0x44] ss:$8 sps:$4 sm:$0xff]  }
 0x91f   : > { %v2596_v15 = vpop.xlane.xlu1 %2595  ;;  %3438 = vmatprep.subr.bf16.mxu1 %v4274_v30  ;;  %v4278_v18 = vld [vmem:[#allocation10 + $0x40] ss:$8 sps:$4 sm:$0xff]   ;;  %v4283_v21 = vld [vmem:[#allocation10 + $0x54] ss:$8 sps:$4 sm:$0xff]  }
 0x920   : > { %v5775_v40 = vsub.f32 %v5664_v59, %v2607_v35  ;;  %v5778_v1 = vsub.f32 %v5718_v26, %v2607_v35  ;;  %v2608_v32 = vmul.f32 0.00390625, %v2596_v15  ;;  %2653 = vadd.xlane.f32.xlu1 %v2652_v20  ;;  %v4281_v35 = vld [vmem:[#allocation10 + $0x50] ss:$8 sps:$4 sm:$0xff]   ;;  %v4286_v20 = vld [vmem:[#allocation10 + $0x64] ss:$8 sps:$4 sm:$0xff]  }
 0x921   : > { %v4289_v15 = vld [vmem:[#allocation10 + $0x74] ss:$8 sps:$4 sm:$0xff]  }
 0x922   : > { %v5781_v16 = vsub.f32 %v5667_v7, %v2608_v32  ;;  %v5784_v37 = vsub.f32 %v5722_v42, %v2608_v32  ;;  %v2635_v12 = vmul.f32 %v5775_v40, %v5775_v40  ;;  %v2636_v59 = vmul.f32 %v5778_v1, %v5778_v1  ;;  %3439 = vmatpush1.bf16.msra.mxu1 %v4272_v14  ;;  %v4292_v32 = vld [vmem:[#allocation10 + $0x84] ss:$8 sps:$4 sm:$0xff]  }
 0x923   : > { %3440 = vmatprep.subr.bf16.mxu1 %v4277_v6 }
 0x924   : > { %v2655_v26 = vadd.f32 %v2636_v59, %v2635_v12  ;;  %v2637_v51 = vmul.f32 %v5781_v16, %v5781_v16  ;;  %v2638_v55 = vmul.f32 %v5784_v37, %v5784_v37  ;;  %v4290_v12 = vld [vmem:[#allocation10 + $0x80] ss:$8 sps:$4 sm:$0xff]   ;;  %v4295_v59 = vld [vmem:[#allocation10 + $0x94] ss:$8 sps:$4 sm:$0xff]  }
 0x925   : > { %v2599_v7 = vpop.xlane.xlu0 %2598 }
 0x926   : > { %v2609_v42 = vmul.f32 0.00390625, %v2599_v7  ;;  %2656 = vadd.xlane.f32.xlu0 %v2655_v26  ;;  %v2658_v23 = vadd.f32 %v2638_v55, %v2637_v51  ;;  %3441 = vmatpush1.bf16.msra.mxu1 %v4275_v13  ;;  %v4296_v26 = vld [vmem:[#allocation10 + $0xa0] ss:$8 sps:$4 sm:$0xff]  }
 0x927   : > { %v2602_v41 = vpop.xlane.xlu1 %2601  ;;  %3442 = vmatprep.subr.bf16.mxu1 %v4280_v46 }
 0x928   : > { %v5795_v44 = vsub.f32 %v5670_v33, %v2609_v42  ;;  %v5798_v9 = vsub.f32 %v5726_v56, %v2609_v42  ;;  %v2610_v25 = vmul.f32 0.00390625, %v2602_v41  ;;  %2659 = vadd.xlane.f32.xlu1 %v2658_v23  ;;  %v2577_v41 = vld [vmem:[%s6046_s1] sm:$0x3] }
 0x92a   : > { %v5801_v58 = vsub.f32 %v5672_v45, %v2610_v25  ;;  %v5804_v53 = vsub.f32 %v5730_v19, %v2610_v25  ;;  %v2639_v60 = vmul.f32 %v5795_v44, %v5795_v44  ;;  %v2640_v33 = vmul.f32 %v5798_v9, %v5798_v9  ;;  %v4256_v19 = vld [vmem:[#allocation9 + $0xc4] ss:$8 sps:$4 sm:$0xff]   ;;  %3443 = vmatpush1.bf16.msra.mxu1 %v4278_v18 }
 0x92b   : > { %3077 = vmatprep.subr.bf16.mxu0 %v4256_v19  ;;  %3444 = vmatprep.subr.bf16.mxu1 %v4283_v21  ;;  %v6111_v25 = vld [vmem:[#allocation21_spill] sm:$0xff] }
 0x92c   : > { %v2661_v56 = vadd.f32 %v2640_v33, %v2639_v60  ;;  %v2641_v57 = vmul.f32 %v5801_v58, %v5801_v58  ;;  %v2642_v17 = vmul.f32 %v5804_v53, %v5804_v53  ;;  %3078 = vmatpush1.bf16.msra.mxu0 %v4254_v61  ;;  %v5821_v60 = vrot.slane %v2577_v41, %v6111_v25 }
 0x92d   : > { %3079 = vmatprep.subr.bf16.mxu0 %v4259_v48  ;;  %v5824_v33 = vrot.slane %v2577_v41, %v5133_v52 }
 0x92e   : > { %2662 = vadd.xlane.f32.xlu0 %v2661_v56  ;;  %v2664_v45 = vadd.f32 %v2642_v17, %v2641_v57  ;;  %3445 = vmatpush1.bf16.msra.mxu1 %v4281_v35  ;;  %v5829_v57 = vrot.slane %v2578_v54, %v5133_v52 }
 0x92f   : > { %3446 = vmatprep.subr.bf16.mxu1 %v4286_v20 }
 0x930   : > { %2665 = vadd.xlane.f32.xlu1 %v2664_v45  ;;  %3080 = vmatpush1.bf16.msra.mxu0 %v4257_v3  ;;  %v5832_v45 = vrot.slane %v2578_v54, %v6111_v25 }
 0x931   : > { %3081 = vmatprep.subr.bf16.mxu0 %v4262_v34 }
 0x932   : > { %3447 = vmatpush1.bf16.msra.mxu1 %v4284_v43 }
 0x933   : > { %3448 = vmatprep.subr.bf16.mxu1 %v4289_v15 }
 0x934   : > { %3082 = vmatpush1.bf16.msra.mxu0 %v4260_v49 }
 0x935   : > { %3083 = vmatprep.subr.bf16.mxu0 %v4265_v62 }
 0x936   : > { %3449 = vmatpush1.bf16.msra.mxu1 %v4287_v50 }
 0x937   : > { %3450 = vmatprep.subr.bf16.mxu1 %v4292_v32 }
 0x938   : > { %3084 = vmatpush1.bf16.msra.mxu0 %v4263_v22 }
 0x93a   : > { %3451 = vmatpush1.bf16.msra.mxu1 %v4290_v12 }
 0x93b   : > { %3452 = vmatprep.subr.bf16.mxu1 %v4295_v59 }
 0x93e   : > { %3453 = vmatpush1.bf16.msra.mxu1 %v4293_v2 }
 0x93f   : > { %3454 = vmatprep.subr.bf16.mxu1 %v4298_v4 }
 0x942   : > { %3455 = vmatpush1.bf16.msra.mxu1 %v4296_v26 }
 0x998   : > { %v2645_v51 = vpop.xlane.xlu0 %2644 }
 0x999   : > { %v2667_v55 = vmul.f32 0.00390625, %v2645_v51 }
 0x99a   : > { %v2648_v7 = vpop.xlane.xlu1 %2647 }
 0x99b   : > { %v2675_v42 = vadd.f32 1e-05, %v2667_v55  ;;  %v2668_v23 = vmul.f32 0.00390625, %v2648_v7 }
 0x99d   : > { %4458 = vrsqrt.f32 %v2675_v42  ;;  %v2676_v8 = vadd.f32 1e-05, %v2668_v23 }
 0x99f   : > { %4460 = vrsqrt.f32 %v2676_v8 }
 0x9a7   : > { %v4459_v39 = vpop.eup %4458 }
 0x9a8   : > { %v2691_v0 = vmul.f32 %v4459_v39, %v5735_v36  ;;  %v2692_v56 = vmul.f32 %v4459_v39, %v5738_v10 }
 0x9a9   : > { %v4461_v17 = vpop.eup %4460 }
 0x9aa   : > { %v2693_v19 = vmul.f32 %v4461_v17, %v5741_v5  ;;  %v2694_v61 = vmul.f32 %v4461_v17, %v5744_v27  ;;  %v2719_v3 = vmul.f32 %v5824_v33, %v2692_v56  ;;  %v2718_v48 = vmul.f32 %v5821_v60, %v2691_v0 }
 0x9ab   : > { %v2651_v34 = vpop.xlane.xlu0 %2650 }
 0x9ac   : > { %v2669_v49 = vmul.f32 0.00390625, %v2651_v34  ;;  %v2721_v36 = vmul.f32 %v5824_v33, %v2694_v61  ;;  %v2746_v10 = vadd.f32 %v5829_v57, %v2719_v3  ;;  %v2720_v22 = vmul.f32 %v5821_v60, %v2693_v19 }
 0x9ad   : > { %v2654_v62 = vpop.xlane.xlu1 %2653  ;;  %v2745_v24 = vadd.f32 %v5832_v45, %v2718_v48 }
 0x9ae   : > { %v2677_v28 = vadd.f32 1e-05, %v2669_v49  ;;  %v2670_v63 = vmul.f32 0.00390625, %v2654_v62  ;;  %v2748_v5 = vadd.f32 %v5829_v57, %v2721_v36  ;;  %v2762_v27 = vadd.f32 3.0, %v2746_v10 }
 0x9af   : > { %v2747_v29 = vadd.f32 %v5832_v45, %v2720_v22  ;;  %v2761_v30 = vadd.f32 3.0, %v2745_v24 }
 0x9b0   : > { %4462 = vrsqrt.f32 %v2677_v28  ;;  %v2678_v14 = vadd.f32 1e-05, %v2670_v63  ;;  %v2764_v6 = vadd.f32 3.0, %v2748_v5  ;;  %v2778_v13 = vmax.f32 %v2762_v27, 0.0 }
 0x9b1   : > { %v2763_v46 = vadd.f32 3.0, %v2747_v29  ;;  %v2777_v18 = vmax.f32 %v2761_v30, 0.0 }
 0x9b2   : > { %4464 = vrsqrt.f32 %v2678_v14  ;;  %v2780_v21 = vmax.f32 %v2764_v6, 0.0  ;;  %v2794_v35 = vmin.f32 %v2778_v13, 6.0 }
 0x9b3   : > { %v2657_v20 = vpop.xlane.xlu0 %2656  ;;  %v2779_v43 = vmax.f32 %v2763_v46, 0.0  ;;  %v2793_v15 = vmin.f32 %v2777_v18, 6.0 }
 0x9b4   : > { %v2671_v50 = vmul.f32 0.00390625, %v2657_v20  ;;  %v2796_v32 = vmin.f32 %v2780_v21, 6.0  ;;  %v2810_v12 = vmul.f32 %v2794_v35, %v2746_v10 }
 0x9b5   : > { %v2660_v59 = vpop.xlane.xlu1 %2659  ;;  %v2795_v2 = vmin.f32 %v2779_v43, 6.0  ;;  %v2809_v4 = vmul.f32 %v2793_v15, %v2745_v24 }
 0x9b6   : > { %v2679_v26 = vadd.f32 1e-05, %v2671_v50  ;;  %v2672_v51 = vmul.f32 0.00390625, %v2660_v59  ;;  %v2812_v55 = vmul.f32 %v2796_v32, %v2748_v5  ;;  %v5844_v23 = vmul.f32 0.16666667, %v2810_v12 }
 0x9b7   : > { %v2811_v7 = vmul.f32 %v2795_v2, %v2747_v29  ;;  %v5848_v41 = vmul.f32 0.16666667, %v2809_v4 }
 0x9b8   : > { %4466 = vrsqrt.f32 %v2679_v26  ;;  %v2680_v42 = vadd.f32 1e-05, %v2672_v51  ;;  %v5846_v8 = vmul.f32 0.16666667, %v2812_v55 }
 0x9b9   : > { %v5850_v54 = vmul.f32 0.16666667, %v2811_v7 }
 0x9ba   : > { %v4463_v39 = vpop.eup %4462  ;;  %4468 = vrsqrt.f32 %v2680_v42  ;;  %v2842_v0 = vpack.c.bf16 %v5846_v8, %v5844_v23 }
 0x9bb   : > { %v2663_v56 = vpop.xlane.xlu0 %2662  ;;  %v2841_v17 = vpack.c.bf16 %v5850_v54, %v5848_v41  ;;  %v2696_v19 = vmul.f32 %v4463_v39, %v5758_v38  ;;  %v2695_v61 = vmul.f32 %v4463_v39, %v5755_v11 }
 0x9bc   : > { %v4465_v3 = vpop.eup %4464  ;;  %v2673_v48 = vmul.f32 0.00390625, %v2663_v56  ;;  %3085 = vmatprep.mubr.bf16.mxu0 %v2842_v0 }
 0x9bd   : > { %v2666_v34 = vpop.xlane.xlu1 %2665  ;;  %3086 = vmatmul.mubr.bf16.vlgmr.msra.gmra.mrb[48].mxu0 %v2841_v17  ;;  %v2698_v49 = vmul.f32 %v4465_v3, %v5764_v47  ;;  %v2723_v36 = vmul.f32 %v5824_v33, %v2696_v19  ;;  %v2697_v10 = vmul.f32 %v4465_v3, %v5761_v31  ;;  %v2722_v22 = vmul.f32 %v5821_v60, %v2695_v61 }
 0x9be   : > { %v2681_v62 = vadd.f32 1e-05, %v2673_v48  ;;  %v2674_v24 = vmul.f32 0.00390625, %v2666_v34 }
 0x9bf   : > { %v2725_v28 = vmul.f32 %v5824_v33, %v2698_v49  ;;  %v2750_v38 = vadd.f32 %v5829_v57, %v2723_v36  ;;  %v2724_v11 = vmul.f32 %v5821_v60, %v2697_v10  ;;  %v2749_v63 = vadd.f32 %v5832_v45, %v2722_v22 }
 0x9c0   : > { %4470 = vrsqrt.f32 %v2681_v62  ;;  %v2682_v5 = vadd.f32 1e-05, %v2674_v24 }
 0x9c1   : > { %v2752_v47 = vadd.f32 %v5829_v57, %v2725_v28  ;;  %v2766_v27 = vadd.f32 3.0, %v2750_v38  ;;  %v2751_v29 = vadd.f32 %v5832_v45, %v2724_v11  ;;  %v2765_v31 = vadd.f32 3.0, %v2749_v63 }
 0x9c2   : > { %v4467_v30 = vpop.eup %4466  ;;  %4472 = vrsqrt.f32 %v2682_v5 }
 0x9c3   : > { %v2768_v14 = vadd.f32 3.0, %v2752_v47  ;;  %v2782_v6 = vmax.f32 %v2766_v27, 0.0  ;;  %v2767_v13 = vadd.f32 3.0, %v2751_v29  ;;  %v2781_v46 = vmax.f32 %v2765_v31, 0.0 }
 0x9c4   : > { %v4469_v18 = vpop.eup %4468  ;;  %v2700_v21 = vmul.f32 %v4467_v30, %v5778_v1  ;;  %v2699_v35 = vmul.f32 %v4467_v30, %v5775_v40 }
 0x9c5   : > { %v2784_v20 = vmax.f32 %v2768_v14, 0.0  ;;  %v2798_v43 = vmin.f32 %v2782_v6, 6.0  ;;  %v2783_v15 = vmax.f32 %v2767_v13, 0.0  ;;  %v2797_v50 = vmin.f32 %v2781_v46, 6.0 }
 0x9c6   : > { %v2702_v32 = vmul.f32 %v4469_v18, %v5784_v37  ;;  %v2727_v12 = vmul.f32 %v5824_v33, %v2700_v21  ;;  %v2701_v59 = vmul.f32 %v4469_v18, %v5781_v16  ;;  %v2726_v2 = vmul.f32 %v5821_v60, %v2699_v35 }
 0x9c7   : > { %v2800_v4 = vmin.f32 %v2784_v20, 6.0  ;;  %v2814_v26 = vmul.f32 %v2798_v43, %v2750_v38  ;;  %v2799_v51 = vmin.f32 %v2783_v15, 6.0  ;;  %v2813_v55 = vmul.f32 %v2797_v50, %v2749_v63 }
 0x9c8   : > { %v2729_v1 = vmul.f32 %v5824_v33, %v2702_v32  ;;  %v2754_v40 = vadd.f32 %v5829_v57, %v2727_v12  ;;  %v2728_v7 = vmul.f32 %v5821_v60, %v2701_v59  ;;  %v2753_v42 = vadd.f32 %v5832_v45, %v2726_v2 }
 0x9c9   : > { %v2816_v39 = vmul.f32 %v2800_v4, %v2752_v47  ;;  %v5878_v37 = vmul.f32 0.16666667, %v2814_v26  ;;  %v2815_v0 = vmul.f32 %v2799_v51, %v2751_v29  ;;  %v5880_v56 = vmul.f32 0.16666667, %v2813_v55 }
 0x9ca   : > { %v4471_v16 = vpop.eup %4470  ;;  %v2756_v17 = vadd.f32 %v5829_v57, %v2729_v1  ;;  %v2770_v19 = vadd.f32 3.0, %v2754_v40  ;;  %v2755_v61 = vadd.f32 %v5832_v45, %v2728_v7  ;;  %v2769_v3 = vadd.f32 3.0, %v2753_v42 }
 0x9cb   : > { %v2703_v48 = vmul.f32 %v4471_v16, %v5795_v44  ;;  %v2704_v34 = vmul.f32 %v4471_v16, %v5798_v9  ;;  %v5886_v49 = vmul.f32 0.16666667, %v2816_v39  ;;  %v5888_v36 = vmul.f32 0.16666667, %v2815_v0 }
 0x9cc   : > { %v4473_v10 = vpop.eup %4472  ;;  %v2772_v22 = vadd.f32 3.0, %v2756_v17  ;;  %v2786_v62 = vmax.f32 %v2770_v19, 0.0  ;;  %v2771_v24 = vadd.f32 3.0, %v2755_v61  ;;  %v2785_v28 = vmax.f32 %v2769_v3, 0.0 }
 0x9cd   : > { %v2705_v38 = vmul.f32 %v4473_v10, %v5801_v58  ;;  %v2706_v11 = vmul.f32 %v4473_v10, %v5804_v53  ;;  %v2844_v63 = vpack.c.bf16 %v5886_v49, %v5878_v37  ;;  %v2843_v44 = vpack.c.bf16 %v5888_v36, %v5880_v56 }
 0x9ce   : > { %v2788_v9 = vmax.f32 %v2772_v22, 0.0  ;;  %v2802_v5 = vmin.f32 %v2786_v62, 6.0  ;;  %v2787_v47 = vmax.f32 %v2771_v24, 0.0  ;;  %v2801_v27 = vmin.f32 %v2785_v28, 6.0  ;;  %v4301_v22 = vld [vmem:[#allocation10 + $0xb4] ss:$8 sps:$4 sm:$0xff]  }
 0x9cf   : > { %3095 = vmatprep.mubr.bf16.mxu0 %v2844_v63  ;;  %v2731_v29 = vmul.f32 %v5824_v33, %v2704_v34  ;;  %v2733_v31 = vmul.f32 %v5824_v33, %v2706_v11  ;;  %v2730_v30 = vmul.f32 %v5821_v60, %v2703_v48  ;;  %v2732_v58 = vmul.f32 %v5821_v60, %v2705_v38  ;;  %v4299_v62 = vld [vmem:[#allocation10 + $0xb0] ss:$8 sps:$4 sm:$0xff]   ;;  %v4304_v24 = vld [vmem:[#allocation10 + $0xc4] ss:$8 sps:$4 sm:$0xff]   ;;  %v4302_v28 = vld [vmem:[#allocation10 + $0xc0] ss:$8 sps:$4 sm:$0xff]  }
 0x9d0   : > { %3096 = vmatmul.mubr.bf16.gmra.mrb[52].mxu0 %v2843_v44  ;;  %v2804_v53 = vmin.f32 %v2788_v9, 6.0  ;;  %v2818_v14 = vmul.f32 %v2802_v5, %v2754_v40  ;;  %v2803_v6 = vmin.f32 %v2787_v47, 6.0  ;;  %v2817_v13 = vmul.f32 %v2801_v27, %v2753_v42  ;;  %3456 = vmatprep.subr.bf16.mxu1 %v4301_v22  ;;  %v4307_v38 = vld [vmem:[#allocation10 + $0xd4] ss:$8 sps:$4 sm:$0xff]   ;;  %v4305_v11 = vld [vmem:[#allocation10 + $0xd0] ss:$8 sps:$4 sm:$0xff]  }
 0x9d1   : > { %v2758_v46 = vadd.f32 %v5829_v57, %v2731_v29  ;;  %v2760_v18 = vadd.f32 %v5829_v57, %v2733_v31  ;;  %v2757_v21 = vadd.f32 %v5832_v45, %v2730_v30  ;;  %v2759_v35 = vadd.f32 %v5832_v45, %v2732_v58  ;;  %3457 = vmatpush1.bf16.msra.mxu1 %v4299_v62  ;;  %v4310_v63 = vld [vmem:[#allocation10 + $0xe4] ss:$8 sps:$4 sm:$0xff]   ;;  %v4308_v44 = vld [vmem:[#allocation10 + $0xe0] ss:$8 sps:$4 sm:$0xff]   ;;  %v4311_v9 = vld [vmem:[#allocation10 + $0xf0] ss:$8 sps:$4 sm:$0xff]  }
 0x9d2   : > { %v2820_v20 = vmul.f32 %v2804_v53, %v2756_v17  ;;  %v5904_v43 = vmul.f32 0.16666667, %v2818_v14  ;;  %v2819_v33 = vmul.f32 %v2803_v6, %v2755_v61  ;;  %v5908_v59 = vmul.f32 0.16666667, %v2817_v13  ;;  %3458 = vmatprep.subr.bf16.mxu1 %v4304_v24  ;;  %v4313_v5 = vld [vmem:[#allocation10 + $0xf4] ss:$8 sps:$4 sm:$0xff]  }
 0x9d3   : > { %v2774_v15 = vadd.f32 3.0, %v2758_v46  ;;  %v2776_v50 = vadd.f32 3.0, %v2760_v18  ;;  %v2773_v60 = vadd.f32 3.0, %v2757_v21  ;;  %v2775_v32 = vadd.f32 3.0, %v2759_v35  ;;  %v2881_v47 = vld [vmem:[%s6052_s7] sm:$0x3] }
 0x9d4   : > { %v5906_v12 = vmul.f32 0.16666667, %v2820_v20  ;;  %v5910_v2 = vmul.f32 0.16666667, %v2819_v33  ;;  %v5932_v27 = vrot.slane %v2881_v47, %v6111_v25  ;;  %v5935_v29 = vrot.slane %v2881_v47, %v5133_v52 }
 0x9d5   : > { %v2790_v4 = vmax.f32 %v2774_v15, 0.0  ;;  %v2792_v57 = vmax.f32 %v2776_v50, 0.0  ;;  %v2789_v26 = vmax.f32 %v2773_v60, 0.0  ;;  %v2791_v51 = vmax.f32 %v2775_v32, 0.0  ;;  %3459 = vmatpush1.bf16.msra.mxu1 %v4302_v28 }
 0x9d6   : > { %v2846_v45 = vpack.c.bf16 %v5906_v12, %v5904_v43  ;;  %v2845_v55 = vpack.c.bf16 %v5910_v2, %v5908_v59  ;;  %3460 = vmatprep.subr.bf16.mxu1 %v4307_v38 }
 0x9d7   : > { %v2806_v1 = vmin.f32 %v2790_v4, 6.0  ;;  %v2808_v40 = vmin.f32 %v2792_v57, 6.0  ;;  %v2805_v7 = vmin.f32 %v2789_v26, 6.0  ;;  %v2807_v42 = vmin.f32 %v2791_v51, 6.0 }
 0x9d8   : > { %3105 = vmatprep.mubr.bf16.mxu0 %v2846_v45 }
 0x9d9   : > { %3106 = vmatmul.mubr.bf16.gmra.mrb[56].mxu0 %v2845_v55  ;;  %v2822_v39 = vmul.f32 %v2806_v1, %v2758_v46  ;;  %v2824_v0 = vmul.f32 %v2808_v40, %v2760_v18  ;;  %v2821_v16 = vmul.f32 %v2805_v7, %v2757_v21  ;;  %v2823_v17 = vmul.f32 %v2807_v42, %v2759_v35 }
 0x9da   : > { %3461 = vmatpush1.bf16.msra.mxu1 %v4305_v11 }
 0x9db   : > { %v5916_v19 = vmul.f32 0.16666667, %v2822_v39  ;;  %v5918_v61 = vmul.f32 0.16666667, %v2824_v0  ;;  %v5920_v3 = vmul.f32 0.16666667, %v2821_v16  ;;  %3462 = vmatprep.subr.bf16.mxu1 %v4310_v63 }
 0x9dc   : > { %v5922_v48 = vmul.f32 0.16666667, %v2823_v17 }
 0x9dd   : > { %v2848_v34 = vpack.c.bf16 %v5918_v61, %v5916_v19 }
 0x9de   : > { %v2847_v10 = vpack.c.bf16 %v5922_v48, %v5920_v3  ;;  %3463 = vmatpush1.bf16.msra.mxu1 %v4308_v44 }
 0x9df   : > { %3115 = vmatprep.mubr.bf16.mxu0 %v2848_v34  ;;  %3464 = vmatprep.subr.bf16.mxu1 %v4313_v5 }
 0x9e1   : > { %3116 = vmatmul.mubr.bf16.gmra.mrb[60].mxu0 %v2847_v10 }
 0x9e2   : > { %3465 = vmatpush1.bf16.msra.mxu1 %v4311_v9 }
 0xa90   : > { %v3087_v31 = vpop.f32.mrb[48].mxu0 }
 0xa91   : > { %v3088_v30 = vadd.f32 %v3087_v31, %v5932_v27  ;;  %v3089_v58 = vpop.f32.mrb[49].mxu0 }
 0xa92   : > { %v3090_v53 = vadd.f32 %v3089_v58, %v5935_v29  ;;  %v3091_v14 = vpop.f32.mrb[50].mxu0 }
 0xa93   : > { %v3126_v6 = vadd.f32 3.0, %v3088_v30  ;;  %v3092_v13 = vadd.f32 %v3091_v14, %v5932_v27  ;;  %v3093_v46 = vpop.f32.mrb[51].mxu0 }
 0xa94   : > { %v3127_v18 = vadd.f32 3.0, %v3090_v53  ;;  %v3094_v21 = vadd.f32 %v3093_v46, %v5935_v29 }
 0xa95   : > { %v3142_v35 = vmax.f32 %v3126_v6, 0.0  ;;  %v3128_v20 = vadd.f32 3.0, %v3092_v13 }
 0xa96   : > { %v3143_v33 = vmax.f32 %v3127_v18, 0.0  ;;  %v3129_v15 = vadd.f32 3.0, %v3094_v21 }
 0xa97   : > { %v3158_v50 = vmin.f32 %v3142_v35, 6.0  ;;  %v3144_v60 = vmax.f32 %v3128_v20, 0.0 }
 0xa98   : > { %v3159_v32 = vmin.f32 %v3143_v33, 6.0  ;;  %v3145_v4 = vmax.f32 %v3129_v15, 0.0 }
 0xa99   : > { %v3174_v57 = vmul.f32 %v3158_v50, %v3088_v30  ;;  %v3160_v26 = vmin.f32 %v3144_v60, 6.0 }
 0xa9a   : > { %v3175_v51 = vmul.f32 %v3159_v32, %v3090_v53  ;;  %v3161_v45 = vmin.f32 %v3145_v4, 6.0 }
 0xa9b   : > { %v3190_v55 = vmul.f32 0.16666667, %v3174_v57  ;;  %v3176_v1 = vmul.f32 %v3160_v26, %v3092_v13 }
 0xa9c   : > { %v3191_v40 = vmul.f32 0.16666667, %v3175_v51  ;;  %v3177_v7 = vmul.f32 %v3161_v45, %v3094_v21 }
 0xa9d   : > { %v3192_v42 = vmul.f32 0.16666667, %v3176_v1  ;;  %v3206_v0 = vadd.f32 %v3190_v55, %v5848_v41 }
 0xa9e   : > { %v3193_v39 = vmul.f32 0.16666667, %v3177_v7  ;;  %v3207_v17 = vadd.f32 %v3191_v40, %v5844_v23 }
 0xa9f   : > { %v3208_v16 = vadd.f32 %v3192_v42, %v5850_v54 }
 0xaa0   : > { %v3209_v34 = vadd.f32 %v3193_v39, %v5846_v8 }
 0xaa1   : > { %v3222_v10 = vpack.c.bf16 %v3208_v16, %v3206_v0 }
 0xaa2   : > { %v3223_v22 = vpack.c.bf16 %v3209_v34, %v3207_v17 }
 0xaa3   : > { %v3097_v62 = vpop.f32.mrb[52].mxu0 }
 0xaa4   : > { %v3098_v24 = vadd.f32 %v3097_v62, %v5932_v27  ;;  %v3099_v28 = vpop.f32.mrb[53].mxu0  ;;  %3466 = vmatprep.mubr.bf16.mxu1 %v3223_v22 }
 0xaa5   : > { %v3100_v38 = vadd.f32 %v3099_v28, %v5935_v29  ;;  %v3101_v11 = vpop.f32.mrb[54].mxu0  ;;  %3467 = vmatmul.mubr.bf16.vlgmr.msra.gmra.mrb[64].mxu1 %v3222_v10 }
 0xaa6   : > { %v3130_v63 = vadd.f32 3.0, %v3098_v24  ;;  %v3102_v41 = vadd.f32 %v3101_v11, %v5932_v27  ;;  %v3103_v44 = vpop.f32.mrb[55].mxu0 }
 0xaa7   : > { %v3131_v54 = vadd.f32 3.0, %v3100_v38  ;;  %v3104_v23 = vadd.f32 %v3103_v44, %v5935_v29 }
 0xaa8   : > { %v3146_v9 = vmax.f32 %v3130_v63, 0.0  ;;  %v3132_v8 = vadd.f32 3.0, %v3102_v41 }
 0xaa9   : > { %v3147_v5 = vmax.f32 %v3131_v54, 0.0  ;;  %v3133_v47 = vadd.f32 3.0, %v3104_v23 }
 0xaaa   : > { %v3162_v31 = vmin.f32 %v3146_v9, 6.0  ;;  %v3148_v30 = vmax.f32 %v3132_v8, 0.0 }
 0xaab   : > { %v3163_v58 = vmin.f32 %v3147_v5, 6.0  ;;  %v3149_v53 = vmax.f32 %v3133_v47, 0.0 }
 0xaac   : > { %v3178_v14 = vmul.f32 %v3162_v31, %v3098_v24  ;;  %v3164_v6 = vmin.f32 %v3148_v30, 6.0  ;;  %v3107_v13 = vpop.f32.mrb[56].mxu0 }
 0xaad   : > { %v3179_v46 = vmul.f32 %v3163_v58, %v3100_v38  ;;  %v3165_v18 = vmin.f32 %v3149_v53, 6.0  ;;  %v3108_v21 = vadd.f32 %v3107_v13, %v5932_v27  ;;  %v3109_v35 = vpop.f32.mrb[57].mxu0 }
 0xaae   : > { %v3194_v20 = vmul.f32 0.16666667, %v3178_v14  ;;  %v3180_v33 = vmul.f32 %v3164_v6, %v3102_v41  ;;  %v3110_v15 = vadd.f32 %v3109_v35, %v5935_v29  ;;  %v3111_v50 = vpop.f32.mrb[58].mxu0 }
 0xaaf   : > { %v3195_v60 = vmul.f32 0.16666667, %v3179_v46  ;;  %v3181_v32 = vmul.f32 %v3165_v18, %v3104_v23  ;;  %v3134_v4 = vadd.f32 3.0, %v3108_v21  ;;  %v3112_v57 = vadd.f32 %v3111_v50, %v5932_v27  ;;  %v3113_v26 = vpop.f32.mrb[59].mxu0 }
 0xab0   : > { %v3196_v51 = vmul.f32 0.16666667, %v3180_v33  ;;  %v3135_v45 = vadd.f32 3.0, %v3110_v15  ;;  %v3114_v55 = vadd.f32 %v3113_v26, %v5935_v29  ;;  %v3210_v42 = vadd.f32 %v3194_v20, %v5880_v56 }
 0xab1   : > { %v3197_v1 = vmul.f32 0.16666667, %v3181_v32  ;;  %v3150_v40 = vmax.f32 %v3134_v4, 0.0  ;;  %v3136_v7 = vadd.f32 3.0, %v3112_v57  ;;  %v3211_v17 = vadd.f32 %v3195_v60, %v5878_v37 }
 0xab2   : > { %v3212_v39 = vadd.f32 %v3196_v51, %v5888_v36  ;;  %v3151_v0 = vmax.f32 %v3135_v45, 0.0  ;;  %v3137_v16 = vadd.f32 3.0, %v3114_v55 }
 0xab3   : > { %v3213_v34 = vadd.f32 %v3197_v1, %v5886_v49  ;;  %v3166_v10 = vmin.f32 %v3150_v40, 6.0  ;;  %v3152_v22 = vmax.f32 %v3136_v7, 0.0 }
 0xab4   : > { %v3167_v62 = vmin.f32 %v3151_v0, 6.0  ;;  %v3153_v24 = vmax.f32 %v3137_v16, 0.0  ;;  %v3117_v28 = vpop.f32.mrb[60].mxu0  ;;  %v3224_v38 = vpack.c.bf16 %v3212_v39, %v3210_v42 }
 0xab5   : > { %v3182_v11 = vmul.f32 %v3166_v10, %v3108_v21  ;;  %v3168_v63 = vmin.f32 %v3152_v22, 6.0  ;;  %v3118_v41 = vadd.f32 %v3117_v28, %v5932_v27  ;;  %v3119_v44 = vpop.f32.mrb[61].mxu0  ;;  %v3225_v56 = vpack.c.bf16 %v3213_v34, %v3211_v17  ;;  %v3262_v17 = vld [vmem:[%s6054_s9] sm:$0x3] }
 0xab6   : > { %v3183_v54 = vmul.f32 %v3167_v62, %v3110_v15  ;;  %v3169_v36 = vmin.f32 %v3153_v24, 6.0  ;;  %v3120_v23 = vadd.f32 %v3119_v44, %v5935_v29  ;;  %v3121_v9 = vpop.f32.mrb[62].mxu0  ;;  %v3267_v34 = vrot.slane %v3262_v17, %v6111_v25 }
 0xab7   : > { %v3198_v37 = vmul.f32 0.16666667, %v3182_v11  ;;  %v3184_v8 = vmul.f32 %v3168_v63, %v3112_v57  ;;  %v3138_v49 = vadd.f32 3.0, %v3118_v41  ;;  %v3122_v5 = vadd.f32 %v3121_v9, %v5932_v27  ;;  %v3123_v47 = vpop.f32.mrb[63].mxu0  ;;  %3476 = vmatprep.mubr.bf16.mxu1 %v3225_v56 }
 0xab8   : > { %v3199_v31 = vmul.f32 0.16666667, %v3183_v54  ;;  %v3185_v30 = vmul.f32 %v3169_v36, %v3114_v55  ;;  %v3139_v58 = vadd.f32 3.0, %v3120_v23  ;;  %v3124_v53 = vadd.f32 %v3123_v47, %v5935_v29  ;;  %3477 = vmatmul.mubr.bf16.gmra.mrb[68].mxu1 %v3224_v38 }
 0xab9   : > { %v3200_v14 = vmul.f32 0.16666667, %v3184_v8  ;;  %v3154_v6 = vmax.f32 %v3138_v49, 0.0  ;;  %v3140_v13 = vadd.f32 3.0, %v3122_v5  ;;  %v3214_v35 = vadd.f32 %v3198_v37, %v5908_v59 }
 0xaba   : > { %v3201_v46 = vmul.f32 0.16666667, %v3185_v30  ;;  %v3155_v18 = vmax.f32 %v3139_v58, 0.0  ;;  %v3141_v21 = vadd.f32 3.0, %v3124_v53  ;;  %v3215_v15 = vadd.f32 %v3199_v31, %v5904_v43 }
 0xabb   : > { %v3216_v20 = vadd.f32 %v3200_v14, %v5910_v2  ;;  %v3170_v33 = vmin.f32 %v3154_v6, 6.0  ;;  %v3156_v27 = vmax.f32 %v3140_v13, 0.0  ;;  %v3271_v10 = vrot.slane %v3262_v17, %v5133_v52 }
 0xabc   : > { %v3217_v50 = vadd.f32 %v3201_v46, %v5906_v12  ;;  %v3171_v60 = vmin.f32 %v3155_v18, 6.0  ;;  %v3157_v32 = vmax.f32 %v3141_v21, 0.0 }
 0xabd   : > { %v3186_v29 = vmul.f32 %v3170_v33, %v3118_v41  ;;  %v3172_v4 = vmin.f32 %v3156_v27, 6.0  ;;  %v3226_v57 = vpack.c.bf16 %v3216_v20, %v3214_v35 }
 0xabe   : > { %v3187_v26 = vmul.f32 %v3171_v60, %v3120_v23  ;;  %v3173_v51 = vmin.f32 %v3157_v32, 6.0  ;;  %v3227_v45 = vpack.c.bf16 %v3217_v50, %v3215_v15 }
 0xabf   : > { %v3202_v55 = vmul.f32 0.16666667, %v3186_v29  ;;  %v3188_v1 = vmul.f32 %v3172_v4, %v3122_v5 }
 0xac0   : > { %v3203_v40 = vmul.f32 0.16666667, %v3187_v26  ;;  %v3189_v59 = vmul.f32 %v3173_v51, %v3124_v53  ;;  %3486 = vmatprep.mubr.bf16.mxu1 %v3227_v45 }
 0xac1   : > { %v3204_v2 = vmul.f32 0.16666667, %v3188_v1  ;;  %3487 = vmatmul.mubr.bf16.gmra.mrb[72].mxu1 %v3226_v57  ;;  %v3218_v43 = vadd.f32 %v3202_v55, %v5920_v3 }
 0xac2   : > { %v3205_v7 = vmul.f32 0.16666667, %v3189_v59  ;;  %v3219_v42 = vadd.f32 %v3203_v40, %v5916_v19 }
 0xac3   : > { %v3220_v12 = vadd.f32 %v3204_v2, %v5922_v48 }
 0xac4   : > { %v3221_v39 = vadd.f32 %v3205_v7, %v5918_v61 }
 0xac5   : > { %v3228_v0 = vpack.c.bf16 %v3220_v12, %v3218_v43 }
 0xac6   : > { %v3229_v16 = vpack.c.bf16 %v3221_v39, %v3219_v42 }
 0xac8   : > { %3496 = vmatprep.mubr.bf16.mxu1 %v3229_v16 }
 0xac9   : > { %3497 = vmatmul.mubr.bf16.gmra.mrb[76].mxu1 %v3228_v0 }
 0xb78   : > { %v3468_v3 = vpop.f32.mrb[64].mxu1 }
 0xb79   : > { %v3469_v22 = vadd.f32 %v3468_v3, %v3267_v34  ;;  %v3470_v62 = vpop.f32.mrb[65].mxu1 }
 0xb7a   : > { %v3471_v48 = vadd.f32 %v3470_v62, %v3271_v10  ;;  %v3472_v24 = vpop.f32.mrb[66].mxu1 }
 0xb7b   : > { %3507 = vst [vmem:[%s5976_s3] sm:$0xff] %v3469_v22  ;;  %v3473_v19 = vadd.f32 %v3472_v24, %v3267_v34  ;;  %v3474_v25 = vpop.f32.mrb[67].mxu1 }
 0xb7c   : > { %3508 = vst [vmem:[%s5976_s3 + $0x8] sm:$0xff] %v3471_v48  ;;  %v3475_v52 = vadd.f32 %v3474_v25, %v3271_v10 }
 0xb7d   : > { %3509 = vst [vmem:[%s5976_s3 + $0x10] sm:$0xff] %v3473_v19 }
 0xb7e   : > { %3510 = vst [vmem:[%s5976_s3 + $0x18] sm:$0xff] %v3475_v52 }
 0xb8b   : > { %v3478_v61 = vpop.f32.mrb[68].mxu1 }
 0xb8c   : > { %v3479_v28 = vadd.f32 %v3478_v61, %v3267_v34  ;;  %v3480_v38 = vpop.f32.mrb[69].mxu1 }
 0xb8d   : > { %v3481_v11 = vadd.f32 %v3480_v38, %v3271_v10  ;;  %v3482_v63 = vpop.f32.mrb[70].mxu1 }
 0xb8e   : > { %3511 = vst [vmem:[%s5976_s3 + $0x20] sm:$0xff] %v3479_v28  ;;  %v3483_v41 = vadd.f32 %v3482_v63, %v3267_v34  ;;  %v3484_v44 = vpop.f32.mrb[71].mxu1 }
 0xb8f   : > { %3512 = vst [vmem:[%s5976_s3 + $0x28] sm:$0xff] %v3481_v11  ;;  %v3485_v56 = vadd.f32 %v3484_v44, %v3271_v10 }
 0xb90   : > { %3513 = vst [vmem:[%s5976_s3 + $0x30] sm:$0xff] %v3483_v41 }
 0xb91   : > { %3514 = vst [vmem:[%s5976_s3 + $0x38] sm:$0xff] %v3485_v56 }
 0xb94   : > { %v3488_v54 = vpop.f32.mrb[72].mxu1 }
 0xb95   : > { %v3489_v36 = vadd.f32 %v3488_v54, %v3267_v34  ;;  %v3490_v23 = vpop.f32.mrb[73].mxu1 }
 0xb96   : > { %v3491_v9 = vadd.f32 %v3490_v23, %v3271_v10  ;;  %v3492_v37 = vpop.f32.mrb[74].mxu1 }
 0xb97   : > { %3515 = vst [vmem:[%s5976_s3 + $0x40] sm:$0xff] %v3489_v36  ;;  %v3493_v8 = vadd.f32 %v3492_v37, %v3267_v34  ;;  %v3494_v49 = vpop.f32.mrb[75].mxu1 }
 0xb98   : > { %3516 = vst [vmem:[%s5976_s3 + $0x48] sm:$0xff] %v3491_v9  ;;  %v3495_v5 = vadd.f32 %v3494_v49, %v3271_v10 }
 0xb99   : > { %3517 = vst [vmem:[%s5976_s3 + $0x50] sm:$0xff] %v3493_v8 }
 0xb9a   : > { %3518 = vst [vmem:[%s5976_s3 + $0x58] sm:$0xff] %v3495_v5 }
 0xb9c   : > { %v3498_v47 = vpop.f32.mrb[76].mxu1 }
 0xb9d   : > { %v3499_v31 = vadd.f32 %v3498_v47, %v3267_v34  ;;  %v3500_v30 = vpop.f32.mrb[77].mxu1 }
 0xb9e   : > { %v3501_v58 = vadd.f32 %v3500_v30, %v3271_v10  ;;  %v3502_v53 = vpop.f32.mrb[78].mxu1 }
 0xb9f   : > { %3519 = vst [vmem:[%s5976_s3 + $0x60] sm:$0xff] %v3499_v31  ;;  %v3503_v14 = vadd.f32 %v3502_v53, %v3267_v34  ;;  %v3504_v6 = vpop.f32.mrb[79].mxu1 }
 0xba0   : > { %3520 = vst [vmem:[%s5976_s3 + $0x68] sm:$0xff] %v3501_v58  ;;  %v3505_v13 = vadd.f32 %v3504_v6, %v3271_v10 }
 0xba1   : > { %3521 = vst [vmem:[%s5976_s3 + $0x70] sm:$0xff] %v3503_v14 }
 0xba2   : > { %3522 = vst [vmem:[%s5976_s3 + $0x78] sm:$0xff] %v3505_v13 }
 0xba3   : > { %4616 = shalt.err (!%p4613_p4)
}
 0xba4   : > { %s4617_s11 = scalar_lea.hbm %s5996_s25, 2048  ;;  %s4621_s22 = scalar_lea.hbm %s6055_s10, 4096 }
 0xba5   : > { %p4618_p8 = scmp.ne.s32.totalorder %s5996_s25, %s4617_s11  ;;  %p4622_p10 = scmp.lt.u32.totalorder %s5996_s25, %s6055_s10 }
 0xba6   : > { %p4623_p3 = scmp.lt.u32.totalorder %s4621_s22, %s4617_s11  ;;  %p4625_p5 = scmp.lt.u32.totalorder %s4617_s11, %s5996_s25 }
 0xba7   : > { %p4619_p9 = pnand %p4618_p8, %p4906_p12 }
 0xba8   : > { %p4624_p1 = por %p4623_p3, %p4622_p10 }
 0xba9   : > { %p4620_p0 = pneg %p4619_p9 }
 0xbaa   : > { %p4626_p7 = por %p4625_p5, %p4624_p1 }
 0xbac   : > { %p4627_p13 = pnand %p4626_p7, %p4620_p0 }
 0xbae   : > { %4630 = shalt.err (!%p4627_p13)
}
 0xbaf   : > { %s4701_s5 = smov 256   ;;  %s4702_s12 = smov 16  }
 0xbb0   : > { %3995 = dma.vmem_to_hbm [thread:$0]  (%p4906_p12), %s5998_s29, 2048, %s5996_s25, %s3524_s17, %s4701_s5, %s4701_s5, %s4702_s12  }
 0xbb1 PF: > { %s6112_s20 = sld [smem:[#allocation19_spill]]  ;;  %s6113_s23 = sld [smem:[#allocation20_spill]] }
 0xbb2   : > { %p6115_p6 = scmp.ge.s32.totalorder %s4685_s16, 2 }
 0xbb7   : > { %s3553_s27 = sand.u32 1, %s6112_s20   ;;  %p6114_p2 = scmp.ne.s32.totalorder %s6113_s23, 0 }
 0xbb8   : > { %s3554_s28 = scalar_lea.sflag [#allocation4], %s3553_s27 }
 0xbb9   : > { %p4015_p11 = pnand %p6115_p6, %p6114_p2 }
 0xbbb   : > { %4668 = dma.done.wait (!%p4015_p11), %s3554_s28, 2048  }
 0xbbc   : > { %4670 = vsyncadd (!%p4015_p11), %s3554_s28, 4294965248  ;;  %s6116_s11 = smov %s4896_s13  ;;  %p26_p4 = scmp.ge.s32.totalorder %s4896_s13, 4  }
 0xbbd   : > { %s6117_s13 = smov %s4677_s14  ;;  %s6118_s14 = smov %s4681_s15 }
 0xbbe   : > { %s6119_s15 = smov %s4912_s30  ;;  %s6120_s16 = smov %s6116_s11 }
 0xbbf   :  { %28 = sbr.rel (!%p26_p4) target bundleno = 11 (0xb), region = 122 }
 0xbc6   :  { %3559 = vsyncpa [#allocation3], 1 }
 0xbc7   :  { %3561 = vsyncpa [#allocation3 + $0x1], 1 }
 0xbc8   :  { %3562 = vsyncpa [#allocation7], 1 }
 0xbc9   :  { %3563 = vsyncpa [#allocation11], 1 }
 0xbca   :  { %3564 = vsyncpa [#allocation4], 1 }
 0xbcb   :  { %3566 = vsyncpa [#allocation4 + $0x1], 1 }
 0xbcc   :  { %3567 = vsyncpa [#allocation5], 1 }
 0xbcd   :  { %3569 = vsyncpa [#allocation5 + $0x1], 1 }

</bundles_post_ra>
